<compile_context>
chip_gen: v7x
topology: tpu7x:2x2x1
jax: 0.10.0
libtpu: 0.0.40
codegen_flags: <defaults>
</compile_context>

<pallas_src>
import numpy as np

import jax
import jax.numpy as jnp
from jax.experimental import pallas as pl
from jax.experimental.pallas import tpu as pltpu


# ---------------------------------------------------------------------------
# parameters (torch layout) + pure-JAX reference (used only for the check)
# ---------------------------------------------------------------------------
def init_g_nlayers_params(key, output_nc=3, nz=16, ngf=8, n_layers=3):
    """Deterministic synthetic parameters; shapes follow G_NLayers.__init__."""
    cfgs = [(nz, ngf * 4, 4, 1, 0, "relu")]
    nf_mult = 4
    for n in range(n_layers, 0, -1):
        nf_mult_prev = nf_mult
        nf_mult = min(n, 4)
        cfgs.append((ngf * nf_mult_prev, ngf * nf_mult, 4, 2, 1, "relu"))
    cfgs.append((ngf, output_nc, 4, 2, 1, "tanh"))

    params = []
    for cin, cout, k, s, p, act in cfgs:
        key, wk, bk = jax.random.split(key, 3)
        fan = cin * k * k
        w = jax.random.normal(wk, (cin, cout, k, k), jnp.float32) / jnp.sqrt(
            jnp.asarray(fan, jnp.float32))
        b = jax.random.normal(bk, (cout,), jnp.float32) * 0.01
        params.append({"w": w, "b": b, "stride": s, "padding": p, "act": act})
    return params


def _ref_conv_transpose(x, w, b, stride, padding):
    """Reference ConvTranspose2d (PyTorch semantics) via lax.conv_general_dilated."""
    k = w.shape[2]
    w_f = jnp.transpose(jnp.flip(w, (2, 3)), (1, 0, 2, 3))   # OIHW, flipped
    pad = k - 1 - padding
    y = jax.lax.conv_general_dilated(
        x, w_f, window_strides=(1, 1), padding=[(pad, pad), (pad, pad)],
        lhs_dilation=(stride, stride),
        dimension_numbers=("NCHW", "OIHW", "NCHW"))
    return y + b.reshape(1, -1, 1, 1)


def ref_forward(x_nchw, params):
    h = x_nchw
    for lp in params:
        h = _ref_conv_transpose(h, lp["w"], lp["b"], lp["stride"], lp["padding"])
        h = jnp.tanh(h) if lp["act"] == "tanh" else jnp.maximum(h, 0.0)
    return h


# ---------------------------------------------------------------------------
# one-time weight preparation (hoisted out of the forward pass)
# ---------------------------------------------------------------------------
def _prepare_operands(params):
    # ---- layer 0: ConvT(nz -> C0, k4, s1, p0) on a 1x1 input ---------------
    w0 = np.asarray(params[0]["w"], np.float32)          # (nz, C0, 4, 4)
    b0 = np.asarray(params[0]["b"], np.float32)          # (C0,)
    nz, c0 = w0.shape[0], w0.shape[1]
    assert w0.shape[2] == 4 and params[0]["stride"] == 1 and params[0]["padding"] == 0
    # y0[oh*4*C0 + ow*C0 + co] = sum_ci x[ci] * w0[ci, co, oh, ow]
    w0m = np.transpose(w0, (0, 2, 3, 1)).reshape(nz, 4 * 4 * c0)
    b0row = np.tile(b0, 16).reshape(1, 16 * c0)

    # ---- stride-2 layers: sub-pixel block-Toeplitz matrices ----------------
    # B[krow][iw*Cin+ci, ow*Cp+co] = W[ci, co, krow, kw] with kw = ow - 2*iw + 1
    # (width taps, channel mixing and W-boundary all folded into the RHS).
    sizes, cins, cps, acts, ups = [], [], [], [], []
    s_in = 4
    n_up = len(params) - 1
    for li, lp in enumerate(params[1:]):
        w = np.asarray(lp["w"], np.float32)              # (Cin, Cout, 4, 4)
        b = np.asarray(lp["b"], np.float32)
        assert w.shape[2] == 4 and lp["stride"] == 2 and lp["padding"] == 1
        cin, cout = w.shape[0], w.shape[1]
        last = li == n_up - 1
        cp = (-(-cout // 4) * 4) if last else cout       # lane-dense final rows
        s_out = 2 * s_in
        B = np.zeros((4, s_in * cin, s_out * cp), np.float32)
        for krow in range(4):
            for iw in range(s_in):
                for ow in range(s_out):
                    kw = ow - 2 * iw + 1
                    if 0 <= kw < 4:
                        B[krow, iw * cin:(iw + 1) * cin,
                          ow * cp:ow * cp + cout] = w[:, :, krow, kw]
        brow = np.zeros((1, s_out * cp), np.float32)
        for ow in range(s_out):
            brow[0, ow * cp:ow * cp + cout] = b
        ups.append((jnp.asarray(B, jnp.bfloat16), jnp.asarray(brow, jnp.float32)))
        sizes.append(s_in)
        cins.append(cin)
        cps.append(cp)
        acts.append(lp["act"])
        s_in = s_out

    assert cins[0] == c0
    return {
        "nz": nz,
        "w0m": jnp.asarray(w0m, jnp.bfloat16),
        "b0row": jnp.asarray(b0row, jnp.float32),
        "ups": ups,
        "sizes": tuple(sizes), "cins": tuple(cins), "cps": tuple(cps),
        "acts": tuple(acts),
        "s_final": s_in, "cp_final": cps[-1],
        "out_nc": int(params[-1]["w"].shape[1]),
    }


# ---------------------------------------------------------------------------
# fused Pallas kernel (whole network, one grid step per batch sample)
# ---------------------------------------------------------------------------
def _make_kernel(nz, sizes, cins, cps, acts):
    n_up = len(sizes)
    f32 = jnp.float32
    bf16 = jnp.bfloat16
    h0 = sizes[0]
    l0 = h0 * cins[0]                  # row width of the first activation slab

    def interleave(even, odd, h):
        """Exact bf16 row interleave (+ zero H-pad rows) via 0/1 MXU matmuls."""
        rows = 2 * h + 2
        r = jax.lax.broadcasted_iota(jnp.int32, (rows, h), 0)
        m = jax.lax.broadcasted_iota(jnp.int32, (rows, h), 1)
        p_even = (r == 2 * m + 1).astype(bf16)
        p_odd = (r == 2 * m + 2).astype(bf16)
        out = (jnp.dot(p_even, even, preferred_element_type=f32) +
               jnp.dot(p_odd, odd, preferred_element_type=f32))
        return out.astype(bf16)

    def kernel(*refs):
        x_ref, w0_ref, b0_ref = refs[0], refs[1], refs[2]
        o_ref = refs[3 + 2 * n_up]
        scratch = refs[4 + 2 * n_up:]

        # ---- layer 0: 1x1 -> 4x4, ReLU (single small matmul) ---------------
        x = jnp.broadcast_to(x_ref[0].astype(bf16), (8, nz))
        y0 = jnp.dot(x, w0_ref[...], preferred_element_type=f32)[0:1, :]
        y0 = jnp.maximum(y0 + b0_ref[...], 0.0)          # (1, h0*l0) f32
        a0 = scratch[0]                                  # (h0+2, l0) bf16 slab
        zero_row = jnp.zeros((1, l0), bf16)
        a0[0:1, :] = zero_row
        a0[h0 + 1:h0 + 2, :] = zero_row
        for oh in range(h0):
            a0[1 + oh:2 + oh, :] = y0[:, oh * l0:(oh + 1) * l0].astype(bf16)

        # ---- stride-2 ConvTranspose layers (sub-pixel decomposition) -------
        for l in range(n_up):
            h = sizes[l]
            b_ref, bias_ref = refs[3 + 2 * l], refs[4 + 2 * l]
            a_in = scratch[l]                            # (h+2, h*cins[l]) bf16
            last = (l + 1 == n_up)
            lout = 2 * h * cps[l]                        # lanes per row parity
            phases = []
            for par in (0, 1):                           # output row parity
                # row taps: offset par   <-> kernel row (3 - par)
                #           offset par+1 <-> kernel row (1 - par)
                lhs0 = a_in[par:par + h, :]
                lhs1 = a_in[par + 1:par + 1 + h, :]
                acc = (jnp.dot(lhs0, b_ref[3 - par], preferred_element_type=f32) +
                       jnp.dot(lhs1, b_ref[1 - par], preferred_element_type=f32))
                acc = acc + bias_ref[...]
                acc = jnp.tanh(acc) if acts[l] == "tanh" else jnp.maximum(acc, 0.0)
                if last:
                    # phases side-by-side in lanes; de-interleaved in wrapper
                    o_ref[:, par * lout:(par + 1) * lout] = acc
                else:
                    phases.append(acc.astype(bf16))
            if not last:
                scratch[l + 1][...] = interleave(phases[0], phases[1], h)

    return kernel


def make_g_nlayers_forward(params):
    ops = _prepare_operands(params)
    nz = ops["nz"]
    sizes, cins, cps, acts = ops["sizes"], ops["cins"], ops["cps"], ops["acts"]
    n_up = len(sizes)
    s_fin, cp_fin, out_nc = ops["s_final"], ops["cp_final"], ops["out_nc"]
    kernel = _make_kernel(nz, sizes, cins, cps, acts)

    weight_args = [ops["w0m"], ops["b0row"]]
    for B, brow in ops["ups"]:
        weight_args += [B, brow]

    in_specs = [pl.BlockSpec((1, 1, nz), lambda i: (i, 0, 0))]
    for wa in weight_args:
        if wa.ndim == 2:
            in_specs.append(pl.BlockSpec(wa.shape, lambda i: (0, 0)))
        else:
            in_specs.append(pl.BlockSpec(wa.shape, lambda i: (0, 0, 0)))

    scratch_shapes = [
        pltpu.VMEM((sizes[l] + 2, sizes[l] * cins[l]), jnp.bfloat16)
        for l in range(n_up)
    ]

    half = s_fin * cp_fin              # lanes per output row-parity phase
    rows = s_fin // 2                  # output slab rows per sample

    @jax.jit
    def forward(x_nchw):
        n = x_nchw.shape[0]
        x3 = x_nchw.reshape(n, 1, nz)
        out = pl.pallas_call(
            kernel,
            out_shape=jax.ShapeDtypeStruct((n * rows, 2 * half), jnp.float32),
            grid_spec=pltpu.PrefetchScalarGridSpec(
                num_scalar_prefetch=0,
                grid=(n,),
                in_specs=in_specs,
                out_specs=pl.BlockSpec((rows, 2 * half), lambda i: (i, 0)),
                scratch_shapes=scratch_shapes),
            compiler_params=pltpu.CompilerParams(
                dimension_semantics=("parallel",)),
        )(x3, *weight_args)
        # De-interleave the two row-parity phases (layout plumbing in XLA):
        # (n, rows, parity, W, Cp) -> (n, Cp, H=rows*2, W) -> slice channels.
        img = out.reshape(n, rows, 2, s_fin, cp_fin)
        img = jnp.transpose(img, (0, 4, 1, 2, 3)).reshape(n, cp_fin, s_fin, s_fin)
        return img[:, :out_nc]

    return forward


if __name__ == "__main__":
    key = jax.random.PRNGKey(0)
    pkey, xkey = jax.random.split(key)

    # small config consistent with the module: output_nc=3, nz=16, ngf=8,
    # n_layers=3, norm_layer=None, nl_layer=ReLU; latent input (N, nz, 1, 1)
    output_nc, nz, ngf, n_layers = 3, 16, 8, 3
    params = init_g_nlayers_params(pkey, output_nc=output_nc, nz=nz, ngf=ngf,
                                   n_layers=n_layers)
    x = jax.random.normal(xkey, (2, nz, 1, 1), jnp.float32)

    forward = make_g_nlayers_forward(params)
    y = forward(x)
    jax.block_until_ready(y)

    assert y.shape == (2, output_nc, 64, 64), y.shape
    assert bool(jnp.all(jnp.isfinite(y)))
    assert bool(jnp.all(jnp.abs(y) <= 1.0 + 1e-6))       # tanh output range

    # numerical check against a pure-JAX f32 ConvTranspose2d reference
    # (tolerance accounts for bf16 matmul operands inside the kernel)
    y_ref = ref_forward(x, params)
    err = float(jnp.max(jnp.abs(y - y_ref)))
    scale = float(jnp.max(jnp.abs(y_ref)))
    assert err <= 0.1 * scale + 1e-3, (err, scale)

    print("KERNEL_OK")
</pallas_src>

<mosaic_0001>
module attributes {stable_mosaic.version = 11 : i64} {
  func.func @kernel(%arg0: i32, %arg1: memref<1x1x16xf32, #tpu.memory_space<vmem>>, %arg2: memref<16x512xbf16, #tpu.memory_space<vmem>>, %arg3: memref<1x512xf32, #tpu.memory_space<vmem>>, %arg4: memref<4x128x192xbf16, #tpu.memory_space<vmem>>, %arg5: memref<1x192xf32, #tpu.memory_space<vmem>>, %arg6: memref<4x192x256xbf16, #tpu.memory_space<vmem>>, %arg7: memref<1x256xf32, #tpu.memory_space<vmem>>, %arg8: memref<4x256x256xbf16, #tpu.memory_space<vmem>>, %arg9: memref<1x256xf32, #tpu.memory_space<vmem>>, %arg10: memref<4x256x256xbf16, #tpu.memory_space<vmem>>, %arg11: memref<1x256xf32, #tpu.memory_space<vmem>>, %arg12: memref<32x512xf32, #tpu.memory_space<vmem>>, %arg13: memref<6x128xbf16, #tpu.memory_space<vmem>>, %arg14: memref<10x192xbf16, #tpu.memory_space<vmem>>, %arg15: memref<18x256xbf16, #tpu.memory_space<vmem>>, %arg16: memref<34x256xbf16, #tpu.memory_space<vmem>>) attributes {dimension_semantics = [#tpu.dimension_semantics<parallel>], iteration_bounds = array<i64: 2>, scalar_prefetch = 0 : i64, scratch_operands = 4 : i64, tpu.core_type = #tpu.core_type<tc>, window_params = [{transform_indices = @transform_0, window_bounds = array<i64: 1, 1, 16>}, {pipeline_mode = #tpu.pipeline_mode<synchronous>, transform_indices = @transform_1, window_bounds = array<i64: 16, 512>}, {pipeline_mode = #tpu.pipeline_mode<synchronous>, transform_indices = @transform_2, window_bounds = array<i64: 1, 512>}, {pipeline_mode = #tpu.pipeline_mode<synchronous>, transform_indices = @transform_3, window_bounds = array<i64: 4, 128, 192>}, {pipeline_mode = #tpu.pipeline_mode<synchronous>, transform_indices = @transform_4, window_bounds = array<i64: 1, 192>}, {pipeline_mode = #tpu.pipeline_mode<synchronous>, transform_indices = @transform_5, window_bounds = array<i64: 4, 192, 256>}, {pipeline_mode = #tpu.pipeline_mode<synchronous>, transform_indices = @transform_6, window_bounds = array<i64: 1, 256>}, {pipeline_mode = #tpu.pipeline_mode<synchronous>, transform_indices = @transform_7, window_bounds = array<i64: 4, 256, 256>}, {pipeline_mode = #tpu.pipeline_mode<synchronous>, transform_indices = @transform_8, window_bounds = array<i64: 1, 256>}, {pipeline_mode = #tpu.pipeline_mode<synchronous>, transform_indices = @transform_9, window_bounds = array<i64: 4, 256, 256>}, {pipeline_mode = #tpu.pipeline_mode<synchronous>, transform_indices = @transform_10, window_bounds = array<i64: 1, 256>}, {transform_indices = @transform_11, window_bounds = array<i64: 32, 512>}]} {
    %c0 = arith.constant 0 : index
    %c0_0 = arith.constant 0 : index
    %c0_1 = arith.constant 0 : index
    %0 = vector.load %arg1[%c0, %c0_0, %c0_1] : memref<1x1x16xf32, #tpu.memory_space<vmem>>, vector<1x1x16xf32>
    %1 = vector.shape_cast %0 : vector<1x1x16xf32> to vector<1x16xf32>
    %2 = arith.truncf %1 : vector<1x16xf32> to vector<1x16xbf16>
    %3 = vector.shape_cast %2 : vector<1x16xbf16> to vector<1x16xbf16>
    %4 = vector.broadcast %3 : vector<1x16xbf16> to vector<8x16xbf16>
    %c0_2 = arith.constant 0 : index
    %c0_3 = arith.constant 0 : index
    %5 = vector.load %arg2[%c0_2, %c0_3] : memref<16x512xbf16, #tpu.memory_space<vmem>>, vector<16x512xbf16>
    %cst = arith.constant dense<0.000000e+00> : vector<8x512xf32>
    %6 = tpu.matmul %4, %5, %cst {dimension_numbers = #tpu.dot_dimension_numbers<[1], [0], [0], [1], [0, 0, 1, 1], [], []>} : vector<8x16xbf16>, vector<16x512xbf16>, vector<8x512xf32> -> vector<8x512xf32>
    %7 = vector.extract_strided_slice %6 {offsets = [0, 0], sizes = [1, 512], strides = [1, 1]} : vector<8x512xf32> to vector<1x512xf32>
    %c0_4 = arith.constant 0 : index
    %c0_5 = arith.constant 0 : index
    %8 = vector.load %arg3[%c0_4, %c0_5] : memref<1x512xf32, #tpu.memory_space<vmem>>, vector<1x512xf32>
    %9 = arith.addf %7, %8 : vector<1x512xf32>
    %cst_6 = arith.constant 0.000000e+00 : f32
    %10 = vector.broadcast %cst_6 : f32 to vector<1x512xf32>
    %11 = arith.maximumf %9, %10 : vector<1x512xf32>
    %cst_7 = arith.constant 0.000000e+00 : bf16
    %12 = vector.broadcast %cst_7 : bf16 to vector<1x128xbf16>
    %c0_8 = arith.constant 0 : index
    %c0_9 = arith.constant 0 : index
    %13 = vector.load %arg13[%c0_8, %c0_9] : memref<6x128xbf16, #tpu.memory_space<vmem>>, vector<1x128xbf16>
    tpu.vector_store %arg13[%c0_8, %c0_9], %12 {strides = array<i32>} : memref<6x128xbf16, #tpu.memory_space<vmem>>, vector<1x128xbf16>,
    %c5 = arith.constant 5 : index
    %c0_10 = arith.constant 0 : index
    %14 = vector.load %arg13[%c5, %c0_10] : memref<6x128xbf16, #tpu.memory_space<vmem>>, vector<1x128xbf16>
    tpu.vector_store %arg13[%c5, %c0_10], %12 {strides = array<i32>} : memref<6x128xbf16, #tpu.memory_space<vmem>>, vector<1x128xbf16>,
    %15 = vector.extract_strided_slice %11 {offsets = [0, 0], sizes = [1, 128], strides = [1, 1]} : vector<1x512xf32> to vector<1x128xf32>
    %16 = arith.truncf %15 : vector<1x128xf32> to vector<1x128xbf16>
    %c1 = arith.constant 1 : index
    %c0_11 = arith.constant 0 : index
    %17 = vector.load %arg13[%c1, %c0_11] : memref<6x128xbf16, #tpu.memory_space<vmem>>, vector<1x128xbf16>
    tpu.vector_store %arg13[%c1, %c0_11], %16 {strides = array<i32>} : memref<6x128xbf16, #tpu.memory_space<vmem>>, vector<1x128xbf16>,
    %18 = vector.extract_strided_slice %11 {offsets = [0, 128], sizes = [1, 128], strides = [1, 1]} : vector<1x512xf32> to vector<1x128xf32>
    %19 = arith.truncf %18 : vector<1x128xf32> to vector<1x128xbf16>
    %c2 = arith.constant 2 : index
    %c0_12 = arith.constant 0 : index
    %20 = vector.load %arg13[%c2, %c0_12] : memref<6x128xbf16, #tpu.memory_space<vmem>>, vector<1x128xbf16>
    tpu.vector_store %arg13[%c2, %c0_12], %19 {strides = array<i32>} : memref<6x128xbf16, #tpu.memory_space<vmem>>, vector<1x128xbf16>,
    %21 = vector.extract_strided_slice %11 {offsets = [0, 256], sizes = [1, 128], strides = [1, 1]} : vector<1x512xf32> to vector<1x128xf32>
    %22 = arith.truncf %21 : vector<1x128xf32> to vector<1x128xbf16>
    %c3 = arith.constant 3 : index
    %c0_13 = arith.constant 0 : index
    %23 = vector.load %arg13[%c3, %c0_13] : memref<6x128xbf16, #tpu.memory_space<vmem>>, vector<1x128xbf16>
    tpu.vector_store %arg13[%c3, %c0_13], %22 {strides = array<i32>} : memref<6x128xbf16, #tpu.memory_space<vmem>>, vector<1x128xbf16>,
    %24 = vector.extract_strided_slice %11 {offsets = [0, 384], sizes = [1, 128], strides = [1, 1]} : vector<1x512xf32> to vector<1x128xf32>
    %25 = arith.truncf %24 : vector<1x128xf32> to vector<1x128xbf16>
    %c4 = arith.constant 4 : index
    %c0_14 = arith.constant 0 : index
    %26 = vector.load %arg13[%c4, %c0_14] : memref<6x128xbf16, #tpu.memory_space<vmem>>, vector<1x128xbf16>
    tpu.vector_store %arg13[%c4, %c0_14], %25 {strides = array<i32>} : memref<6x128xbf16, #tpu.memory_space<vmem>>, vector<1x128xbf16>,
    %c0_15 = arith.constant 0 : index
    %c0_16 = arith.constant 0 : index
    %27 = vector.load %arg13[%c0_15, %c0_16] : memref<6x128xbf16, #tpu.memory_space<vmem>>, vector<4x128xbf16>
    %c1_17 = arith.constant 1 : index
    %c0_18 = arith.constant 0 : index
    %28 = vector.load %arg13[%c1_17, %c0_18] : memref<6x128xbf16, #tpu.memory_space<vmem>>, vector<4x128xbf16>
    %c3_19 = arith.constant 3 : index
    %c0_20 = arith.constant 0 : index
    %c0_21 = arith.constant 0 : index
    %29 = vector.load %arg4[%c3_19, %c0_20, %c0_21] : memref<4x128x192xbf16, #tpu.memory_space<vmem>>, vector<1x128x192xbf16>
    %30 = vector.shape_cast %29 : vector<1x128x192xbf16> to vector<128x192xbf16>
    %cst_22 = arith.constant dense<0.000000e+00> : vector<4x192xf32>
    %31 = tpu.matmul %27, %30, %cst_22 {dimension_numbers = #tpu.dot_dimension_numbers<[1], [0], [0], [1], [0, 0, 1, 1], [], []>} : vector<4x128xbf16>, vector<128x192xbf16>, vector<4x192xf32> -> vector<4x192xf32>
    %c1_23 = arith.constant 1 : index
    %c0_24 = arith.constant 0 : index
    %c0_25 = arith.constant 0 : index
    %32 = vector.load %arg4[%c1_23, %c0_24, %c0_25] : memref<4x128x192xbf16, #tpu.memory_space<vmem>>, vector<1x128x192xbf16>
    %33 = vector.shape_cast %32 : vector<1x128x192xbf16> to vector<128x192xbf16>
    %cst_26 = arith.constant dense<0.000000e+00> : vector<4x192xf32>
    %34 = tpu.matmul %28, %33, %cst_26 {dimension_numbers = #tpu.dot_dimension_numbers<[1], [0], [0], [1], [0, 0, 1, 1], [], []>} : vector<4x128xbf16>, vector<128x192xbf16>, vector<4x192xf32> -> vector<4x192xf32>
    %35 = arith.addf %31, %34 : vector<4x192xf32>
    %c0_27 = arith.constant 0 : index
    %c0_28 = arith.constant 0 : index
    %36 = vector.load %arg5[%c0_27, %c0_28] : memref<1x192xf32, #tpu.memory_space<vmem>>, vector<1x192xf32>
    %37 = vector.broadcast %36 : vector<1x192xf32> to vector<4x192xf32>
    %38 = arith.addf %35, %37 : vector<4x192xf32>
    %cst_29 = arith.constant 0.000000e+00 : f32
    %39 = vector.broadcast %cst_29 : f32 to vector<4x192xf32>
    %40 = arith.maximumf %38, %39 : vector<4x192xf32>
    %41 = arith.truncf %40 : vector<4x192xf32> to vector<4x192xbf16>
    %c1_30 = arith.constant 1 : index
    %c0_31 = arith.constant 0 : index
    %42 = vector.load %arg13[%c1_30, %c0_31] : memref<6x128xbf16, #tpu.memory_space<vmem>>, vector<4x128xbf16>
    %c2_32 = arith.constant 2 : index
    %c0_33 = arith.constant 0 : index
    %43 = vector.load %arg13[%c2_32, %c0_33] : memref<6x128xbf16, #tpu.memory_space<vmem>>, vector<4x128xbf16>
    %c2_34 = arith.constant 2 : index
    %c0_35 = arith.constant 0 : index
    %c0_36 = arith.constant 0 : index
    %44 = vector.load %arg4[%c2_34, %c0_35, %c0_36] : memref<4x128x192xbf16, #tpu.memory_space<vmem>>, vector<1x128x192xbf16>
    %45 = vector.shape_cast %44 : vector<1x128x192xbf16> to vector<128x192xbf16>
    %cst_37 = arith.constant dense<0.000000e+00> : vector<4x192xf32>
    %46 = tpu.matmul %42, %45, %cst_37 {dimension_numbers = #tpu.dot_dimension_numbers<[1], [0], [0], [1], [0, 0, 1, 1], [], []>} : vector<4x128xbf16>, vector<128x192xbf16>, vector<4x192xf32> -> vector<4x192xf32>
    %c0_38 = arith.constant 0 : index
    %c0_39 = arith.constant 0 : index
    %c0_40 = arith.constant 0 : index
    %47 = vector.load %arg4[%c0_38, %c0_39, %c0_40] : memref<4x128x192xbf16, #tpu.memory_space<vmem>>, vector<1x128x192xbf16>
    %48 = vector.shape_cast %47 : vector<1x128x192xbf16> to vector<128x192xbf16>
    %cst_41 = arith.constant dense<0.000000e+00> : vector<4x192xf32>
    %49 = tpu.matmul %43, %48, %cst_41 {dimension_numbers = #tpu.dot_dimension_numbers<[1], [0], [0], [1], [0, 0, 1, 1], [], []>} : vector<4x128xbf16>, vector<128x192xbf16>, vector<4x192xf32> -> vector<4x192xf32>
    %50 = arith.addf %46, %49 : vector<4x192xf32>
    %c0_42 = arith.constant 0 : index
    %c0_43 = arith.constant 0 : index
    %51 = vector.load %arg5[%c0_42, %c0_43] : memref<1x192xf32, #tpu.memory_space<vmem>>, vector<1x192xf32>
    %52 = vector.broadcast %51 : vector<1x192xf32> to vector<4x192xf32>
    %53 = arith.addf %50, %52 : vector<4x192xf32>
    %cst_44 = arith.constant 0.000000e+00 : f32
    %54 = vector.broadcast %cst_44 : f32 to vector<4x192xf32>
    %55 = arith.maximumf %53, %54 : vector<4x192xf32>
    %56 = arith.truncf %55 : vector<4x192xf32> to vector<4x192xbf16>
    %57 = tpu.iota {dimensions = array<i32: 0>} : vector<10x4xi32>
    %58 = tpu.iota {dimensions = array<i32: 1>} : vector<10x4xi32>
    %c2_i32 = arith.constant 2 : i32
    %59 = vector.broadcast %c2_i32 : i32 to vector<10x4xi32>
    %60 = arith.muli %59, %58 : vector<10x4xi32>
    %c1_i32 = arith.constant 1 : i32
    %61 = vector.broadcast %c1_i32 : i32 to vector<10x4xi32>
    %62 = arith.addi %60, %61 : vector<10x4xi32>
    %63 = arith.cmpi eq, %57, %62 : vector<10x4xi32>
    %64 = arith.extui %63 : vector<10x4xi1> to vector<10x4xi32>
    %65 = arith.sitofp %64 : vector<10x4xi32> to vector<10x4xf32>
    %66 = arith.truncf %65 : vector<10x4xf32> to vector<10x4xbf16>
    %c2_i32_45 = arith.constant 2 : i32
    %67 = vector.broadcast %c2_i32_45 : i32 to vector<10x4xi32>
    %68 = arith.muli %67, %58 : vector<10x4xi32>
    %c2_i32_46 = arith.constant 2 : i32
    %69 = vector.broadcast %c2_i32_46 : i32 to vector<10x4xi32>
    %70 = arith.addi %68, %69 : vector<10x4xi32>
    %71 = arith.cmpi eq, %57, %70 : vector<10x4xi32>
    %72 = arith.extui %71 : vector<10x4xi1> to vector<10x4xi32>
    %73 = arith.sitofp %72 : vector<10x4xi32> to vector<10x4xf32>
    %74 = arith.truncf %73 : vector<10x4xf32> to vector<10x4xbf16>
    %cst_47 = arith.constant dense<0.000000e+00> : vector<10x192xf32>
    %75 = tpu.matmul %66, %41, %cst_47 {dimension_numbers = #tpu.dot_dimension_numbers<[1], [0], [0], [1], [0, 0, 1, 1], [], []>} : vector<10x4xbf16>, vector<4x192xbf16>, vector<10x192xf32> -> vector<10x192xf32>
    %cst_48 = arith.constant dense<0.000000e+00> : vector<10x192xf32>
    %76 = tpu.matmul %74, %56, %cst_48 {dimension_numbers = #tpu.dot_dimension_numbers<[1], [0], [0], [1], [0, 0, 1, 1], [], []>} : vector<10x4xbf16>, vector<4x192xbf16>, vector<10x192xf32> -> vector<10x192xf32>
    %77 = arith.addf %75, %76 : vector<10x192xf32>
    %78 = arith.truncf %77 : vector<10x192xf32> to vector<10x192xbf16>
    %c0_49 = arith.constant 0 : index
    %c0_50 = arith.constant 0 : index
    %79 = vector.load %arg14[%c0_49, %c0_50] : memref<10x192xbf16, #tpu.memory_space<vmem>>, vector<10x192xbf16>
    tpu.vector_store %arg14[%c0_49, %c0_50], %78 {strides = array<i32>} : memref<10x192xbf16, #tpu.memory_space<vmem>>, vector<10x192xbf16>,
    %c0_51 = arith.constant 0 : index
    %c0_52 = arith.constant 0 : index
    %80 = vector.load %arg14[%c0_51, %c0_52] : memref<10x192xbf16, #tpu.memory_space<vmem>>, vector<8x192xbf16>
    %c1_53 = arith.constant 1 : index
    %c0_54 = arith.constant 0 : index
    %81 = vector.load %arg14[%c1_53, %c0_54] : memref<10x192xbf16, #tpu.memory_space<vmem>>, vector<8x192xbf16>
    %c3_55 = arith.constant 3 : index
    %c0_56 = arith.constant 0 : index
    %c0_57 = arith.constant 0 : index
    %82 = vector.load %arg6[%c3_55, %c0_56, %c0_57] : memref<4x192x256xbf16, #tpu.memory_space<vmem>>, vector<1x192x256xbf16>
    %83 = vector.shape_cast %82 : vector<1x192x256xbf16> to vector<192x256xbf16>
    %cst_58 = arith.constant dense<0.000000e+00> : vector<8x256xf32>
    %84 = tpu.matmul %80, %83, %cst_58 {dimension_numbers = #tpu.dot_dimension_numbers<[1], [0], [0], [1], [0, 0, 1, 1], [], []>} : vector<8x192xbf16>, vector<192x256xbf16>, vector<8x256xf32> -> vector<8x256xf32>
    %c1_59 = arith.constant 1 : index
    %c0_60 = arith.constant 0 : index
    %c0_61 = arith.constant 0 : index
    %85 = vector.load %arg6[%c1_59, %c0_60, %c0_61] : memref<4x192x256xbf16, #tpu.memory_space<vmem>>, vector<1x192x256xbf16>
    %86 = vector.shape_cast %85 : vector<1x192x256xbf16> to vector<192x256xbf16>
    %cst_62 = arith.constant dense<0.000000e+00> : vector<8x256xf32>
    %87 = tpu.matmul %81, %86, %cst_62 {dimension_numbers = #tpu.dot_dimension_numbers<[1], [0], [0], [1], [0, 0, 1, 1], [], []>} : vector<8x192xbf16>, vector<192x256xbf16>, vector<8x256xf32> -> vector<8x256xf32>
    %88 = arith.addf %84, %87 : vector<8x256xf32>
    %c0_63 = arith.constant 0 : index
    %c0_64 = arith.constant 0 : index
    %89 = vector.load %arg7[%c0_63, %c0_64] : memref<1x256xf32, #tpu.memory_space<vmem>>, vector<1x256xf32>
    %90 = vector.broadcast %89 : vector<1x256xf32> to vector<8x256xf32>
    %91 = arith.addf %88, %90 : vector<8x256xf32>
    %cst_65 = arith.constant 0.000000e+00 : f32
    %92 = vector.broadcast %cst_65 : f32 to vector<8x256xf32>
    %93 = arith.maximumf %91, %92 : vector<8x256xf32>
    %94 = arith.truncf %93 : vector<8x256xf32> to vector<8x256xbf16>
    %c1_66 = arith.constant 1 : index
    %c0_67 = arith.constant 0 : index
    %95 = vector.load %arg14[%c1_66, %c0_67] : memref<10x192xbf16, #tpu.memory_space<vmem>>, vector<8x192xbf16>
    %c2_68 = arith.constant 2 : index
    %c0_69 = arith.constant 0 : index
    %96 = vector.load %arg14[%c2_68, %c0_69] : memref<10x192xbf16, #tpu.memory_space<vmem>>, vector<8x192xbf16>
    %c2_70 = arith.constant 2 : index
    %c0_71 = arith.constant 0 : index
    %c0_72 = arith.constant 0 : index
    %97 = vector.load %arg6[%c2_70, %c0_71, %c0_72] : memref<4x192x256xbf16, #tpu.memory_space<vmem>>, vector<1x192x256xbf16>
    %98 = vector.shape_cast %97 : vector<1x192x256xbf16> to vector<192x256xbf16>
    %cst_73 = arith.constant dense<0.000000e+00> : vector<8x256xf32>
    %99 = tpu.matmul %95, %98, %cst_73 {dimension_numbers = #tpu.dot_dimension_numbers<[1], [0], [0], [1], [0, 0, 1, 1], [], []>} : vector<8x192xbf16>, vector<192x256xbf16>, vector<8x256xf32> -> vector<8x256xf32>
    %c0_74 = arith.constant 0 : index
    %c0_75 = arith.constant 0 : index
    %c0_76 = arith.constant 0 : index
    %100 = vector.load %arg6[%c0_74, %c0_75, %c0_76] : memref<4x192x256xbf16, #tpu.memory_space<vmem>>, vector<1x192x256xbf16>
    %101 = vector.shape_cast %100 : vector<1x192x256xbf16> to vector<192x256xbf16>
    %cst_77 = arith.constant dense<0.000000e+00> : vector<8x256xf32>
    %102 = tpu.matmul %96, %101, %cst_77 {dimension_numbers = #tpu.dot_dimension_numbers<[1], [0], [0], [1], [0, 0, 1, 1], [], []>} : vector<8x192xbf16>, vector<192x256xbf16>, vector<8x256xf32> -> vector<8x256xf32>
    %103 = arith.addf %99, %102 : vector<8x256xf32>
    %c0_78 = arith.constant 0 : index
    %c0_79 = arith.constant 0 : index
    %104 = vector.load %arg7[%c0_78, %c0_79] : memref<1x256xf32, #tpu.memory_space<vmem>>, vector<1x256xf32>
    %105 = vector.broadcast %104 : vector<1x256xf32> to vector<8x256xf32>
    %106 = arith.addf %103, %105 : vector<8x256xf32>
    %cst_80 = arith.constant 0.000000e+00 : f32
    %107 = vector.broadcast %cst_80 : f32 to vector<8x256xf32>
    %108 = arith.maximumf %106, %107 : vector<8x256xf32>
    %109 = arith.truncf %108 : vector<8x256xf32> to vector<8x256xbf16>
    %110 = tpu.iota {dimensions = array<i32: 0>} : vector<18x8xi32>
    %111 = tpu.iota {dimensions = array<i32: 1>} : vector<18x8xi32>
    %c2_i32_81 = arith.constant 2 : i32
    %112 = vector.broadcast %c2_i32_81 : i32 to vector<18x8xi32>
    %113 = arith.muli %112, %111 : vector<18x8xi32>
    %c1_i32_82 = arith.constant 1 : i32
    %114 = vector.broadcast %c1_i32_82 : i32 to vector<18x8xi32>
    %115 = arith.addi %113, %114 : vector<18x8xi32>
    %116 = arith.cmpi eq, %110, %115 : vector<18x8xi32>
    %117 = arith.extui %116 : vector<18x8xi1> to vector<18x8xi32>
    %118 = arith.sitofp %117 : vector<18x8xi32> to vector<18x8xf32>
    %119 = arith.truncf %118 : vector<18x8xf32> to vector<18x8xbf16>
    %c2_i32_83 = arith.constant 2 : i32
    %120 = vector.broadcast %c2_i32_83 : i32 to vector<18x8xi32>
    %121 = arith.muli %120, %111 : vector<18x8xi32>
    %c2_i32_84 = arith.constant 2 : i32
    %122 = vector.broadcast %c2_i32_84 : i32 to vector<18x8xi32>
    %123 = arith.addi %121, %122 : vector<18x8xi32>
    %124 = arith.cmpi eq, %110, %123 : vector<18x8xi32>
    %125 = arith.extui %124 : vector<18x8xi1> to vector<18x8xi32>
    %126 = arith.sitofp %125 : vector<18x8xi32> to vector<18x8xf32>
    %127 = arith.truncf %126 : vector<18x8xf32> to vector<18x8xbf16>
    %cst_85 = arith.constant dense<0.000000e+00> : vector<18x256xf32>
    %128 = tpu.matmul %119, %94, %cst_85 {dimension_numbers = #tpu.dot_dimension_numbers<[1], [0], [0], [1], [0, 0, 1, 1], [], []>} : vector<18x8xbf16>, vector<8x256xbf16>, vector<18x256xf32> -> vector<18x256xf32>
    %cst_86 = arith.constant dense<0.000000e+00> : vector<18x256xf32>
    %129 = tpu.matmul %127, %109, %cst_86 {dimension_numbers = #tpu.dot_dimension_numbers<[1], [0], [0], [1], [0, 0, 1, 1], [], []>} : vector<18x8xbf16>, vector<8x256xbf16>, vector<18x256xf32> -> vector<18x256xf32>
    %130 = arith.addf %128, %129 : vector<18x256xf32>
    %131 = arith.truncf %130 : vector<18x256xf32> to vector<18x256xbf16>
    %c0_87 = arith.constant 0 : index
    %c0_88 = arith.constant 0 : index
    %132 = vector.load %arg15[%c0_87, %c0_88] : memref<18x256xbf16, #tpu.memory_space<vmem>>, vector<18x256xbf16>
    tpu.vector_store %arg15[%c0_87, %c0_88], %131 {strides = array<i32>} : memref<18x256xbf16, #tpu.memory_space<vmem>>, vector<18x256xbf16>,
    %c0_89 = arith.constant 0 : index
    %c0_90 = arith.constant 0 : index
    %133 = vector.load %arg15[%c0_89, %c0_90] : memref<18x256xbf16, #tpu.memory_space<vmem>>, vector<16x256xbf16>
    %c1_91 = arith.constant 1 : index
    %c0_92 = arith.constant 0 : index
    %134 = vector.load %arg15[%c1_91, %c0_92] : memref<18x256xbf16, #tpu.memory_space<vmem>>, vector<16x256xbf16>
    %c3_93 = arith.constant 3 : index
    %c0_94 = arith.constant 0 : index
    %c0_95 = arith.constant 0 : index
    %135 = vector.load %arg8[%c3_93, %c0_94, %c0_95] : memref<4x256x256xbf16, #tpu.memory_space<vmem>>, vector<1x256x256xbf16>
    %136 = vector.shape_cast %135 : vector<1x256x256xbf16> to vector<256x256xbf16>
    %cst_96 = arith.constant dense<0.000000e+00> : vector<16x256xf32>
    %137 = tpu.matmul %133, %136, %cst_96 {dimension_numbers = #tpu.dot_dimension_numbers<[1], [0], [0], [1], [0, 0, 1, 1], [], []>} : vector<16x256xbf16>, vector<256x256xbf16>, vector<16x256xf32> -> vector<16x256xf32>
    %c1_97 = arith.constant 1 : index
    %c0_98 = arith.constant 0 : index
    %c0_99 = arith.constant 0 : index
    %138 = vector.load %arg8[%c1_97, %c0_98, %c0_99] : memref<4x256x256xbf16, #tpu.memory_space<vmem>>, vector<1x256x256xbf16>
    %139 = vector.shape_cast %138 : vector<1x256x256xbf16> to vector<256x256xbf16>
    %cst_100 = arith.constant dense<0.000000e+00> : vector<16x256xf32>
    %140 = tpu.matmul %134, %139, %cst_100 {dimension_numbers = #tpu.dot_dimension_numbers<[1], [0], [0], [1], [0, 0, 1, 1], [], []>} : vector<16x256xbf16>, vector<256x256xbf16>, vector<16x256xf32> -> vector<16x256xf32>
    %141 = arith.addf %137, %140 : vector<16x256xf32>
    %c0_101 = arith.constant 0 : index
    %c0_102 = arith.constant 0 : index
    %142 = vector.load %arg9[%c0_101, %c0_102] : memref<1x256xf32, #tpu.memory_space<vmem>>, vector<1x256xf32>
    %143 = vector.broadcast %142 : vector<1x256xf32> to vector<16x256xf32>
    %144 = arith.addf %141, %143 : vector<16x256xf32>
    %cst_103 = arith.constant 0.000000e+00 : f32
    %145 = vector.broadcast %cst_103 : f32 to vector<16x256xf32>
    %146 = arith.maximumf %144, %145 : vector<16x256xf32>
    %147 = arith.truncf %146 : vector<16x256xf32> to vector<16x256xbf16>
    %c1_104 = arith.constant 1 : index
    %c0_105 = arith.constant 0 : index
    %148 = vector.load %arg15[%c1_104, %c0_105] : memref<18x256xbf16, #tpu.memory_space<vmem>>, vector<16x256xbf16>
    %c2_106 = arith.constant 2 : index
    %c0_107 = arith.constant 0 : index
    %149 = vector.load %arg15[%c2_106, %c0_107] : memref<18x256xbf16, #tpu.memory_space<vmem>>, vector<16x256xbf16>
    %c2_108 = arith.constant 2 : index
    %c0_109 = arith.constant 0 : index
    %c0_110 = arith.constant 0 : index
    %150 = vector.load %arg8[%c2_108, %c0_109, %c0_110] : memref<4x256x256xbf16, #tpu.memory_space<vmem>>, vector<1x256x256xbf16>
    %151 = vector.shape_cast %150 : vector<1x256x256xbf16> to vector<256x256xbf16>
    %cst_111 = arith.constant dense<0.000000e+00> : vector<16x256xf32>
    %152 = tpu.matmul %148, %151, %cst_111 {dimension_numbers = #tpu.dot_dimension_numbers<[1], [0], [0], [1], [0, 0, 1, 1], [], []>} : vector<16x256xbf16>, vector<256x256xbf16>, vector<16x256xf32> -> vector<16x256xf32>
    %c0_112 = arith.constant 0 : index
    %c0_113 = arith.constant 0 : index
    %c0_114 = arith.constant 0 : index
    %153 = vector.load %arg8[%c0_112, %c0_113, %c0_114] : memref<4x256x256xbf16, #tpu.memory_space<vmem>>, vector<1x256x256xbf16>
    %154 = vector.shape_cast %153 : vector<1x256x256xbf16> to vector<256x256xbf16>
    %cst_115 = arith.constant dense<0.000000e+00> : vector<16x256xf32>
    %155 = tpu.matmul %149, %154, %cst_115 {dimension_numbers = #tpu.dot_dimension_numbers<[1], [0], [0], [1], [0, 0, 1, 1], [], []>} : vector<16x256xbf16>, vector<256x256xbf16>, vector<16x256xf32> -> vector<16x256xf32>
    %156 = arith.addf %152, %155 : vector<16x256xf32>
    %c0_116 = arith.constant 0 : index
    %c0_117 = arith.constant 0 : index
    %157 = vector.load %arg9[%c0_116, %c0_117] : memref<1x256xf32, #tpu.memory_space<vmem>>, vector<1x256xf32>
    %158 = vector.broadcast %157 : vector<1x256xf32> to vector<16x256xf32>
    %159 = arith.addf %156, %158 : vector<16x256xf32>
    %cst_118 = arith.constant 0.000000e+00 : f32
    %160 = vector.broadcast %cst_118 : f32 to vector<16x256xf32>
    %161 = arith.maximumf %159, %160 : vector<16x256xf32>
    %162 = arith.truncf %161 : vector<16x256xf32> to vector<16x256xbf16>
    %163 = tpu.iota {dimensions = array<i32: 0>} : vector<34x16xi32>
    %164 = tpu.iota {dimensions = array<i32: 1>} : vector<34x16xi32>
    %c2_i32_119 = arith.constant 2 : i32
    %165 = vector.broadcast %c2_i32_119 : i32 to vector<34x16xi32>
    %166 = arith.muli %165, %164 : vector<34x16xi32>
    %c1_i32_120 = arith.constant 1 : i32
    %167 = vector.broadcast %c1_i32_120 : i32 to vector<34x16xi32>
    %168 = arith.addi %166, %167 : vector<34x16xi32>
    %169 = arith.cmpi eq, %163, %168 : vector<34x16xi32>
    %170 = arith.extui %169 : vector<34x16xi1> to vector<34x16xi32>
    %171 = arith.sitofp %170 : vector<34x16xi32> to vector<34x16xf32>
    %172 = arith.truncf %171 : vector<34x16xf32> to vector<34x16xbf16>
    %c2_i32_121 = arith.constant 2 : i32
    %173 = vector.broadcast %c2_i32_121 : i32 to vector<34x16xi32>
    %174 = arith.muli %173, %164 : vector<34x16xi32>
    %c2_i32_122 = arith.constant 2 : i32
    %175 = vector.broadcast %c2_i32_122 : i32 to vector<34x16xi32>
    %176 = arith.addi %174, %175 : vector<34x16xi32>
    %177 = arith.cmpi eq, %163, %176 : vector<34x16xi32>
    %178 = arith.extui %177 : vector<34x16xi1> to vector<34x16xi32>
    %179 = arith.sitofp %178 : vector<34x16xi32> to vector<34x16xf32>
    %180 = arith.truncf %179 : vector<34x16xf32> to vector<34x16xbf16>
    %cst_123 = arith.constant dense<0.000000e+00> : vector<34x256xf32>
    %181 = tpu.matmul %172, %147, %cst_123 {dimension_numbers = #tpu.dot_dimension_numbers<[1], [0], [0], [1], [0, 0, 1, 1], [], []>} : vector<34x16xbf16>, vector<16x256xbf16>, vector<34x256xf32> -> vector<34x256xf32>
    %cst_124 = arith.constant dense<0.000000e+00> : vector<34x256xf32>
    %182 = tpu.matmul %180, %162, %cst_124 {dimension_numbers = #tpu.dot_dimension_numbers<[1], [0], [0], [1], [0, 0, 1, 1], [], []>} : vector<34x16xbf16>, vector<16x256xbf16>, vector<34x256xf32> -> vector<34x256xf32>
    %183 = arith.addf %181, %182 : vector<34x256xf32>
    %184 = arith.truncf %183 : vector<34x256xf32> to vector<34x256xbf16>
    %c0_125 = arith.constant 0 : index
    %c0_126 = arith.constant 0 : index
    %185 = vector.load %arg16[%c0_125, %c0_126] : memref<34x256xbf16, #tpu.memory_space<vmem>>, vector<34x256xbf16>
    tpu.vector_store %arg16[%c0_125, %c0_126], %184 {strides = array<i32>} : memref<34x256xbf16, #tpu.memory_space<vmem>>, vector<34x256xbf16>,
    %c0_127 = arith.constant 0 : index
    %c0_128 = arith.constant 0 : index
    %186 = vector.load %arg16[%c0_127, %c0_128] : memref<34x256xbf16, #tpu.memory_space<vmem>>, vector<32x256xbf16>
    %c1_129 = arith.constant 1 : index
    %c0_130 = arith.constant 0 : index
    %187 = vector.load %arg16[%c1_129, %c0_130] : memref<34x256xbf16, #tpu.memory_space<vmem>>, vector<32x256xbf16>
    %c3_131 = arith.constant 3 : index
    %c0_132 = arith.constant 0 : index
    %c0_133 = arith.constant 0 : index
    %188 = vector.load %arg10[%c3_131, %c0_132, %c0_133] : memref<4x256x256xbf16, #tpu.memory_space<vmem>>, vector<1x256x256xbf16>
    %189 = vector.shape_cast %188 : vector<1x256x256xbf16> to vector<256x256xbf16>
    %cst_134 = arith.constant dense<0.000000e+00> : vector<32x256xf32>
    %190 = tpu.matmul %186, %189, %cst_134 {dimension_numbers = #tpu.dot_dimension_numbers<[1], [0], [0], [1], [0, 0, 1, 1], [], []>} : vector<32x256xbf16>, vector<256x256xbf16>, vector<32x256xf32> -> vector<32x256xf32>
    %c1_135 = arith.constant 1 : index
    %c0_136 = arith.constant 0 : index
    %c0_137 = arith.constant 0 : index
    %191 = vector.load %arg10[%c1_135, %c0_136, %c0_137] : memref<4x256x256xbf16, #tpu.memory_space<vmem>>, vector<1x256x256xbf16>
    %192 = vector.shape_cast %191 : vector<1x256x256xbf16> to vector<256x256xbf16>
    %cst_138 = arith.constant dense<0.000000e+00> : vector<32x256xf32>
    %193 = tpu.matmul %187, %192, %cst_138 {dimension_numbers = #tpu.dot_dimension_numbers<[1], [0], [0], [1], [0, 0, 1, 1], [], []>} : vector<32x256xbf16>, vector<256x256xbf16>, vector<32x256xf32> -> vector<32x256xf32>
    %194 = arith.addf %190, %193 : vector<32x256xf32>
    %c0_139 = arith.constant 0 : index
    %c0_140 = arith.constant 0 : index
    %195 = vector.load %arg11[%c0_139, %c0_140] : memref<1x256xf32, #tpu.memory_space<vmem>>, vector<1x256xf32>
    %196 = vector.broadcast %195 : vector<1x256xf32> to vector<32x256xf32>
    %197 = arith.addf %194, %196 : vector<32x256xf32>
    %198 = math.tanh %197 : vector<32x256xf32>
    %c0_141 = arith.constant 0 : index
    %c0_142 = arith.constant 0 : index
    %199 = vector.load %arg12[%c0_141, %c0_142] : memref<32x512xf32, #tpu.memory_space<vmem>>, vector<32x256xf32>
    tpu.vector_store %arg12[%c0_141, %c0_142], %198 {strides = array<i32>} : memref<32x512xf32, #tpu.memory_space<vmem>>, vector<32x256xf32>,
    %c1_143 = arith.constant 1 : index
    %c0_144 = arith.constant 0 : index
    %200 = vector.load %arg16[%c1_143, %c0_144] : memref<34x256xbf16, #tpu.memory_space<vmem>>, vector<32x256xbf16>
    %c2_145 = arith.constant 2 : index
    %c0_146 = arith.constant 0 : index
    %201 = vector.load %arg16[%c2_145, %c0_146] : memref<34x256xbf16, #tpu.memory_space<vmem>>, vector<32x256xbf16>
    %c2_147 = arith.constant 2 : index
    %c0_148 = arith.constant 0 : index
    %c0_149 = arith.constant 0 : index
    %202 = vector.load %arg10[%c2_147, %c0_148, %c0_149] : memref<4x256x256xbf16, #tpu.memory_space<vmem>>, vector<1x256x256xbf16>
    %203 = vector.shape_cast %202 : vector<1x256x256xbf16> to vector<256x256xbf16>
    %cst_150 = arith.constant dense<0.000000e+00> : vector<32x256xf32>
    %204 = tpu.matmul %200, %203, %cst_150 {dimension_numbers = #tpu.dot_dimension_numbers<[1], [0], [0], [1], [0, 0, 1, 1], [], []>} : vector<32x256xbf16>, vector<256x256xbf16>, vector<32x256xf32> -> vector<32x256xf32>
    %c0_151 = arith.constant 0 : index
    %c0_152 = arith.constant 0 : index
    %c0_153 = arith.constant 0 : index
    %205 = vector.load %arg10[%c0_151, %c0_152, %c0_153] : memref<4x256x256xbf16, #tpu.memory_space<vmem>>, vector<1x256x256xbf16>
    %206 = vector.shape_cast %205 : vector<1x256x256xbf16> to vector<256x256xbf16>
    %cst_154 = arith.constant dense<0.000000e+00> : vector<32x256xf32>
    %207 = tpu.matmul %201, %206, %cst_154 {dimension_numbers = #tpu.dot_dimension_numbers<[1], [0], [0], [1], [0, 0, 1, 1], [], []>} : vector<32x256xbf16>, vector<256x256xbf16>, vector<32x256xf32> -> vector<32x256xf32>
    %208 = arith.addf %204, %207 : vector<32x256xf32>
    %c0_155 = arith.constant 0 : index
    %c0_156 = arith.constant 0 : index
    %209 = vector.load %arg11[%c0_155, %c0_156] : memref<1x256xf32, #tpu.memory_space<vmem>>, vector<1x256xf32>
    %210 = vector.broadcast %209 : vector<1x256xf32> to vector<32x256xf32>
    %211 = arith.addf %208, %210 : vector<32x256xf32>
    %212 = math.tanh %211 : vector<32x256xf32>
    %c0_157 = arith.constant 0 : index
    %c256 = arith.constant 256 : index
    %213 = vector.load %arg12[%c0_157, %c256] : memref<32x512xf32, #tpu.memory_space<vmem>>, vector<32x256xf32>
    tpu.vector_store %arg12[%c0_157, %c256], %212 {strides = array<i32>} : memref<32x512xf32, #tpu.memory_space<vmem>>, vector<32x256xf32>,
    return
  }
  func.func @transform_0(%arg0: i32) -> (i32, i32, i32) {
    %c0_i32 = arith.constant 0 : i32
    %c0_i32_0 = arith.constant 0 : i32
    %c0_i32_1 = arith.constant 0 : i32
    return %arg0, %c0_i32, %c0_i32_0 : i32, i32, i32
  }
  func.func @transform_1(%arg0: i32) -> (i32, i32) {
    %c0_i32 = arith.constant 0 : i32
    %c0_i32_0 = arith.constant 0 : i32
    %c0_i32_1 = arith.constant 0 : i32
    return %c0_i32, %c0_i32_0 : i32, i32
  }
  func.func @transform_2(%arg0: i32) -> (i32, i32) {
    %c0_i32 = arith.constant 0 : i32
    %c0_i32_0 = arith.constant 0 : i32
    %c0_i32_1 = arith.constant 0 : i32
    return %c0_i32, %c0_i32_0 : i32, i32
  }
  func.func @transform_3(%arg0: i32) -> (i32, i32, i32) {
    %c0_i32 = arith.constant 0 : i32
    %c0_i32_0 = arith.constant 0 : i32
    %c0_i32_1 = arith.constant 0 : i32
    %c0_i32_2 = arith.constant 0 : i32
    return %c0_i32, %c0_i32_0, %c0_i32_1 : i32, i32, i32
  }
  func.func @transform_4(%arg0: i32) -> (i32, i32) {
    %c0_i32 = arith.constant 0 : i32
    %c0_i32_0 = arith.constant 0 : i32
    %c0_i32_1 = arith.constant 0 : i32
    return %c0_i32, %c0_i32_0 : i32, i32
  }
  func.func @transform_5(%arg0: i32) -> (i32, i32, i32) {
    %c0_i32 = arith.constant 0 : i32
    %c0_i32_0 = arith.constant 0 : i32
    %c0_i32_1 = arith.constant 0 : i32
    %c0_i32_2 = arith.constant 0 : i32
    return %c0_i32, %c0_i32_0, %c0_i32_1 : i32, i32, i32
  }
  func.func @transform_6(%arg0: i32) -> (i32, i32) {
    %c0_i32 = arith.constant 0 : i32
    %c0_i32_0 = arith.constant 0 : i32
    %c0_i32_1 = arith.constant 0 : i32
    return %c0_i32, %c0_i32_0 : i32, i32
  }
  func.func @transform_7(%arg0: i32) -> (i32, i32, i32) {
    %c0_i32 = arith.constant 0 : i32
    %c0_i32_0 = arith.constant 0 : i32
    %c0_i32_1 = arith.constant 0 : i32
    %c0_i32_2 = arith.constant 0 : i32
    return %c0_i32, %c0_i32_0, %c0_i32_1 : i32, i32, i32
  }
  func.func @transform_8(%arg0: i32) -> (i32, i32) {
    %c0_i32 = arith.constant 0 : i32
    %c0_i32_0 = arith.constant 0 : i32
    %c0_i32_1 = arith.constant 0 : i32
    return %c0_i32, %c0_i32_0 : i32, i32
  }
  func.func @transform_9(%arg0: i32) -> (i32, i32, i32) {
    %c0_i32 = arith.constant 0 : i32
    %c0_i32_0 = arith.constant 0 : i32
    %c0_i32_1 = arith.constant 0 : i32
    %c0_i32_2 = arith.constant 0 : i32
    return %c0_i32, %c0_i32_0, %c0_i32_1 : i32, i32, i32
  }
  func.func @transform_10(%arg0: i32) -> (i32, i32) {
    %c0_i32 = arith.constant 0 : i32
    %c0_i32_0 = arith.constant 0 : i32
    %c0_i32_1 = arith.constant 0 : i32
    return %c0_i32, %c0_i32_0 : i32, i32
  }
  func.func @transform_11(%arg0: i32) -> (i32, i32) {
    %c0_i32 = arith.constant 0 : i32
    %c0_i32_0 = arith.constant 0 : i32
    return %arg0, %c0_i32 : i32, i32
  }
}

</mosaic_0001>

<bundles_post_ra>
// kernel: forward.1
= control target key start
LH: loop header
LB: loop body
LE: loop exit
PB: predicated region body
PF: predicated region fallthrough
CT: control target
= control target key end

     0   :  { %s6450_s17 = smov 0   ;;  %s7971_s0 = inlined_call_operand.vmem [shape: f32[2,1,16], index: 0, kind: input, shape index: {}]   ;;  %s7972_s1 = inlined_call_operand.vmem [shape: bf16[16,512], index: 1, kind: input, shape index: {}]   ;;  %s7973_s2 = inlined_call_operand.vmem [shape: f32[1,512], index: 2, kind: input, shape index: {}]   ;;  %s7974_s3 = inlined_call_operand.vmem [shape: bf16[4,128,192], index: 3, kind: input, shape index: {}]   ;;  %s7975_s4 = inlined_call_operand.vmem [shape: f32[1,192], index: 4, kind: input, shape index: {}]   ;;  %s7976_s5 = inlined_call_operand.vmem [shape: bf16[4,192,256], index: 5, kind: input, shape index: {}]   ;;  %s7977_s6 = inlined_call_operand.vmem [shape: f32[1,256], index: 6, kind: input, shape index: {}]   ;;  %s7978_s7 = inlined_call_operand.vmem [shape: bf16[4,256,256], index: 7, kind: input, shape index: {}]   ;;  %s7979_s8 = inlined_call_operand.vmem [shape: f32[1,256], index: 8, kind: input, shape index: {}]   ;;  %s7980_s9 = inlined_call_operand.vmem [shape: bf16[4,256,256], index: 9, kind: input, shape index: {}]   ;;  %s7981_s10 = inlined_call_operand.vmem [shape: f32[1,256], index: 10, kind: input, shape index: {}]   ;;  %s7982_s11 = inlined_call_operand.vmem [shape: f32[64,512], index: 11, kind: output, shape index: {}]  }
   0x1 LB: > { %s6456_s18 = sadd.s32 4294967295, %s6386_s17   ;;  %p4815_p0 = scmp.ge.s32.totalorder %s6386_s17, 1  ;;  %s6386_s17 = sphi %s6450_s17, %s21_s17  }
   0x2   : > { %p335_p1 = scmp.lt.s32.totalorder %s6386_s17, 3 }
   0x4   : > { %p336_p2 = pnand %p4815_p0, %p335_p1 }
   0x5   : > { %v5698_v0 = vld [vmem:[%s7972_s1 + $0x4] ss:$16 sps:$4 sm:$0xff] (!%p336_p2)   ;;  %p374_p3 = scmp.lt.s32.totalorder (!%p336_p2), %s6456_s18, 1  ;;  %v390_v1 = vlaneseq (!%p336_p2)  ;;  %v5700_v2 = vld [vmem:[%s7972_s1] ss:$16 sps:$4 sm:$0xff] (!%p336_p2)   ;;  %v6388_v3 = vmov (!%p336_p2), 0  }
   0x6   : > { %339 = sbr.rel (%p336_p2) target bundleno = 2118 (0x846), region = 64  ;;  %454 = vmatprep.mubr.bf16.mxu0 (!%p336_p2), %v6388_v3  ;;  %495 = vmatprep.mubr.bf16.mxu1 (!%p336_p2), %v6388_v3  ;;  %v5701_v5 = vld [vmem:[%s7972_s1 + $0xc] ss:$16 sps:$4 sm:$0xff] (!%p336_p2)   ;;  %v5703_v6 = vld [vmem:[%s7972_s1 + $0x8] ss:$16 sps:$4 sm:$0xff] (!%p336_p2)   ;;  %vm418_vm0 = vcmask (!%p336_p2), 130048  }
   0x7   : > { %422 = vmatprep.subr.bf16.mxu0 (!%p336_p2), %v5698_v0  ;;  %v6471_v4 = vshrl.u32 (!%p336_p2), %v390_v1, 7  ;;  %463 = vmatprep.subr.bf16.mxu1 (!%p336_p2), %v5701_v5  ;;  %v5706_v7 = vld [vmem:[%s7974_s3 + $0x184] ss:$8 sps:$4 sm:$0xff] (!%p336_p2)   ;;  %v5704_v11 = vld [vmem:[%s7974_s3 + $0x180] ss:$8 sps:$4 sm:$0xff] (!%p336_p2)   ;;  %vm534_vm1 = vcmask (!%p336_p2), 1040384  }
   0x8   : > { %423 = vmatpush1.bf16.msra.mxu0 (!%p336_p2), %v5700_v2  ;;  %464 = vmatpush1.bf16.msra.mxu1 (!%p336_p2), %v5703_v6  ;;  %v5709_v13 = vld [vmem:[%s7974_s3 + $0x194] ss:$8 sps:$4 sm:$0xff] (!%p336_p2)   ;;  %v5707_v15 = vld [vmem:[%s7974_s3 + $0x190] ss:$8 sps:$4 sm:$0xff] (!%p336_p2)   ;;  %vm535_vm2 = vsmask.f32 (!%p336_p2), 256 }
   0x9   : > { %v6486_v10 = vsub.s32 (!%p336_p2), 0, %v6471_v4  ;;  %844 = vmatprep.subr.bf16.mxu1 (!%p336_p2), %v5706_v7  ;;  %vm536_vm3 = vmand (!%p336_p2), %vm534_vm1, %vm535_vm2  ;;  %v537_v16 = vld [vmem:[#allocation2] sm:$0x1] (!%p336_p2)  ;;  %v5712_v18 = vld [vmem:[%s7974_s3 + $0x84] ss:$8 sps:$4 sm:$0xff] (!%p336_p2)   ;;  %vm540_vm4 = vcmask (!%p336_p2), 1042434  }
   0xa   : > { %v538_v17 = vsel (!%p336_p2), %vm536_vm3, 0, %v537_v16  ;;  %v5710_v19 = vld [vmem:[%s7974_s3 + $0x80] ss:$8 sps:$4 sm:$0xff] (!%p336_p2)   ;;  %v5715_v20 = vld [vmem:[%s7974_s3 + $0x1a4] ss:$8 sps:$4 sm:$0xff] (!%p336_p2)   ;;  %723 = vmatprep.subr.bf16.mxu0 (!%p336_p2), %v5712_v18  ;;  %v516_v50 = vsub.s32 (!%p336_p2), 2, %v6471_v4 }
   0xb   : > { %539 = vst [vmem:[#allocation2] sm:$0x1] (!%p336_p2), %v538_v17  ;;  %v5713_v21 = vld [vmem:[%s7974_s3 + $0x1a0] ss:$8 sps:$4 sm:$0xff] (!%p336_p2)   ;;  %v5718_v22 = vld [vmem:[%s7974_s3 + $0x94] ss:$8 sps:$4 sm:$0xff] (!%p336_p2)  }
   0xc   : > { %v5716_v23 = vld [vmem:[%s7974_s3 + $0x90] ss:$8 sps:$4 sm:$0xff] (!%p336_p2)   ;;  %v5721_v24 = vld [vmem:[%s7974_s3 + $0x1b4] ss:$8 sps:$4 sm:$0xff] (!%p336_p2)   ;;  %vm541_vm5 = vsmask.f32 (!%p336_p2), 7946 }
   0xd   : > { %s375_s23 = scalar_select %p374_p3, %s6456_s18, 1  ;;  %v5719_v25 = vld [vmem:[%s7974_s3 + $0x1b0] ss:$8 sps:$4 sm:$0xff]   ;;  %vm542_vm6 = vmand %vm540_vm4, %vm541_vm5  ;;  %v543_v26 = vld [vmem:[#allocation2] sm:$0x4]  ;;  %v6599_v52 = vsub.s32 1, %v6471_v4 }
   0xe   : > { %v544_v27 = vsel %vm542_vm6, 0, %v543_v26  ;;  %v5722_v28 = vld [vmem:[%s7974_s3 + $0xa0] ss:$8 sps:$4 sm:$0xff]   ;;  %v5724_v29 = vld [vmem:[%s7974_s3 + $0xa4] ss:$8 sps:$4 sm:$0xff]   ;;  %v520_v53 = vsub.s32 3, %v6471_v4 }
   0xf   : > { %s376_s30 = scalar_lea.vmem %s7971_s0, %s375_s23  ;;  %545 = vst [vmem:[#allocation2] sm:$0x4] %v544_v27  ;;  %v5725_v30 = vld [vmem:[%s7974_s3 + $0x1c0] ss:$8 sps:$4 sm:$0xff]   ;;  %v5727_v31 = vld [vmem:[%s7974_s3 + $0x1c4] ss:$8 sps:$4 sm:$0xff]  }
  0x10   : > { %v385_v8 = vld [vmem:[%s376_s30] sm:$0x1]  ;;  %v5730_v32 = vld [vmem:[%s7974_s3 + $0xb4] ss:$8 sps:$4 sm:$0xff]   ;;  %v5728_v33 = vld [vmem:[%s7974_s3 + $0xb0] ss:$8 sps:$4 sm:$0xff]  }
  0x11   : > { %v386_v9 = vpack.c.bf16 %v385_v8, %v385_v8  ;;  %v5733_v34 = vld [vmem:[%s7974_s3 + $0x1d4] ss:$8 sps:$4 sm:$0xff]   ;;  %v5731_v35 = vld [vmem:[%s7974_s3 + $0x1d0] ss:$8 sps:$4 sm:$0xff]   ;;  %v5736_v36 = vld [vmem:[%s7974_s3 + $0xc4] ss:$8 sps:$4 sm:$0xff]  }
  0x12   : > { %v5734_v37 = vld [vmem:[%s7974_s3 + $0xc0] ss:$8 sps:$4 sm:$0xff]   ;;  %v5739_v38 = vld [vmem:[%s7974_s3 + $0x1e4] ss:$8 sps:$4 sm:$0xff]   ;;  %v5742_v40 = vld [vmem:[%s7974_s3 + $0xd4] ss:$8 sps:$4 sm:$0xff]  }
  0x13   : > { %v388_v12 = vpack.i.b16 %v386_v9, %v386_v9  ;;  %v5737_v39 = vld [vmem:[%s7974_s3 + $0x1e0] ss:$8 sps:$4 sm:$0xff]   ;;  %v5740_v41 = vld [vmem:[%s7974_s3 + $0xd0] ss:$8 sps:$4 sm:$0xff]   ;;  %v5745_v43 = vld [vmem:[%s7974_s3 + $0x1f4] ss:$8 sps:$4 sm:$0xff]  }
  0x14   : > { %v5743_v42 = vld [vmem:[%s7974_s3 + $0x1f0] ss:$8 sps:$4 sm:$0xff]   ;;  %v5748_v44 = vld [vmem:[%s7974_s3 + $0xe4] ss:$8 sps:$4 sm:$0xff]   ;;  %v5746_v46 = vld [vmem:[%s7974_s3 + $0xe0] ss:$8 sps:$4 sm:$0xff]  }
  0x15   : > { %v393_v14 = vrot.slane %v388_v12, %v6486_v10  ;;  %v5751_v45 = vld [vmem:[%s7974_s3 + $0x104] ss:$8 sps:$4 sm:$0xff]   ;;  %v5752_v47 = vld [vmem:[%s7974_s3 + $0xf0] ss:$8 sps:$4 sm:$0xff]   ;;  %v5754_v48 = vld [vmem:[%s7974_s3 + $0xf4] ss:$8 sps:$4 sm:$0xff]  }
  0x16   : > { %v5760_v49 = vld [vmem:[%s7974_s3 + $0x4] ss:$8 sps:$4 sm:$0xff]   ;;  %v504_v51 = vld [vmem:[%s7973_s2] sm:$0xf]  ;;  %vm554_vm7 = vsmask.f32 7938 }
  0x17   : > { %4823 = vmatmul.mubr.msk.bf16.vlgmr.msra.gmra.mrb[0].mxu0 %vm418_vm0, %v393_v14  ;;  %4824 = vmatmul.mubr.msk.bf16.vlgmr.msra.gmra.mrb[0].mxu1 %vm418_vm0, %v393_v14  ;;  %v509_v54 = vrot.slane %v504_v51, %v6486_v10  ;;  %v517_v55 = vrot.slane %v504_v51, %v516_v50  ;;  %v513_v56 = vrot.slane %v504_v51, %v6599_v52  ;;  %vm565_vm8 = vcmask 1041409   ;;  %vm555_vm11 = vmand %vm534_vm1, %vm554_vm7  ;;  %v5774_v50 = vld [vmem:[%s7974_s3 + $0x140] ss:$8 sps:$4 sm:$0xff]   ;;  %s4816_s23 = sshll.u32 %s6456_s18, 2 }
  0x18   : > { %845 = vmatpush1.bf16.msra.mxu1 %v5704_v11  ;;  %876 = vmatprep.mubr.bf16.mxu1 %v6388_v3  ;;  %v521_v57 = vrot.slane %v504_v51, %v520_v53  ;;  %vm566_vm9 = vsmask.f32 1280  ;;  %vm591_vm10 = vsmask.f32 2304  ;;  %vm580_vm14 = vsmask.f32 7942 }
  0x19   : > { %846 = vmatprep.subr.bf16.mxu1 %v5709_v13  ;;  %755 = vmatprep.mubr.bf16.mxu0 %v6388_v3  ;;  %vm567_vm12 = vmand %vm565_vm8, %vm566_vm9  ;;  %v5779_v51 = vld [vmem:[%s7974_s3 + $0x34] ss:$8 sps:$4 sm:$0xff]   ;;  %vm1212_vm5 = vcmask 31744   ;;  %vm1331_vm9 = vcmask 523268   ;;  %p378_p4 = scmp.lt.s32.totalorder %s4816_s23, 7 }
  0x1a   : > { %724 = vmatpush1.bf16.msra.mxu0 %v5710_v19  ;;  %v568_v19 = vld [vmem:[#allocation2] sm:$0x2]  ;;  %vm592_vm13 = vmand %vm540_vm4, %vm591_vm10  ;;  %v5782_v53 = vld [vmem:[%s7974_s3 + $0x154] ss:$8 sps:$4 sm:$0xff]   ;;  %vm1216_vm4 = vcmask 1041408   ;;  %vm1335_vm10 = vcmask 520196  }
  0x1b   : > { %725 = vmatprep.subr.bf16.mxu0 %v5718_v22  ;;  %vm581_vm15 = vmand %vm565_vm8, %vm580_vm14  ;;  %vm1330_vm8 = vcmask 1043456   ;;  %s7984_s23 = smov (!%p378_p4, %s4816_s23), 7 }
  0x1c   : > { %847 = vmatpush1.bf16.msra.mxu1 %v5707_v15  ;;  %v556_v15 = vld [vmem:[#allocation2] sm:$0x1]  ;;  %s5627_s18 = sshll.u32 %s7984_s23, 5 }
  0x1d   : > { %848 = vmatprep.subr.bf16.mxu1 %v5715_v20  ;;  %s7950_s28 = scalar_lea.vmem %s7982_s11, %s5627_s18 }
  0x1e   : > { %726 = vmatpush1.bf16.msra.mxu0 %v5716_v23 }
  0x1f   : > { %727 = vmatprep.subr.bf16.mxu0 %v5724_v29 }
  0x20   : > { %849 = vmatpush1.bf16.msra.mxu1 %v5713_v21  ;;  %v593_v21 = vld [vmem:[#allocation2] sm:$0x4] }
  0x21   : > { %850 = vmatprep.subr.bf16.mxu1 %v5721_v24 }
  0x22   : > { %728 = vmatpush1.bf16.msra.mxu0 %v5722_v28 }
  0x23   : > { %729 = vmatprep.subr.bf16.mxu0 %v5730_v32  ;;  %v5757_v32 = vld [vmem:[%s7974_s3 + $0x114] ss:$8 sps:$4 sm:$0xff]  }
  0x24   : > { %851 = vmatpush1.bf16.msra.mxu1 %v5719_v25 }
  0x25   : > { %852 = vmatprep.subr.bf16.mxu1 %v5727_v31  ;;  %v5749_v31 = vld [vmem:[%s7974_s3 + $0x100] ss:$8 sps:$4 sm:$0xff]  }
  0x26   : > { %730 = vmatpush1.bf16.msra.mxu0 %v5728_v33 }
  0x27   : > { %731 = vmatprep.subr.bf16.mxu0 %v5736_v36  ;;  %v5763_v36 = vld [vmem:[%s7974_s3 + $0x124] ss:$8 sps:$4 sm:$0xff]  }
  0x28   : > { %853 = vmatpush1.bf16.msra.mxu1 %v5725_v30 }
  0x29   : > { %854 = vmatprep.subr.bf16.mxu1 %v5733_v34 }
  0x2a   : > { %732 = vmatpush1.bf16.msra.mxu0 %v5734_v37 }
  0x2b   : > { %733 = vmatprep.subr.bf16.mxu0 %v5742_v40  ;;  %v5758_v40 = vld [vmem:[%s7974_s3] ss:$8 sps:$4 sm:$0xff]  }
  0x2c   : > { %855 = vmatpush1.bf16.msra.mxu1 %v5731_v35  ;;  %v5755_v35 = vld [vmem:[%s7974_s3 + $0x110] ss:$8 sps:$4 sm:$0xff]  }
  0x2d   : > { %856 = vmatprep.subr.bf16.mxu1 %v5739_v38 }
  0x2e   : > { %734 = vmatpush1.bf16.msra.mxu0 %v5740_v41  ;;  %v5761_v41 = vld [vmem:[%s7974_s3 + $0x120] ss:$8 sps:$4 sm:$0xff]  }
  0x2f   : > { %735 = vmatprep.subr.bf16.mxu0 %v5748_v44  ;;  %v5770_v44 = vld [vmem:[%s7974_s3 + $0x134] ss:$8 sps:$4 sm:$0xff]  }
  0x30   : > { %857 = vmatpush1.bf16.msra.mxu1 %v5737_v39 }
  0x31   : > { %858 = vmatprep.subr.bf16.mxu1 %v5745_v43  ;;  %v5767_v43 = vld [vmem:[%s7974_s3 + $0x14] ss:$8 sps:$4 sm:$0xff]  }
  0x32   : > { %736 = vmatpush1.bf16.msra.mxu0 %v5746_v46  ;;  %v5768_v46 = vld [vmem:[%s7974_s3 + $0x130] ss:$8 sps:$4 sm:$0xff]  }
  0x33   : > { %737 = vmatprep.subr.bf16.mxu0 %v5754_v48  ;;  %v5776_v48 = vld [vmem:[%s7974_s3 + $0x144] ss:$8 sps:$4 sm:$0xff]  }
  0x34   : > { %859 = vmatpush1.bf16.msra.mxu1 %v5743_v42 }
  0x35   : > { %1143 = vmatprep.subr.bf16.mxu1 %v5751_v45  ;;  %v5765_v45 = vld [vmem:[%s7974_s3 + $0x10] ss:$8 sps:$4 sm:$0xff]  }
  0x36   : > { %738 = vmatpush1.bf16.msra.mxu0 %v5752_v47  ;;  %v5773_v47 = vld [vmem:[%s7974_s3 + $0x24] ss:$8 sps:$4 sm:$0xff]  }
  0x37   : > { %1022 = vmatprep.subr.bf16.mxu0 %v5760_v49  ;;  %v5771_v49 = vld [vmem:[%s7974_s3 + $0x20] ss:$8 sps:$4 sm:$0xff]  }
  0xea   : > { %v456_v58 = vpop.f32.mrb[0].mxu0  ;;  %v497_v59 = vpop.f32.mrb[0].mxu1 }
  0xeb   : > { %v526_v60 = vadd.f32 %v509_v54, %v456_v58  ;;  %v458_v61 = vpop.f32.mrb[1].mxu0  ;;  %v528_v62 = vadd.f32 %v517_v55, %v497_v59  ;;  %v499_v63 = vpop.f32.mrb[1].mxu1  ;;  %v5777_v54 = vld [vmem:[%s7974_s3 + $0x30] ss:$8 sps:$4 sm:$0xff]   ;;  %v5783_v58 = vld [vmem:[%s7974_s3 + $0x40] ss:$8 sps:$4 sm:$0xff]  }
  0xec   : > { %v527_v0 = vadd.f32 %v513_v56, %v458_v61  ;;  %v460_v2 = vpop.f32.mrb[2].mxu0  ;;  %v529_v5 = vadd.f32 %v521_v57, %v499_v63  ;;  %v501_v6 = vpop.f32.mrb[2].mxu1  ;;  %v5780_v55 = vld [vmem:[%s7974_s3 + $0x150] ss:$8 sps:$4 sm:$0xff]   ;;  %v5785_v56 = vld [vmem:[%s7974_s3 + $0x44] ss:$8 sps:$4 sm:$0xff]  }
  0xed   : > { %v530_v7 = vmax.f32 %v526_v60, 0.0  ;;  %v461_v8 = vpop.f32.mrb[3].mxu0  ;;  %v532_v9 = vmax.f32 %v528_v62, 0.0  ;;  %v502_v11 = vpop.f32.mrb[3].mxu1  ;;  %v5788_v57 = vld [vmem:[%s7974_s3 + $0x164] ss:$8 sps:$4 sm:$0xff]  }
  0xee   : > { %v531_v12 = vmax.f32 %v527_v0, 0.0  ;;  %v533_v13 = vmax.f32 %v529_v5, 0.0  ;;  %v5786_v59 = vld [vmem:[%s7974_s3 + $0x160] ss:$8 sps:$4 sm:$0xff]   ;;  %v5791_v60 = vld [vmem:[%s7974_s3 + $0x54] ss:$8 sps:$4 sm:$0xff]  }
  0xef   : > { %v5628_v14 = vpack.c.bf16 %v530_v7, %v530_v7  ;;  %v5630_v20 = vpack.c.bf16 %v532_v9, %v532_v9  ;;  %v5794_v61 = vld [vmem:[%s7974_s3 + $0x174] ss:$8 sps:$4 sm:$0xff]   ;;  %v5789_v62 = vld [vmem:[%s7974_s3 + $0x50] ss:$8 sps:$4 sm:$0xff]   ;;  %v5797_v0 = vld [vmem:[%s7974_s3 + $0x64] ss:$8 sps:$4 sm:$0xff]  }
  0xf0   : > { %v5629_v16 = vpack.c.bf16 %v531_v12, %v531_v12  ;;  %v5631_v17 = vpack.c.bf16 %v533_v13, %v533_v13  ;;  %v5792_v63 = vld [vmem:[%s7974_s3 + $0x170] ss:$8 sps:$4 sm:$0xff]   ;;  %v5795_v2 = vld [vmem:[%s7974_s3 + $0x60] ss:$8 sps:$4 sm:$0xff]   ;;  %v5800_v5 = vld [vmem:[%s7974_s3 + $0x74] ss:$8 sps:$4 sm:$0xff]  }
  0xf1   : > { %v551_v18 = vshll.u32 %v5628_v14, 16  ;;  %v576_v27 = vshll.u32 %v5630_v20, 16  ;;  %v5798_v6 = vld [vmem:[%s7974_s3 + $0x70] ss:$8 sps:$4 sm:$0xff]   ;;  %v5808_v9 = vld [vmem:[%s7976_s5 + $0xc0] ss:$8 sps:$4 sm:$0xff]  }
  0xf2   : > { %v563_v22 = vrot.slane %v5629_v16, 7  ;;  %v589_v23 = vrot.slane %v5631_v17, 6  ;;  %v5801_v7 = vld [vmem:[#allocation2] ss:$0 sps:$4 sm:$0x66]  }
  0xf3   : > { %v557_v24 = vsel %vm555_vm11, %v551_v18, %v556_v15  ;;  %v578_v28 = vrot.slane %v576_v27, 7  ;;  %v940_v8 = vrot.slane %v5801_v7, 1  ;;  %v5810_v11 = vld [vmem:[%s7976_s5 + $0xc4] ss:$8 sps:$4 sm:$0xff]   ;;  %v5814_v12 = vld [vmem:[%s7976_s5 + $0xd0] ss:$8 sps:$4 sm:$0xff]   ;;  %vm1332_vm11 = vmor %vm1331_vm9, %vm1330_vm8 }
  0xf4   : > { %558 = vst [vmem:[#allocation2] sm:$0x1] %v557_v24  ;;  %v569_v25 = vsel %vm567_vm12, %v563_v22, %v568_v19  ;;  %v594_v26 = vsel %vm592_vm13, %v589_v23, %v593_v21  ;;  %v5816_v13 = vld [vmem:[%s7976_s5 + $0xd4] ss:$8 sps:$4 sm:$0xff]   ;;  %v5820_v14 = vld [vmem:[%s7976_s5 + $0xe0] ss:$8 sps:$4 sm:$0xff]   ;;  %vm1336_vm12 = vmor %vm1335_vm10, %vm534_vm1 }
  0xf5   : > { %570 = vst [vmem:[#allocation2] sm:$0x2] %v569_v25  ;;  %595 = vst [vmem:[#allocation2] sm:$0x4] %v594_v26  ;;  %v5822_v15 = vld [vmem:[%s7976_s5 + $0xe4] ss:$8 sps:$4 sm:$0xff]  }
  0xf6   : > { %v5826_v16 = vld [vmem:[%s7976_s5 + $0xf0] ss:$8 sps:$4 sm:$0xff]   ;;  %v5828_v17 = vld [vmem:[%s7976_s5 + $0xf4] ss:$8 sps:$4 sm:$0xff]   ;;  %v5832_v18 = vld [vmem:[%s7976_s5 + $0x100] ss:$8 sps:$4 sm:$0xff]  }
  0xf7   : > { %v5834_v19 = vld [vmem:[%s7976_s5 + $0x104] ss:$8 sps:$4 sm:$0xff]   ;;  %v5838_v20 = vld [vmem:[%s7976_s5 + $0x110] ss:$8 sps:$4 sm:$0xff]   ;;  %v5840_v21 = vld [vmem:[%s7976_s5 + $0x114] ss:$8 sps:$4 sm:$0xff]  }
  0xf8   : > { %v5844_v22 = vld [vmem:[%s7976_s5 + $0x120] ss:$8 sps:$4 sm:$0xff]   ;;  %v5846_v23 = vld [vmem:[%s7976_s5 + $0x124] ss:$8 sps:$4 sm:$0xff]   ;;  %vm1533_vm13 = vcmask 523264   ;;  %vm2161_vm1 = vcmask 64512  }
  0xfb   : > { %v5764_v34 = vld [vmem:[#allocation2] ss:$0 sps:$4 sm:$0x77]  }
  0xfc   : > { %v582_v29 = vld [vmem:[#allocation2] sm:$0x2]  ;;  %v638_v37 = vshll.u32 %v5764_v34, 16  ;;  %v636_v38 = vshrl.u32 %v5764_v34, 16 }
  0xfd   : > { %v583_v30 = vsel %vm581_vm15, %v578_v28, %v582_v29 }
  0xfe   : > { %584 = vst [vmem:[#allocation2] sm:$0x2] %v583_v30  ;;  %v640_v39 = vrot.slane %v638_v37, 1 }
 0x100   : > { %v641_v42 = vor.u32 %v640_v39, %v636_v38  ;;  %v885_v38 = vld [vmem:[%s7975_s4] sm:$0x3] }
 0x102   : > { %756 = vmatmul.mubr.bf16.vlgmr.msra.gmra.mrb[4].mxu0 %v641_v42 }
 0x103   : > { %1023 = vmatpush1.bf16.msra.mxu0 %v5758_v40  ;;  %1054 = vmatprep.mubr.bf16.mxu0 %v6388_v3 }
 0x104   : > { %1024 = vmatprep.subr.bf16.mxu0 %v5767_v43 }
 0x105   : > { %v596_v33 = vld [vmem:[#allocation2] sm:$0x3] }
 0x106   : > { %877 = vmatmul.mubr.bf16.vlgmr.msra.gmra.mrb[4].mxu1 %v596_v33 }
 0x107   : > { %1144 = vmatpush1.bf16.msra.mxu1 %v5749_v31  ;;  %1175 = vmatprep.mubr.bf16.mxu1 %v6388_v3 }
 0x108   : > { %1145 = vmatprep.subr.bf16.mxu1 %v5757_v32  ;;  %1025 = vmatpush1.bf16.msra.mxu0 %v5765_v45 }
 0x109   : > { %1026 = vmatprep.subr.bf16.mxu0 %v5773_v47 }
 0x10b   : > { %1146 = vmatpush1.bf16.msra.mxu1 %v5755_v35  ;;  %v1194_v35 = vand.u32 127, %v390_v1 }
 0x10c   : > { %1147 = vmatprep.subr.bf16.mxu1 %v5763_v36  ;;  %1027 = vmatpush1.bf16.msra.mxu0 %v5771_v49 }
 0x10d   : > { %1028 = vmatprep.subr.bf16.mxu0 %v5779_v51  ;;  %v1195_v40 = vmul.u32 2, %v1194_v35  ;;  %v5858_v35 = vld [vmem:[%s7976_s5 + $0x144] ss:$8 sps:$4 sm:$0xff]  }
 0x10f   : > { %1148 = vmatpush1.bf16.msra.mxu1 %v5761_v41  ;;  %v890_v41 = vrot.slane %v885_v38, %v6486_v10  ;;  %v6751_v45 = vadd.s32 2, %v1195_v40  ;;  %v6760_v7 = vadd.s32 1, %v1195_v40  ;;  %v5862_v40 = vld [vmem:[%s7976_s5 + $0x150] ss:$8 sps:$4 sm:$0xff]  }
 0x110   : > { %1149 = vmatprep.subr.bf16.mxu1 %v5770_v44  ;;  %1029 = vmatpush1.bf16.msra.mxu0 %v5777_v54  ;;  %v1192_v44 = vadd.s32 8, %v6471_v4 }
 0x111   : > { %1030 = vmatprep.subr.bf16.mxu0 %v5785_v56  ;;  %vm1205_vm2 = vcmp.eq.s32.totalorder %v6471_v4, %v6751_v45  ;;  %vm1197_vm6 = vcmp.eq.s32.totalorder %v6471_v4, %v6760_v7 }
 0x112   : > { %vm1206_vm3 = vcmp.eq.s32.totalorder %v1192_v44, %v6751_v45  ;;  %vm1198_vm7 = vcmp.eq.s32.totalorder %v1192_v44, %v6760_v7  ;;  %v5868_v44 = vld [vmem:[%s7976_s5 + $0x160] ss:$8 sps:$4 sm:$0xff]  }
 0x113   : > { %1150 = vmatpush1.bf16.msra.mxu1 %v5768_v46 }
 0x114   : > { %1151 = vmatprep.subr.bf16.mxu1 %v5776_v48  ;;  %1031 = vmatpush1.bf16.msra.mxu0 %v5783_v58 }
 0x115   : > { %1032 = vmatprep.subr.bf16.mxu0 %v5791_v60  ;;  %v6389_v60 = vmov 0.0  }
 0x117   : > { %1152 = vmatpush1.bf16.msra.mxu1 %v5774_v50 }
 0x118   : > { %1153 = vmatprep.subr.bf16.mxu1 %v5782_v53  ;;  %1033 = vmatpush1.bf16.msra.mxu0 %v5789_v62  ;;  %v4946_v62 = vsel %vm1206_vm3, 1.0, %v6389_v60  ;;  %vm2391_vm3 = vsmask.f32 7424 }
 0x119   : > { %1034 = vmatprep.subr.bf16.mxu0 %v5797_v0 }
 0x11b   : > { %1154 = vmatpush1.bf16.msra.mxu1 %v5780_v55 }
 0x11c   : > { %1155 = vmatprep.subr.bf16.mxu1 %v5788_v57  ;;  %1035 = vmatpush1.bf16.msra.mxu0 %v5795_v2 }
 0x11d   : > { %1036 = vmatprep.subr.bf16.mxu0 %v5800_v5 }
 0x11f   : > { %1156 = vmatpush1.bf16.msra.mxu1 %v5786_v59 }
 0x120   : > { %1157 = vmatprep.subr.bf16.mxu1 %v5794_v61  ;;  %1037 = vmatpush1.bf16.msra.mxu0 %v5798_v6  ;;  %v4945_v61 = vsel %vm1205_vm2, 1.0, %v6389_v60  ;;  %vm2919_vm2 = vcmask 1046528  }
 0x121   : > { %v6758_v6 = vpack.c.bf16 %v4946_v62, %v4945_v61  ;;  %v5881_v61 = vld [vmem:[%s7976_s5 + $0x194] ss:$8 sps:$4 sm:$0xff]  }
 0x123   : > { %1158 = vmatpush1.bf16.msra.mxu1 %v5792_v63  ;;  %1055 = vmatmul.mubr.bf16.vlgmr.msra.gmra.mrb[8].mxu0 %v940_v8  ;;  %v5804_v8 = vld [vmem:[%s7976_s5 + $0x244] ss:$8 sps:$4 sm:$0xff]  }
 0x124   : > { %1255 = vmatprep.mubr.bf16.mxu0 %v6388_v3  ;;  %1537 = vmatprep.subr.bf16.mxu1 %v5810_v11  ;;  %v4943_v11 = vsel %vm1197_vm6, 1.0, %v6389_v60 }
 0x126   : > { %1176 = vmatmul.mubr.bf16.vlgmr.msra.gmra.mrb[8].mxu1 %v641_v42  ;;  %v894_v42 = vrot.slane %v885_v38, %v6599_v52  ;;  %v5859_v38 = vld [vmem:[%s7976_s5 + $0x2e0] ss:$8 sps:$4 sm:$0xff]  }
 0x127   : > { %1538 = vmatpush1.bf16.msra.mxu1 %v5808_v9 }
 0x128   : > { %1539 = vmatprep.subr.bf16.mxu1 %v5816_v13 }
 0x12b   : > { %1540 = vmatpush1.bf16.msra.mxu1 %v5814_v12  ;;  %v4944_v12 = vsel %vm1198_vm7, 1.0, %v6389_v60 }
 0x12c   : > { %1541 = vmatprep.subr.bf16.mxu1 %v5822_v15  ;;  %v6773_v13 = vpack.c.bf16 %v4944_v12, %v4943_v11  ;;  %v5807_v15 = vld [vmem:[%s7976_s5 + $0x254] ss:$8 sps:$4 sm:$0xff]  }
 0x12f   : > { %1542 = vmatpush1.bf16.msra.mxu1 %v5820_v14  ;;  %v5802_v14 = vld [vmem:[%s7976_s5 + $0x240] ss:$8 sps:$4 sm:$0xff]  }
 0x130   : > { %1543 = vmatprep.subr.bf16.mxu1 %v5828_v17  ;;  %v5813_v17 = vld [vmem:[%s7976_s5 + $0x264] ss:$8 sps:$4 sm:$0xff]  }
 0x133   : > { %1544 = vmatpush1.bf16.msra.mxu1 %v5826_v16  ;;  %v5805_v16 = vld [vmem:[%s7976_s5 + $0x250] ss:$8 sps:$4 sm:$0xff]  }
 0x134   : > { %1545 = vmatprep.subr.bf16.mxu1 %v5834_v19  ;;  %v5819_v19 = vld [vmem:[%s7976_s5 + $0x274] ss:$8 sps:$4 sm:$0xff]  }
 0x137   : > { %1546 = vmatpush1.bf16.msra.mxu1 %v5832_v18  ;;  %v5811_v18 = vld [vmem:[%s7976_s5 + $0x260] ss:$8 sps:$4 sm:$0xff]  }
 0x138   : > { %1547 = vmatprep.subr.bf16.mxu1 %v5840_v21  ;;  %v5825_v21 = vld [vmem:[%s7976_s5 + $0x284] ss:$8 sps:$4 sm:$0xff]  }
 0x13b   : > { %1548 = vmatpush1.bf16.msra.mxu1 %v5838_v20  ;;  %v5817_v20 = vld [vmem:[%s7976_s5 + $0x270] ss:$8 sps:$4 sm:$0xff]  }
 0x13c   : > { %1549 = vmatprep.subr.bf16.mxu1 %v5846_v23  ;;  %v5831_v23 = vld [vmem:[%s7976_s5 + $0x294] ss:$8 sps:$4 sm:$0xff]  }
 0x13f   : > { %1550 = vmatpush1.bf16.msra.mxu1 %v5844_v22  ;;  %v5823_v22 = vld [vmem:[%s7976_s5 + $0x280] ss:$8 sps:$4 sm:$0xff]  }
 0x1d5   : > { %v757_v28 = vpop.f32.mrb[4].mxu0 }
 0x1d6   : > { %v759_v30 = vpop.f32.mrb[5].mxu0 }
 0x1d7   : > { %v761_v32 = vpop.f32.mrb[6].mxu0 }
 0x1d8   : > { %v762_v33 = vpop.f32.mrb[7].mxu0  ;;  %v5855_v32 = vld [vmem:[%s7976_s5 + $0x2d4] ss:$8 sps:$4 sm:$0xff]  }
 0x1d9   : > { %v878_v24 = vpop.f32.mrb[4].mxu1  ;;  %v5850_v33 = vld [vmem:[%s7976_s5 + $0x130] ss:$8 sps:$4 sm:$0xff]  }
 0x1da   : > { %v880_v25 = vpop.f32.mrb[5].mxu1  ;;  %v879_v29 = vadd.f32 %v878_v24, %v757_v28  ;;  %v5829_v24 = vld [vmem:[%s7976_s5 + $0x290] ss:$8 sps:$4 sm:$0xff]  }
 0x1db   : > { %v882_v26 = vpop.f32.mrb[6].mxu1  ;;  %v881_v31 = vadd.f32 %v880_v25, %v759_v30  ;;  %v5837_v25 = vld [vmem:[%s7976_s5 + $0x2a4] ss:$8 sps:$4 sm:$0xff]   ;;  %v5841_v28 = vld [vmem:[%s7976_s5 + $0x2b0] ss:$8 sps:$4 sm:$0xff]  }
 0x1dc   : > { %v883_v27 = vpop.f32.mrb[7].mxu1  ;;  %v897_v1 = vadd.f32 %v890_v41, %v879_v29  ;;  %v5835_v26 = vld [vmem:[%s7976_s5 + $0x2a0] ss:$8 sps:$4 sm:$0xff]   ;;  %v5849_v29 = vld [vmem:[%s7976_s5 + $0x2c4] ss:$8 sps:$4 sm:$0xff]  }
 0x1dd   : > { %v898_v48 = vadd.f32 %v894_v42, %v881_v31  ;;  %v5843_v27 = vld [vmem:[%s7976_s5 + $0x2b4] ss:$8 sps:$4 sm:$0xff]   ;;  %v5847_v30 = vld [vmem:[%s7976_s5 + $0x2c0] ss:$8 sps:$4 sm:$0xff]  }
 0x1de   : > { %v899_v56 = vmax.f32 %v897_v1, 0.0  ;;  %v5852_v31 = vld [vmem:[%s7976_s5 + $0x134] ss:$8 sps:$4 sm:$0xff]  }
 0x1df   : > { %v900_v57 = vmax.f32 %v898_v48, 0.0  ;;  %1551 = vmatprep.subr.bf16.mxu1 %v5852_v31  ;;  %v5878_v1 = vld [vmem:[%s7976_s5 + $0x174] ss:$8 sps:$4 sm:$0xff]   ;;  %v5885_v48 = vld [vmem:[%s7976_s5 + $0x4] ss:$8 sps:$4 sm:$0xff]  }
 0x1e0   : > { %v901_v2 = vpack.c.bf16 %v899_v56, %v899_v56  ;;  %1552 = vmatpush1.bf16.msra.mxu1 %v5850_v33  ;;  %v5905_v31 = vld [vmem:[%s7976_s5 + $0x34] ss:$8 sps:$4 sm:$0xff]   ;;  %v5903_v33 = vld [vmem:[%s7976_s5 + $0x30] ss:$8 sps:$4 sm:$0xff]  }
 0x1e1   : > { %v902_v5 = vpack.c.bf16 %v900_v57, %v900_v57  ;;  %1553 = vmatprep.subr.bf16.mxu1 %v5858_v35  ;;  %v5911_v35 = vld [vmem:[%s7976_s5 + $0x44] ss:$8 sps:$4 sm:$0xff]  }
 0x1e2   : > { %v1270_v9 = vsel %vm1216_vm4, %v901_v2, 0  ;;  %v5879_v2 = vld [vmem:[%s7976_s5 + $0x190] ss:$8 sps:$4 sm:$0xff]  }
 0x1f6   : > { %v1056_v43 = vpop.f32.mrb[8].mxu0 }
 0x1f7   : > { %v1058_v47 = vpop.f32.mrb[9].mxu0 }
 0x1f8   : > { %v1060_v50 = vpop.f32.mrb[10].mxu0 }
 0x1f9   : > { %v1177_v34 = vpop.f32.mrb[8].mxu1  ;;  %v1061_v53 = vpop.f32.mrb[11].mxu0 }
 0x1fa   : > { %v1179_v36 = vpop.f32.mrb[9].mxu1  ;;  %v1178_v46 = vadd.f32 %v1177_v34, %v1056_v43  ;;  %v5853_v34 = vld [vmem:[%s7976_s5 + $0x2d0] ss:$8 sps:$4 sm:$0xff]   ;;  %v5870_v43 = vld [vmem:[%s7976_s5 + $0x164] ss:$8 sps:$4 sm:$0xff]  }
 0x1fb   : > { %v1181_v37 = vpop.f32.mrb[10].mxu1  ;;  %v1180_v49 = vadd.f32 %v1179_v36, %v1058_v47  ;;  %v5861_v36 = vld [vmem:[%s7976_s5 + $0x2e4] ss:$8 sps:$4 sm:$0xff]   ;;  %v5876_v47 = vld [vmem:[%s7976_s5 + $0x170] ss:$8 sps:$4 sm:$0xff]  }
 0x1fc   : > { %v1182_v39 = vpop.f32.mrb[11].mxu1  ;;  %v1184_v51 = vadd.f32 %v1178_v46, %v890_v41  ;;  %v5856_v37 = vld [vmem:[%s7976_s5 + $0x140] ss:$8 sps:$4 sm:$0xff]   ;;  %v5865_v41 = vld [vmem:[%s7976_s5 + $0x2f0] ss:$8 sps:$4 sm:$0xff]  }
 0x1fd   : > { %v1185_v54 = vadd.f32 %v1180_v49, %v894_v42  ;;  %v5864_v39 = vld [vmem:[%s7976_s5 + $0x154] ss:$8 sps:$4 sm:$0xff]   ;;  %1554 = vmatpush1.bf16.msra.mxu1 %v5856_v37  ;;  %v5874_v46 = vld [vmem:[%s7976_s5 + $0x184] ss:$8 sps:$4 sm:$0xff]   ;;  %v5909_v37 = vld [vmem:[%s7976_s5 + $0x40] ss:$8 sps:$4 sm:$0xff]  }
 0x1fe   : > { %v1186_v55 = vmax.f32 %v1184_v51, 0.0  ;;  %v5867_v42 = vld [vmem:[%s7976_s5 + $0x2f4] ss:$8 sps:$4 sm:$0xff]   ;;  %1555 = vmatprep.subr.bf16.mxu1 %v5864_v39 }
 0x1ff   : > { %v1187_v58 = vmax.f32 %v1185_v54, 0.0  ;;  %v5917_v39 = vld [vmem:[%s7976_s5 + $0x54] ss:$8 sps:$4 sm:$0xff]  }
 0x200   : > { %v1188_v59 = vpack.c.bf16 %v1186_v55, %v1186_v55 }
 0x201   : > { %v1189_v63 = vpack.c.bf16 %v1187_v58, %v1187_v58  ;;  %1556 = vmatpush1.bf16.msra.mxu1 %v5862_v40  ;;  %v5872_v58 = vld [vmem:[%s7976_s5 + $0x180] ss:$8 sps:$4 sm:$0xff]   ;;  %v5920_v40 = vld [vmem:[%s7976_s5 + $0x1f4] ss:$8 sps:$4 sm:$0xff]  }
 0x202   : > { %v1218_v0 = vsel %vm1216_vm4, %v1188_v59, 0  ;;  %1557 = vmatprep.subr.bf16.mxu1 %v5870_v43  ;;  %v5923_v43 = vld [vmem:[%s7976_s5 + $0x64] ss:$8 sps:$4 sm:$0xff]  }
 0x203   : > { %4947 = vmatprep.subr.msk.bf16.mxu0 %vm1216_vm4, %v1189_v63 }
 0x204   : > { %1224 = vmatpush1.bf16.msra.mxu0 %v1218_v0 }
 0x205   : > { %4949 = vmatprep.subr.msk.bf16.mxu0 %vm1216_vm4, %v902_v5  ;;  %1558 = vmatpush1.bf16.msra.mxu1 %v5868_v44  ;;  %v5926_v44 = vld [vmem:[%s7976_s5 + $0x204] ss:$8 sps:$4 sm:$0xff]  }
 0x206   : > { %1559 = vmatprep.subr.bf16.mxu1 %v5878_v1  ;;  %v5929_v1 = vld [vmem:[%s7976_s5 + $0x74] ss:$8 sps:$4 sm:$0xff]  }
 0x207   : > { %4948 = vmatmul.mubr.msk.bf16.vlgmr.msra.gmra.mrb[12].mxu0 %vm1212_vm5, %v6758_v6 }
 0x208   : > { %1276 = vmatpush1.bf16.msra.mxu0 %v1270_v9  ;;  %1307 = vmatprep.mubr.bf16.mxu0 %v6388_v3  ;;  %v5888_v9 = vld [vmem:[%s7976_s5 + $0x1a4] ss:$8 sps:$4 sm:$0xff]  }
 0x209   : > { %1704 = vmatprep.subr.bf16.mxu0 %v5804_v8  ;;  %1560 = vmatpush1.bf16.msra.mxu1 %v5876_v47  ;;  %v5924_v47 = vld [vmem:[%s7976_s5 + $0x200] ss:$8 sps:$4 sm:$0xff]  }
 0x20a   : > { %1944 = vmatprep.subr.bf16.mxu1 %v5885_v48  ;;  %v5932_v48 = vld [vmem:[%s7976_s5 + $0x214] ss:$8 sps:$4 sm:$0xff]  }
 0x213   : > { %4950 = vmatmul.mubr.msk.bf16.vlgmr.msra.gmra.mrb[12].mxu0 %vm1212_vm5, %v6773_v13 }
 0x214   : > { %1705 = vmatpush1.bf16.msra.mxu0 %v5802_v14 }
 0x215   : > { %1706 = vmatprep.subr.bf16.mxu0 %v5807_v15 }
 0x218   : > { %1707 = vmatpush1.bf16.msra.mxu0 %v5805_v16 }
 0x219   : > { %1708 = vmatprep.subr.bf16.mxu0 %v5813_v17 }
 0x21c   : > { %1709 = vmatpush1.bf16.msra.mxu0 %v5811_v18 }
 0x21d   : > { %1710 = vmatprep.subr.bf16.mxu0 %v5819_v19  ;;  %v5883_v19 = vld [vmem:[%s7976_s5] ss:$8 sps:$4 sm:$0xff]  }
 0x220   : > { %1711 = vmatpush1.bf16.msra.mxu0 %v5817_v20  ;;  %v5886_v20 = vld [vmem:[%s7976_s5 + $0x1a0] ss:$8 sps:$4 sm:$0xff]  }
 0x221   : > { %1712 = vmatprep.subr.bf16.mxu0 %v5825_v21 }
 0x224   : > { %1713 = vmatpush1.bf16.msra.mxu0 %v5823_v22  ;;  %v5893_v22 = vld [vmem:[%s7976_s5 + $0x14] ss:$8 sps:$4 sm:$0xff]  }
 0x225   : > { %1714 = vmatprep.subr.bf16.mxu0 %v5831_v23  ;;  %v5896_v23 = vld [vmem:[%s7976_s5 + $0x1b4] ss:$8 sps:$4 sm:$0xff]  }
 0x228   : > { %1715 = vmatpush1.bf16.msra.mxu0 %v5829_v24 }
 0x229   : > { %1716 = vmatprep.subr.bf16.mxu0 %v5837_v25  ;;  %v5891_v25 = vld [vmem:[%s7976_s5 + $0x10] ss:$8 sps:$4 sm:$0xff]  }
 0x22c   : > { %1717 = vmatpush1.bf16.msra.mxu0 %v5835_v26  ;;  %v5894_v26 = vld [vmem:[%s7976_s5 + $0x1b0] ss:$8 sps:$4 sm:$0xff]  }
 0x22d   : > { %1718 = vmatprep.subr.bf16.mxu0 %v5843_v27  ;;  %v5899_v27 = vld [vmem:[%s7976_s5 + $0x24] ss:$8 sps:$4 sm:$0xff]  }
 0x230   : > { %1719 = vmatpush1.bf16.msra.mxu0 %v5841_v28  ;;  %v5902_v28 = vld [vmem:[%s7976_s5 + $0x1c4] ss:$8 sps:$4 sm:$0xff]  }
 0x231   : > { %1720 = vmatprep.subr.bf16.mxu0 %v5849_v29  ;;  %v5897_v29 = vld [vmem:[%s7976_s5 + $0x20] ss:$8 sps:$4 sm:$0xff]  }
 0x234   : > { %1721 = vmatpush1.bf16.msra.mxu0 %v5847_v30  ;;  %v5900_v30 = vld [vmem:[%s7976_s5 + $0x1c0] ss:$8 sps:$4 sm:$0xff]  }
 0x235   : > { %1722 = vmatprep.subr.bf16.mxu0 %v5855_v32  ;;  %v5908_v32 = vld [vmem:[%s7976_s5 + $0x1d4] ss:$8 sps:$4 sm:$0xff]  }
 0x238   : > { %1723 = vmatpush1.bf16.msra.mxu0 %v5853_v34  ;;  %v5906_v34 = vld [vmem:[%s7976_s5 + $0x1d0] ss:$8 sps:$4 sm:$0xff]  }
 0x239   : > { %1724 = vmatprep.subr.bf16.mxu0 %v5861_v36  ;;  %v5914_v36 = vld [vmem:[%s7976_s5 + $0x1e4] ss:$8 sps:$4 sm:$0xff]  }
 0x23c   : > { %1725 = vmatpush1.bf16.msra.mxu0 %v5859_v38  ;;  %v5912_v38 = vld [vmem:[%s7976_s5 + $0x1e0] ss:$8 sps:$4 sm:$0xff]  }
 0x23d   : > { %1726 = vmatprep.subr.bf16.mxu0 %v5867_v42  ;;  %v5918_v42 = vld [vmem:[%s7976_s5 + $0x1f0] ss:$8 sps:$4 sm:$0xff]  }
 0x240   : > { %1727 = vmatpush1.bf16.msra.mxu0 %v5865_v41  ;;  %v5915_v41 = vld [vmem:[%s7976_s5 + $0x50] ss:$8 sps:$4 sm:$0xff]  }
 0x241   : > { %2105 = vmatprep.subr.bf16.mxu0 %v5874_v46  ;;  %v5921_v46 = vld [vmem:[%s7976_s5 + $0x60] ss:$8 sps:$4 sm:$0xff]  }
 0x2e6   : > { %v1309_v49 = vpop.f32.mrb[12].mxu0 }
 0x2e7   : > { %v1311_v50 = vpop.f32.mrb[13].mxu0 }
 0x2e8   : > { %v5632_v51 = vpack.c.bf16 %v1311_v50, %v1309_v49  ;;  %v1313_v53 = vpop.f32.mrb[14].mxu0  ;;  %v5927_v49 = vld [vmem:[%s7976_s5 + $0x70] ss:$8 sps:$4 sm:$0xff]  }
 0x2e9   : > { %v1315_v54 = vpop.f32.mrb[15].mxu0  ;;  %v5930_v50 = vld [vmem:[%s7976_s5 + $0x210] ss:$8 sps:$4 sm:$0xff]  }
 0x2ea   : > { %1333 = vst.msk [vmem:[#allocation3] sm:$0xff] %vm1332_vm11, %v5632_v51  ;;  %v5633_v55 = vpack.c.bf16 %v1315_v54, %v1313_v53  ;;  %v5935_v51 = vld [vmem:[%s7976_s5 + $0x84] ss:$8 sps:$4 sm:$0xff]   ;;  %v5933_v54 = vld [vmem:[%s7976_s5 + $0x80] ss:$8 sps:$4 sm:$0xff]  }
 0x2eb   : > { %v5938_v53 = vld [vmem:[%s7976_s5 + $0x224] ss:$8 sps:$4 sm:$0xff]  }
 0x2ec   : > { %1337 = vst.msk [vmem:[#allocation3 + $0x8] sm:$0x11] %vm1336_vm12, %v5633_v55  ;;  %v5936_v55 = vld [vmem:[%s7976_s5 + $0x220] ss:$8 sps:$4 sm:$0xff]  }
 0x2f1   : > { %v1338_v56 = vld [vmem:[#allocation3] sm:$0xff] }
 0x2f2   : > { %v5029_v57 = vcombine.high %v1338_v56, %v1338_v56  ;;  %v5028_v59 = vcombine.low %v1338_v56, %v1338_v56  ;;  %v6901_v16 = vld [vmem:[#allocation3] sm:$0xee] }
 0x2f3   : > { %v6890_v62 = vld [vmem:[#allocation3 + $0x8] sm:$0x11] }
 0x2f4   : > { %5054 = vmatprep.mubr.msk.bf16.mxu0 %vm1533_vm13, %v5029_v57  ;;  %v5002_v63 = vcombine.high %v1338_v56, %v6890_v62  ;;  %v5001_v0 = vcombine.low %v1338_v56, %v6890_v62  ;;  %v5080_v17 = vcombine.high %v6901_v16, %v6890_v62  ;;  %v5941_v56 = vld [vmem:[%s7976_s5 + $0x94] ss:$8 sps:$4 sm:$0xff]  }
 0x2f5   : > { %1737 = vmatmul.mubr.bf16.vlgmr.msra.gmra.mrb[16].mxu0 %v5028_v59  ;;  %v5944_v57 = vld [vmem:[%s7976_s5 + $0x234] ss:$8 sps:$4 sm:$0xff]   ;;  %v5942_v59 = vld [vmem:[%s7976_s5 + $0x230] ss:$8 sps:$4 sm:$0xff]  }
 0x2f6   : > { %2106 = vmatpush1.bf16.msra.mxu0 %v5872_v58  ;;  %v1408_v5 = vshll.u32 %v5002_v63, 16  ;;  %v1401_v8 = vshll.u32 %v5001_v0, 16  ;;  %v1406_v11 = vshrl.u32 %v5002_v63, 16  ;;  %v1399_v14 = vshrl.u32 %v5001_v0, 16  ;;  %v5939_v58 = vld [vmem:[%s7976_s5 + $0x90] ss:$8 sps:$4 sm:$0xff]  }
 0x2f7   : > { %2107 = vmatprep.subr.bf16.mxu0 %v5881_v61  ;;  %v1819_v24 = vrot.slane %v5080_v17, 1  ;;  %v5947_v61 = vld [vmem:[%s7976_s5 + $0xa4] ss:$8 sps:$4 sm:$0xff]   ;;  %v5945_v63 = vld [vmem:[%s7976_s5 + $0xa0] ss:$8 sps:$4 sm:$0xff]  }
 0x2f8   : > { %v1410_v12 = vrot.slane %v1408_v5, 1  ;;  %v1403_v15 = vrot.slane %v1401_v8, 1  ;;  %v5950_v0 = vld [vmem:[%s7976_s5 + $0xb4] ss:$8 sps:$4 sm:$0xff]   ;;  %v5079_v5 = vcombine.low %v6901_v16, %v6890_v62  ;;  %v5961_v62 = vld [vmem:[%s7978_s7 + $0x110] ss:$8 sps:$4 sm:$0xff]  }
 0x2f9   : > { %v5975_v16 = vld [vmem:[%s7978_s7 + $0x134] ss:$8 sps:$4 sm:$0xff]   ;;  %v5973_v17 = vld [vmem:[%s7978_s7 + $0x130] ss:$8 sps:$4 sm:$0xff]  }
 0x2fa   : > { %2108 = vmatpush1.bf16.msra.mxu0 %v5879_v2  ;;  %v1411_v18 = vor.u32 %v1410_v12, %v1406_v11  ;;  %v6911_v21 = vor.u32 %v1403_v15, %v1399_v14  ;;  %v5948_v2 = vld [vmem:[%s7976_s5 + $0xb0] ss:$8 sps:$4 sm:$0xff]   ;;  %v1818_v8 = vrot.slane %v5079_v5, 1  ;;  %v5957_v11 = vld [vmem:[%s7978_s7 + $0x104] ss:$8 sps:$4 sm:$0xff]   ;;  %v2152_v5 = vadd.s32 16, %v6471_v4 }
 0x2fb   : > { %2109 = vmatprep.subr.bf16.mxu0 %v5888_v9  ;;  %v5955_v9 = vld [vmem:[%s7978_s7 + $0x100] ss:$8 sps:$4 sm:$0xff]   ;;  %v5963_v12 = vld [vmem:[%s7978_s7 + $0x114] ss:$8 sps:$4 sm:$0xff]   ;;  %v5969_v14 = vld [vmem:[%s7978_s7 + $0x124] ss:$8 sps:$4 sm:$0xff]  }
 0x2fc   : > { %5027 = vmatprep.mubr.msk.bf16.mxu1 %vm1533_vm13, %v1411_v18  ;;  %5130 = vmatprep.mubr.msk.bf16.mxu0 %vm1533_vm13, %v1411_v18  ;;  %v5967_v15 = vld [vmem:[%s7978_s7 + $0x120] ss:$8 sps:$4 sm:$0xff]   ;;  %v5981_v18 = vld [vmem:[%s7978_s7 + $0x144] ss:$8 sps:$4 sm:$0xff]   ;;  %vm2157_vm14 = vcmp.eq.s32.totalorder %v2152_v5, %v6751_v45  ;;  %vm2153_vm15 = vcmp.eq.s32.totalorder %v2152_v5, %v6760_v7 }
 0x2fd   : > { %1570 = vmatmul.mubr.bf16.vlgmr.msra.gmra.mrb[12].mxu1 %v6911_v21 }
 0x2fe   : > { %1945 = vmatpush1.bf16.msra.mxu1 %v5883_v19  ;;  %2110 = vmatpush1.bf16.msra.mxu0 %v5886_v20  ;;  %v5979_v19 = vld [vmem:[%s7978_s7 + $0x140] ss:$8 sps:$4 sm:$0xff]   ;;  %v5987_v20 = vld [vmem:[%s7978_s7 + $0x154] ss:$8 sps:$4 sm:$0xff]  }
 0x2ff   : > { %5105 = vmatprep.mubr.msk.bf16.mxu1 %vm1533_vm13, %v1819_v24  ;;  %1946 = vmatprep.subr.bf16.mxu1 %v5893_v22  ;;  %v5993_v22 = vld [vmem:[%s7978_s7 + $0x164] ss:$8 sps:$4 sm:$0xff]   ;;  %v5999_v24 = vld [vmem:[%s7978_s7 + $0x174] ss:$8 sps:$4 sm:$0xff]  }
 0x300   : > { %2111 = vmatprep.subr.bf16.mxu0 %v5896_v23  ;;  %v5991_v23 = vld [vmem:[%s7978_s7 + $0x160] ss:$8 sps:$4 sm:$0xff]  }
 0x302   : > { %1947 = vmatpush1.bf16.msra.mxu1 %v5891_v25  ;;  %2112 = vmatpush1.bf16.msra.mxu0 %v5894_v26  ;;  %v5997_v25 = vld [vmem:[%s7978_s7 + $0x170] ss:$8 sps:$4 sm:$0xff]   ;;  %v6005_v26 = vld [vmem:[%s7978_s7 + $0x184] ss:$8 sps:$4 sm:$0xff]  }
 0x303   : > { %1948 = vmatprep.subr.bf16.mxu1 %v5899_v27  ;;  %2113 = vmatprep.subr.bf16.mxu0 %v5902_v28  ;;  %v6003_v27 = vld [vmem:[%s7978_s7 + $0x180] ss:$8 sps:$4 sm:$0xff]   ;;  %v6011_v28 = vld [vmem:[%s7978_s7 + $0x194] ss:$8 sps:$4 sm:$0xff]  }
 0x306   : > { %1949 = vmatpush1.bf16.msra.mxu1 %v5897_v29  ;;  %2114 = vmatpush1.bf16.msra.mxu0 %v5900_v30 }
 0x307   : > { %1950 = vmatprep.subr.bf16.mxu1 %v5905_v31  ;;  %2115 = vmatprep.subr.bf16.mxu0 %v5908_v32  ;;  %v6009_v32 = vld [vmem:[%s7978_s7 + $0x190] ss:$8 sps:$4 sm:$0xff]  }
 0x30a   : > { %1951 = vmatpush1.bf16.msra.mxu1 %v5903_v33  ;;  %2116 = vmatpush1.bf16.msra.mxu0 %v5906_v34 }
 0x30b   : > { %1952 = vmatprep.subr.bf16.mxu1 %v5911_v35  ;;  %2117 = vmatprep.subr.bf16.mxu0 %v5914_v36 }
 0x30e   : > { %1953 = vmatpush1.bf16.msra.mxu1 %v5909_v37  ;;  %2118 = vmatpush1.bf16.msra.mxu0 %v5912_v38 }
 0x30f   : > { %1954 = vmatprep.subr.bf16.mxu1 %v5917_v39  ;;  %2119 = vmatprep.subr.bf16.mxu0 %v5920_v40 }
 0x312   : > { %1955 = vmatpush1.bf16.msra.mxu1 %v5915_v41  ;;  %2120 = vmatpush1.bf16.msra.mxu0 %v5918_v42 }
 0x313   : > { %1956 = vmatprep.subr.bf16.mxu1 %v5923_v43  ;;  %2121 = vmatprep.subr.bf16.mxu0 %v5926_v44  ;;  %v1745_v43 = vld [vmem:[%s7977_s6] sm:$0x3] }
 0x316   : > { %1957 = vmatpush1.bf16.msra.mxu1 %v5921_v46  ;;  %2122 = vmatpush1.bf16.msra.mxu0 %v5924_v47  ;;  %v1750_v46 = vrot.slane %v1745_v43, %v6486_v10  ;;  %v1754_v47 = vrot.slane %v1745_v43, %v6599_v52  ;;  %v6023_v43 = vld [vmem:[%s7978_s7 + $0x1b4] ss:$8 sps:$4 sm:$0xff]  }
 0x317   : > { %1958 = vmatprep.subr.bf16.mxu1 %v5929_v1  ;;  %2123 = vmatprep.subr.bf16.mxu0 %v5932_v48 }
 0x31a   : > { %1959 = vmatpush1.bf16.msra.mxu1 %v5927_v49  ;;  %2124 = vmatpush1.bf16.msra.mxu0 %v5930_v50 }
 0x31b   : > { %1960 = vmatprep.subr.bf16.mxu1 %v5935_v51  ;;  %2125 = vmatprep.subr.bf16.mxu0 %v5938_v53 }
 0x31e   : > { %1961 = vmatpush1.bf16.msra.mxu1 %v5933_v54  ;;  %2126 = vmatpush1.bf16.msra.mxu0 %v5936_v55 }
 0x31f   : > { %1962 = vmatprep.subr.bf16.mxu1 %v5941_v56  ;;  %2127 = vmatprep.subr.bf16.mxu0 %v5944_v57 }
 0x322   : > { %1963 = vmatpush1.bf16.msra.mxu1 %v5939_v58  ;;  %2128 = vmatpush1.bf16.msra.mxu0 %v5942_v59 }
 0x323   : > { %1964 = vmatprep.subr.bf16.mxu1 %v5947_v61  ;;  %2578 = vmatprep.subr.bf16.mxu0 %v5957_v11 }
 0x325   : > { %2138 = vmatmul.mubr.bf16.vlgmr.msra.gmra.mrb[20].mxu0 %v6911_v21  ;;  %v5985_v21 = vld [vmem:[%s7978_s7 + $0x150] ss:$8 sps:$4 sm:$0xff]  }
 0x326   : > { %1965 = vmatpush1.bf16.msra.mxu1 %v5945_v63  ;;  %2579 = vmatpush1.bf16.msra.mxu0 %v5955_v9 }
 0x327   : > { %1966 = vmatprep.subr.bf16.mxu1 %v5950_v0  ;;  %2580 = vmatprep.subr.bf16.mxu0 %v5963_v12  ;;  %v5954_v12 = vld [vmem:[%s7978_s7 + $0x4] ss:$8 sps:$4 sm:$0xff]  }
 0x32a   : > { %1967 = vmatpush1.bf16.msra.mxu1 %v5948_v2  ;;  %2581 = vmatpush1.bf16.msra.mxu0 %v5961_v62 }
 0x32b   : > { %2582 = vmatprep.subr.bf16.mxu0 %v5969_v14  ;;  %v7119_v14 = vsel %vm2157_vm14, 1.0, %v6389_v60 }
 0x32d   : > { %1977 = vmatmul.mubr.bf16.vlgmr.msra.gmra.mrb[16].mxu1 %v1818_v8 }
 0x32e   : > { %2205 = vmatprep.mubr.bf16.mxu1 %v6388_v3  ;;  %2583 = vmatpush1.bf16.msra.mxu0 %v5967_v15  ;;  %v2160_v15 = vpack.c.bf16 %v7119_v14, %v7119_v14 }
 0x32f   : > { %2584 = vmatprep.subr.bf16.mxu0 %v5975_v16  ;;  %v5952_v16 = vld [vmem:[%s7978_s7] ss:$8 sps:$4 sm:$0xff]  }
 0x332   : > { %2585 = vmatpush1.bf16.msra.mxu0 %v5973_v17  ;;  %v5960_v17 = vld [vmem:[%s7978_s7 + $0x14] ss:$8 sps:$4 sm:$0xff]  }
 0x333   : > { %2586 = vmatprep.subr.bf16.mxu0 %v5981_v18  ;;  %v7136_v18 = vsel %vm2153_vm15, 1.0, %v6389_v60 }
 0x336   : > { %2587 = vmatpush1.bf16.msra.mxu0 %v5979_v19  ;;  %v5958_v19 = vld [vmem:[%s7978_s7 + $0x10] ss:$8 sps:$4 sm:$0xff]  }
 0x337   : > { %2588 = vmatprep.subr.bf16.mxu0 %v5987_v20  ;;  %v5966_v20 = vld [vmem:[%s7978_s7 + $0x24] ss:$8 sps:$4 sm:$0xff]  }
 0x33a   : > { %2589 = vmatpush1.bf16.msra.mxu0 %v5985_v21  ;;  %v2156_v21 = vpack.c.bf16 %v7136_v18, %v7136_v18 }
 0x33b   : > { %2590 = vmatprep.subr.bf16.mxu0 %v5993_v22  ;;  %v5964_v22 = vld [vmem:[%s7978_s7 + $0x20] ss:$8 sps:$4 sm:$0xff]  }
 0x33e   : > { %2591 = vmatpush1.bf16.msra.mxu0 %v5991_v23  ;;  %v5972_v23 = vld [vmem:[%s7978_s7 + $0x34] ss:$8 sps:$4 sm:$0xff]  }
 0x33f   : > { %2592 = vmatprep.subr.bf16.mxu0 %v5999_v24  ;;  %v5970_v24 = vld [vmem:[%s7978_s7 + $0x30] ss:$8 sps:$4 sm:$0xff]  }
 0x342   : > { %2593 = vmatpush1.bf16.msra.mxu0 %v5997_v25  ;;  %v5978_v25 = vld [vmem:[%s7978_s7 + $0x44] ss:$8 sps:$4 sm:$0xff]  }
 0x343   : > { %2594 = vmatprep.subr.bf16.mxu0 %v6005_v26  ;;  %v5976_v26 = vld [vmem:[%s7978_s7 + $0x40] ss:$8 sps:$4 sm:$0xff]  }
 0x346   : > { %2595 = vmatpush1.bf16.msra.mxu0 %v6003_v27  ;;  %v5984_v27 = vld [vmem:[%s7978_s7 + $0x54] ss:$8 sps:$4 sm:$0xff]  }
 0x347   : > { %2596 = vmatprep.subr.bf16.mxu0 %v6011_v28  ;;  %v5982_v28 = vld [vmem:[%s7978_s7 + $0x50] ss:$8 sps:$4 sm:$0xff]  }
 0x34a   : > { %2597 = vmatpush1.bf16.msra.mxu0 %v6009_v32  ;;  %v5994_v32 = vld [vmem:[%s7978_s7 + $0x70] ss:$8 sps:$4 sm:$0xff]  }
 0x3c8   : > { %v1738_v29 = vpop.f32.mrb[16].mxu0 }
 0x3c9   : > { %v1740_v30 = vpop.f32.mrb[17].mxu0 }
 0x3ca   : > { %v1742_v31 = vpop.f32.mrb[18].mxu0 }
 0x3cb   : > { %v1743_v33 = vpop.f32.mrb[19].mxu0  ;;  %v5996_v31 = vld [vmem:[%s7978_s7 + $0x74] ss:$8 sps:$4 sm:$0xff]  }
 0x3cc   : > { %v6002_v33 = vld [vmem:[%s7978_s7 + $0x84] ss:$8 sps:$4 sm:$0xff]  }
 0x3d0   : > { %v1571_v34 = vpop.f32.mrb[12].mxu1 }
 0x3d1   : > { %v1739_v35 = vadd.f32 %v1738_v29, %v1571_v34  ;;  %v1573_v36 = vpop.f32.mrb[13].mxu1  ;;  %v5990_v29 = vld [vmem:[%s7978_s7 + $0x64] ss:$8 sps:$4 sm:$0xff]   ;;  %v6000_v34 = vld [vmem:[%s7978_s7 + $0x80] ss:$8 sps:$4 sm:$0xff]  }
 0x3d2   : > { %v1741_v37 = vadd.f32 %v1740_v30, %v1573_v36  ;;  %v1575_v38 = vpop.f32.mrb[14].mxu1  ;;  %v5988_v30 = vld [vmem:[%s7978_s7 + $0x60] ss:$8 sps:$4 sm:$0xff]   ;;  %v6006_v36 = vld [vmem:[%s7978_s7 + $0x90] ss:$8 sps:$4 sm:$0xff]  }
 0x3d3   : > { %v1576_v39 = vpop.f32.mrb[15].mxu1  ;;  %v1757_v50 = vadd.f32 %v1750_v46, %v1739_v35  ;;  %v6008_v35 = vld [vmem:[%s7978_s7 + $0x94] ss:$8 sps:$4 sm:$0xff]   ;;  %v6012_v38 = vld [vmem:[%s7978_s7 + $0xa0] ss:$8 sps:$4 sm:$0xff]  }
 0x3d4   : > { %v1758_v51 = vadd.f32 %v1754_v47, %v1741_v37  ;;  %v6014_v37 = vld [vmem:[%s7978_s7 + $0xa4] ss:$8 sps:$4 sm:$0xff]  }
 0x3d5   : > { %v1759_v59 = vmax.f32 %v1757_v50, 0.0  ;;  %v6017_v39 = vld [vmem:[%s7978_s7 + $0x1a4] ss:$8 sps:$4 sm:$0xff]   ;;  %v6030_v50 = vld [vmem:[%s7978_s7 + $0xd0] ss:$8 sps:$4 sm:$0xff]  }
 0x3d6   : > { %v1760_v61 = vmax.f32 %v1758_v51, 0.0  ;;  %2598 = vmatprep.subr.bf16.mxu0 %v6017_v39  ;;  %v6033_v51 = vld [vmem:[%s7978_s7 + $0x1d0] ss:$8 sps:$4 sm:$0xff]  }
 0x3d7   : > { %v1761_v9 = vpack.c.bf16 %v1759_v59, %v1759_v59  ;;  %v6047_v59 = vld [vmem:[%s7978_s7 + $0x1f4] ss:$8 sps:$4 sm:$0xff]  }
 0x3d8   : > { %v1762_v11 = vpack.c.bf16 %v1760_v61, %v1760_v61  ;;  %v6042_v61 = vld [vmem:[%s7978_s7 + $0xf0] ss:$8 sps:$4 sm:$0xff]  }
 0x3d9   : > { %v2230_v62 = vsel %vm1330_vm8, %v1761_v9, 0 }
 0x3f8   : > { %v2139_v40 = vpop.f32.mrb[20].mxu0 }
 0x3f9   : > { %v2141_v41 = vpop.f32.mrb[21].mxu0 }
 0x3fa   : > { %v2143_v42 = vpop.f32.mrb[22].mxu0 }
 0x3fb   : > { %v2144_v44 = vpop.f32.mrb[23].mxu0  ;;  %v6018_v42 = vld [vmem:[%s7978_s7 + $0xb0] ss:$8 sps:$4 sm:$0xff]  }
 0x3fc   : > { %v6021_v44 = vld [vmem:[%s7978_s7 + $0x1b0] ss:$8 sps:$4 sm:$0xff]  }
 0x400   : > { %v1978_v1 = vpop.f32.mrb[16].mxu1 }
 0x401   : > { %v2140_v48 = vadd.f32 %v2139_v40, %v1978_v1  ;;  %v1980_v49 = vpop.f32.mrb[17].mxu1  ;;  %v6015_v40 = vld [vmem:[%s7978_s7 + $0x1a0] ss:$8 sps:$4 sm:$0xff]   ;;  %v6029_v1 = vld [vmem:[%s7978_s7 + $0x1c4] ss:$8 sps:$4 sm:$0xff]  }
 0x402   : > { %v2142_v53 = vadd.f32 %v2141_v41, %v1980_v49  ;;  %v1982_v54 = vpop.f32.mrb[18].mxu1  ;;  %v6020_v41 = vld [vmem:[%s7978_s7 + $0xb4] ss:$8 sps:$4 sm:$0xff]   ;;  %2599 = vmatpush1.bf16.msra.mxu0 %v6015_v40 }
 0x403   : > { %v2146_v55 = vadd.f32 %v2140_v48, %v1750_v46  ;;  %v1983_v56 = vpop.f32.mrb[19].mxu1  ;;  %2600 = vmatprep.subr.bf16.mxu0 %v6023_v43  ;;  %v6026_v46 = vld [vmem:[%s7978_s7 + $0xc4] ss:$8 sps:$4 sm:$0xff]   ;;  %v6027_v48 = vld [vmem:[%s7978_s7 + $0x1c0] ss:$8 sps:$4 sm:$0xff]  }
 0x404   : > { %v2147_v57 = vadd.f32 %v2142_v53, %v1754_v47  ;;  %v6024_v47 = vld [vmem:[%s7978_s7 + $0xc0] ss:$8 sps:$4 sm:$0xff]   ;;  %v6032_v49 = vld [vmem:[%s7978_s7 + $0xd4] ss:$8 sps:$4 sm:$0xff]   ;;  %v6038_v54 = vld [vmem:[%s7978_s7 + $0xe4] ss:$8 sps:$4 sm:$0xff]  }
 0x405   : > { %v2148_v58 = vmax.f32 %v2146_v55, 0.0  ;;  %v6035_v53 = vld [vmem:[%s7978_s7 + $0x1d4] ss:$8 sps:$4 sm:$0xff]   ;;  %v6036_v55 = vld [vmem:[%s7978_s7 + $0xe0] ss:$8 sps:$4 sm:$0xff]  }
 0x406   : > { %v2149_v63 = vmax.f32 %v2147_v57, 0.0  ;;  %2601 = vmatpush1.bf16.msra.mxu0 %v6021_v44  ;;  %v6041_v56 = vld [vmem:[%s7978_s7 + $0x1e4] ss:$8 sps:$4 sm:$0xff]   ;;  %v6044_v57 = vld [vmem:[%s7978_s7 + $0xf4] ss:$8 sps:$4 sm:$0xff]  }
 0x407   : > { %v2150_v0 = vpack.c.bf16 %v2148_v58, %v2148_v58  ;;  %2602 = vmatprep.subr.bf16.mxu0 %v6029_v1  ;;  %v6039_v58 = vld [vmem:[%s7978_s7 + $0x1e0] ss:$8 sps:$4 sm:$0xff]  }
 0x408   : > { %v2151_v2 = vpack.c.bf16 %v2149_v63, %v2149_v63  ;;  %v6045_v63 = vld [vmem:[%s7978_s7 + $0x1f0] ss:$8 sps:$4 sm:$0xff]  }
 0x409   : > { %v2168_v8 = vsel %vm1330_vm8, %v2150_v0, 0  ;;  %v6052_v0 = vld [vmem:[%s7978_s7 + $0x204] ss:$8 sps:$4 sm:$0xff]  }
 0x40a   : > { %5133 = vmatprep.subr.msk.bf16.mxu1 %vm1330_vm8, %v2151_v2  ;;  %2603 = vmatpush1.bf16.msra.mxu0 %v6027_v48  ;;  %v6055_v2 = vld [vmem:[%s7978_s7 + $0x304] ss:$8 sps:$4 sm:$0xff]   ;;  %v6053_v48 = vld [vmem:[%s7978_s7 + $0x300] ss:$8 sps:$4 sm:$0xff]  }
 0x40b   : > { %2174 = vmatpush1.bf16.msra.mxu1 %v2168_v8  ;;  %2604 = vmatprep.subr.bf16.mxu0 %v6035_v53  ;;  %v6061_v53 = vld [vmem:[%s7978_s7 + $0x314] ss:$8 sps:$4 sm:$0xff]  }
 0x40c   : > { %5136 = vmatprep.subr.msk.bf16.mxu1 %vm1330_vm8, %v1762_v11 }
 0x40e   : > { %5134 = vmatmul.mubr.msk.bf16.vlgmr.msra.gmra.mrb[20].mxu1 %vm2161_vm1, %v6758_v6  ;;  %2605 = vmatpush1.bf16.msra.mxu0 %v6033_v51  ;;  %v6058_v51 = vld [vmem:[%s7978_s7 + $0x214] ss:$8 sps:$4 sm:$0xff]  }
 0x40f   : > { %2236 = vmatpush1.bf16.msra.mxu1 %v2230_v62  ;;  %2215 = vmatprep.mubr.bf16.mxu1 %v6388_v3 }
 0x410   : > { %3088 = vmatprep.subr.bf16.mxu1 %v5954_v12  ;;  %2606 = vmatprep.subr.bf16.mxu0 %v6041_v56  ;;  %v6059_v56 = vld [vmem:[%s7978_s7 + $0x310] ss:$8 sps:$4 sm:$0xff]  }
 0x412   : > { %2607 = vmatpush1.bf16.msra.mxu0 %v6039_v58  ;;  %v6062_v58 = vld [vmem:[%s7978_s7 + $0x220] ss:$8 sps:$4 sm:$0xff]  }
 0x413   : > { %2608 = vmatprep.subr.bf16.mxu0 %v6047_v59  ;;  %v6070_v59 = vld [vmem:[%s7978_s7 + $0x234] ss:$8 sps:$4 sm:$0xff]  }
 0x416   : > { %5135 = vmatmul.mubr.msk.bf16.gmra.mrb[24].mxu1 %vm2161_vm1, %v2160_v15  ;;  %2609 = vmatpush1.bf16.msra.mxu0 %v6045_v63  ;;  %v6073_v63 = vld [vmem:[%s7978_s7 + $0x334] ss:$8 sps:$4 sm:$0xff]  }
 0x417   : > { %2267 = vmatprep.mubr.bf16.mxu1 %v6388_v3  ;;  %2783 = vmatprep.subr.bf16.mxu0 %v6055_v2  ;;  %v6076_v2 = vld [vmem:[%s7978_s7 + $0x244] ss:$8 sps:$4 sm:$0xff]  }
 0x41e   : > { %5137 = vmatmul.mubr.msk.bf16.vlgmr.msra.gmra.mrb[20].mxu1 %vm2161_vm1, %v6773_v13 }
 0x41f   : > { %2277 = vmatprep.mubr.bf16.mxu1 %v6388_v3  ;;  %3089 = vmatpush1.bf16.msra.mxu1 %v5952_v16 }
 0x420   : > { %3090 = vmatprep.subr.bf16.mxu1 %v5960_v17 }
 0x423   : > { %3091 = vmatpush1.bf16.msra.mxu1 %v5958_v19 }
 0x424   : > { %3092 = vmatprep.subr.bf16.mxu1 %v5966_v20 }
 0x426   : > { %5138 = vmatmul.mubr.msk.bf16.gmra.mrb[24].mxu1 %vm2161_vm1, %v2156_v21 }
 0x427   : > { %3093 = vmatpush1.bf16.msra.mxu1 %v5964_v22 }
 0x428   : > { %3094 = vmatprep.subr.bf16.mxu1 %v5972_v23 }
 0x42b   : > { %3095 = vmatpush1.bf16.msra.mxu1 %v5970_v24 }
 0x42c   : > { %3096 = vmatprep.subr.bf16.mxu1 %v5978_v25 }
 0x42f   : > { %3097 = vmatpush1.bf16.msra.mxu1 %v5976_v26 }
 0x430   : > { %3098 = vmatprep.subr.bf16.mxu1 %v5984_v27 }
 0x433   : > { %3099 = vmatpush1.bf16.msra.mxu1 %v5982_v28 }
 0x434   : > { %3100 = vmatprep.subr.bf16.mxu1 %v5990_v29 }
 0x437   : > { %3101 = vmatpush1.bf16.msra.mxu1 %v5988_v30 }
 0x438   : > { %3102 = vmatprep.subr.bf16.mxu1 %v5996_v31 }
 0x43b   : > { %3103 = vmatpush1.bf16.msra.mxu1 %v5994_v32 }
 0x43c   : > { %3104 = vmatprep.subr.bf16.mxu1 %v6002_v33 }
 0x43f   : > { %3105 = vmatpush1.bf16.msra.mxu1 %v6000_v34 }
 0x440   : > { %3106 = vmatprep.subr.bf16.mxu1 %v6008_v35 }
 0x443   : > { %3107 = vmatpush1.bf16.msra.mxu1 %v6006_v36 }
 0x444   : > { %3108 = vmatprep.subr.bf16.mxu1 %v6014_v37 }
 0x447   : > { %3109 = vmatpush1.bf16.msra.mxu1 %v6012_v38 }
 0x448   : > { %3110 = vmatprep.subr.bf16.mxu1 %v6020_v41  ;;  %v6050_v41 = vld [vmem:[%s7978_s7 + $0x200] ss:$8 sps:$4 sm:$0xff]  }
 0x44b   : > { %3111 = vmatpush1.bf16.msra.mxu1 %v6018_v42 }
 0x44c   : > { %3112 = vmatprep.subr.bf16.mxu1 %v6026_v46 }
 0x44f   : > { %3113 = vmatpush1.bf16.msra.mxu1 %v6024_v47 }
 0x450   : > { %3114 = vmatprep.subr.bf16.mxu1 %v6032_v49 }
 0x453   : > { %3115 = vmatpush1.bf16.msra.mxu1 %v6030_v50 }
 0x454   : > { %3116 = vmatprep.subr.bf16.mxu1 %v6038_v54  ;;  %v6056_v54 = vld [vmem:[%s7978_s7 + $0x210] ss:$8 sps:$4 sm:$0xff]  }
 0x457   : > { %3117 = vmatpush1.bf16.msra.mxu1 %v6036_v55  ;;  %v6064_v55 = vld [vmem:[%s7978_s7 + $0x224] ss:$8 sps:$4 sm:$0xff]  }
 0x458   : > { %3118 = vmatprep.subr.bf16.mxu1 %v6044_v57  ;;  %v6067_v57 = vld [vmem:[%s7978_s7 + $0x324] ss:$8 sps:$4 sm:$0xff]  }
 0x45b   : > { %3119 = vmatpush1.bf16.msra.mxu1 %v6042_v61  ;;  %v6065_v61 = vld [vmem:[%s7978_s7 + $0x320] ss:$8 sps:$4 sm:$0xff]  }
 0x45c   : > { %3291 = vmatprep.subr.bf16.mxu1 %v6052_v0  ;;  %v6068_v0 = vld [vmem:[%s7978_s7 + $0x230] ss:$8 sps:$4 sm:$0xff]  }
 0x4f1   : > { %v2269_v5 = vpop.f32.mrb[20].mxu1 }
 0x4f2   : > { %v2271_v8 = vpop.f32.mrb[21].mxu1 }
 0x4f3   : > { %v5634_v9 = vpack.c.bf16 %v2271_v8, %v2269_v5  ;;  %v2273_v11 = vpop.f32.mrb[22].mxu1 }
 0x4f4   : > { %v2275_v12 = vpop.f32.mrb[23].mxu1  ;;  %v7270_v16 = vpack.c.bf16 %v2273_v11, %v2269_v5  ;;  %v6071_v5 = vld [vmem:[%s7978_s7 + $0x330] ss:$8 sps:$4 sm:$0xff]  }
 0x4f5   : > { %2306 = vst [vmem:[#allocation4] sm:$0xff] %v5634_v9  ;;  %v5635_v62 = vpack.c.bf16 %v2275_v12, %v2273_v11  ;;  %v6374_v15 = vpack.c.bf16 %v2275_v12, %v2271_v8  ;;  %v6079_v8 = vld [vmem:[%s7978_s7 + $0x344] ss:$8 sps:$4 sm:$0xff]   ;;  %v6074_v9 = vld [vmem:[%s7978_s7 + $0x240] ss:$8 sps:$4 sm:$0xff]  }
 0x4f6   : > { %v2395_v25 = vshll.u32 %v7270_v16, 16  ;;  %v2393_v36 = vshrl.u32 %v7270_v16, 16  ;;  %v6082_v11 = vld [vmem:[%s7978_s7 + $0x254] ss:$8 sps:$4 sm:$0xff]   ;;  %v6077_v12 = vld [vmem:[%s7978_s7 + $0x340] ss:$8 sps:$4 sm:$0xff]  }
 0x4f7   : > { %v2407_v24 = vshll.u32 %v6374_v15, 16  ;;  %v2405_v35 = vshrl.u32 %v6374_v15, 16 }
 0x4f8   : > { %v2397_v30 = vrot.slane %v2395_v25, 1  ;;  %v6092_v25 = vld [vmem:[%s7978_s7 + $0x270] ss:$8 sps:$4 sm:$0xff]  }
 0x4f9   : > { %v2279_v17 = vpop.f32.mrb[24].mxu1  ;;  %v2409_v29 = vrot.slane %v2407_v24, 1  ;;  %v6097_v24 = vld [vmem:[%s7978_s7 + $0x374] ss:$8 sps:$4 sm:$0xff]  }
 0x4fa   : > { %v2281_v19 = vpop.f32.mrb[25].mxu1  ;;  %v2398_v43 = vor.u32 %v2397_v30, %v2393_v36  ;;  %v6106_v30 = vld [vmem:[%s7978_s7 + $0x294] ss:$8 sps:$4 sm:$0xff]   ;;  %v6115_v36 = vld [vmem:[%s7978_s7 + $0x3a4] ss:$8 sps:$4 sm:$0xff]  }
 0x4fb   : > { %v5636_v20 = vpack.c.bf16 %v2281_v19, %v2279_v17  ;;  %v2283_v21 = vpop.f32.mrb[26].mxu1  ;;  %v2410_v42 = vor.u32 %v2409_v29, %v2405_v35  ;;  %v6088_v17 = vld [vmem:[%s7978_s7 + $0x264] ss:$8 sps:$4 sm:$0xff]   ;;  %v6083_v19 = vld [vmem:[%s7978_s7 + $0x350] ss:$8 sps:$4 sm:$0xff]  }
 0x4fc   : > { %v2284_v22 = vpop.f32.mrb[27].mxu1  ;;  %v2848_v23 = vld [vmem:[#allocation4] sm:$0xee]  ;;  %v6086_v21 = vld [vmem:[%s7978_s7 + $0x260] ss:$8 sps:$4 sm:$0xff]  }
 0x4fd   : > { %2308 = vst [vmem:[#allocation4 + $0x10] sm:$0x11] %v5636_v20  ;;  %v5306_v26 = vcombine.low %v2848_v23, %v5635_v62  ;;  %v5307_v27 = vcombine.high %v2848_v23, %v5635_v62  ;;  %v6085_v62 = vld [vmem:[%s7978_s7 + $0x354] ss:$8 sps:$4 sm:$0xff]   ;;  %v6091_v20 = vld [vmem:[%s7978_s7 + $0x364] ss:$8 sps:$4 sm:$0xff]  }
 0x4fe   : > { %v6094_v22 = vld [vmem:[%s7978_s7 + $0x274] ss:$8 sps:$4 sm:$0xff]   ;;  %v6089_v23 = vld [vmem:[%s7978_s7 + $0x360] ss:$8 sps:$4 sm:$0xff]   ;;  %v6107_v35 = vld [vmem:[%s7978_s7 + $0x390] ss:$8 sps:$4 sm:$0xff]  }
 0x4ff   : > { %v2920_v33 = vrot.slane %v5306_v26, 1  ;;  %v2923_v34 = vrot.slane %v5307_v27, 1  ;;  %v6100_v26 = vld [vmem:[%s7978_s7 + $0x284] ss:$8 sps:$4 sm:$0xff]   ;;  %v6095_v27 = vld [vmem:[%s7978_s7 + $0x370] ss:$8 sps:$4 sm:$0xff]  }
 0x500   : > { %v6098_v29 = vld [vmem:[%s7978_s7 + $0x280] ss:$8 sps:$4 sm:$0xff]  }
 0x504   : > { %v2311_v28 = vld [vmem:[#allocation4 + $0x10] sm:$0x11] }
 0x505   : > { %v5208_v31 = vcombine.low %v2311_v28, %v2311_v28  ;;  %v5209_v32 = vcombine.high %v2311_v28, %v2311_v28  ;;  %v6103_v28 = vld [vmem:[%s7978_s7 + $0x384] ss:$8 sps:$4 sm:$0xff]  }
 0x507   : > { %v2924_v37 = vrot.slane %v5209_v32, 1  ;;  %v2921_v38 = vrot.slane %v5208_v31, 1  ;;  %v2412_v39 = vshll.u32 %v5209_v32, 16  ;;  %v2400_v40 = vshll.u32 %v5208_v31, 16  ;;  %v6101_v31 = vld [vmem:[%s7978_s7 + $0x380] ss:$8 sps:$4 sm:$0xff]  }
 0x508   : > { %v6109_v32 = vld [vmem:[%s7978_s7 + $0x394] ss:$8 sps:$4 sm:$0xff]  }
 0x509   : > { %v2925_v44 = vsel %vm2919_vm2, %v2923_v34, %v2924_v37  ;;  %v2922_v46 = vsel %vm2919_vm2, %v2920_v33, %v2921_v38  ;;  %v2414_v47 = vrot.slane %v2412_v39, 1  ;;  %v2402_v1 = vrot.slane %v2400_v40, 1  ;;  %v6104_v33 = vld [vmem:[%s7978_s7 + $0x290] ss:$8 sps:$4 sm:$0xff]   ;;  %v6112_v34 = vld [vmem:[%s7978_s7 + $0x2a4] ss:$8 sps:$4 sm:$0xff]  }
 0x50a   : > { %3120 = vmatprep.mubr.bf16.mxu1 %v2925_v44  ;;  %v6110_v37 = vld [vmem:[%s7978_s7 + $0x2a0] ss:$8 sps:$4 sm:$0xff]   ;;  %v6118_v38 = vld [vmem:[%s7978_s7 + $0x2b4] ss:$8 sps:$4 sm:$0xff]   ;;  %v6127_v44 = vld [vmem:[%s7978_s7 + $0x3c4] ss:$8 sps:$4 sm:$0xff]  }
 0x50b   : > { %3121 = vmatmul.mubr.bf16.vlgmr.msra.gmra.mrb[28].mxu1 %v2922_v46  ;;  %v2415_v49 = vsel %vm2391_vm3, %v2410_v42, %v2414_v47  ;;  %v7284_v50 = vsel %vm2391_vm3, %v2398_v43, %v2402_v1  ;;  %v6113_v39 = vld [vmem:[%s7978_s7 + $0x3a0] ss:$8 sps:$4 sm:$0xff]   ;;  %v6121_v40 = vld [vmem:[%s7978_s7 + $0x3b4] ss:$8 sps:$4 sm:$0xff]   ;;  %v6124_v42 = vld [vmem:[%s7978_s7 + $0x2c4] ss:$8 sps:$4 sm:$0xff]  }
 0x50c   : > { %3292 = vmatpush1.bf16.msra.mxu1 %v6050_v41  ;;  %2610 = vmatprep.mubr.bf16.mxu0 %v2415_v49  ;;  %v6116_v41 = vld [vmem:[%s7978_s7 + $0x2b0] ss:$8 sps:$4 sm:$0xff]   ;;  %v6122_v46 = vld [vmem:[%s7978_s7 + $0x2c0] ss:$8 sps:$4 sm:$0xff]   ;;  %v6130_v47 = vld [vmem:[%s7978_s7 + $0x2d4] ss:$8 sps:$4 sm:$0xff]  }
 0x50d   : > { %3323 = vmatprep.mubr.bf16.mxu1 %v2415_v49  ;;  %2611 = vmatmul.mubr.bf16.vlgmr.msra.gmra.mrb[24].mxu0 %v7284_v50  ;;  %v6119_v43 = vld [vmem:[%s7978_s7 + $0x3b0] ss:$8 sps:$4 sm:$0xff]   ;;  %v6125_v1 = vld [vmem:[%s7978_s7 + $0x3c0] ss:$8 sps:$4 sm:$0xff]  }
 0x50e   : > { %2784 = vmatpush1.bf16.msra.mxu0 %v6053_v48  ;;  %2815 = vmatprep.mubr.bf16.mxu0 %v6374_v15  ;;  %v6080_v15 = vld [vmem:[%s7978_s7 + $0x250] ss:$8 sps:$4 sm:$0xff]   ;;  %v6133_v48 = vld [vmem:[%s7978_s7 + $0x3d4] ss:$8 sps:$4 sm:$0xff]  }
 0x50f   : > { %3293 = vmatprep.subr.bf16.mxu1 %v6058_v51  ;;  %2785 = vmatprep.subr.bf16.mxu0 %v6061_v53  ;;  %v6128_v49 = vld [vmem:[%s7978_s7 + $0x2d0] ss:$8 sps:$4 sm:$0xff]   ;;  %v6136_v51 = vld [vmem:[%s7978_s7 + $0x2e4] ss:$8 sps:$4 sm:$0xff]  }
 0x510   : > { %3294 = vmatpush1.bf16.msra.mxu1 %v6056_v54  ;;  %v6131_v53 = vld [vmem:[%s7978_s7 + $0x3d0] ss:$8 sps:$4 sm:$0xff]   ;;  %v6139_v54 = vld [vmem:[%s7978_s7 + $0x3e4] ss:$8 sps:$4 sm:$0xff]  }
 0x511   : > { %3295 = vmatprep.subr.bf16.mxu1 %v6064_v55  ;;  %v6134_v55 = vld [vmem:[%s7978_s7 + $0x2e0] ss:$8 sps:$4 sm:$0xff]  }
 0x512   : > { %2786 = vmatpush1.bf16.msra.mxu0 %v6059_v56  ;;  %v6142_v56 = vld [vmem:[%s7978_s7 + $0x2f4] ss:$8 sps:$4 sm:$0xff]  }
 0x513   : > { %2787 = vmatprep.subr.bf16.mxu0 %v6067_v57  ;;  %v6137_v57 = vld [vmem:[%s7978_s7 + $0x3e0] ss:$8 sps:$4 sm:$0xff]  }
 0x514   : > { %3296 = vmatpush1.bf16.msra.mxu1 %v6062_v58  ;;  %v6145_v58 = vld [vmem:[%s7978_s7 + $0x3f4] ss:$8 sps:$4 sm:$0xff]  }
 0x515   : > { %3297 = vmatprep.subr.bf16.mxu1 %v6070_v59  ;;  %v6140_v59 = vld [vmem:[%s7978_s7 + $0x2f0] ss:$8 sps:$4 sm:$0xff]  }
 0x516   : > { %2788 = vmatpush1.bf16.msra.mxu0 %v6065_v61  ;;  %v6143_v61 = vld [vmem:[%s7978_s7 + $0x3f0] ss:$8 sps:$4 sm:$0xff]  }
 0x517   : > { %2789 = vmatprep.subr.bf16.mxu0 %v6073_v63  ;;  %v2826_v63 = vld [vmem:[%s7979_s8] sm:$0x3] }
 0x518   : > { %3298 = vmatpush1.bf16.msra.mxu1 %v6068_v0  ;;  %v2831_v0 = vrot.slane %v2826_v63, %v6486_v10 }
 0x519   : > { %3299 = vmatprep.subr.bf16.mxu1 %v6076_v2  ;;  %v2835_v2 = vrot.slane %v2826_v63, %v6599_v52  ;;  %v6178_v63 = vld [vmem:[%s7980_s9 + $0x54] ss:$8 sps:$4 sm:$0xff]  }
 0x51a   : > { %2790 = vmatpush1.bf16.msra.mxu0 %v6071_v5 }
 0x51b   : > { %2791 = vmatprep.subr.bf16.mxu0 %v6079_v8 }
 0x51c   : > { %3300 = vmatpush1.bf16.msra.mxu1 %v6074_v9 }
 0x51d   : > { %3301 = vmatprep.subr.bf16.mxu1 %v6082_v11 }
 0x51e   : > { %2792 = vmatpush1.bf16.msra.mxu0 %v6077_v12 }
 0x51f   : > { %2793 = vmatprep.subr.bf16.mxu0 %v6085_v62 }
 0x520   : > { %3302 = vmatpush1.bf16.msra.mxu1 %v6080_v15 }
 0x521   : > { %3303 = vmatprep.subr.bf16.mxu1 %v6088_v17 }
 0x522   : > { %2794 = vmatpush1.bf16.msra.mxu0 %v6083_v19 }
 0x523   : > { %2795 = vmatprep.subr.bf16.mxu0 %v6091_v20 }
 0x524   : > { %3304 = vmatpush1.bf16.msra.mxu1 %v6086_v21 }
 0x525   : > { %3305 = vmatprep.subr.bf16.mxu1 %v6094_v22 }
 0x526   : > { %2796 = vmatpush1.bf16.msra.mxu0 %v6089_v23 }
 0x527   : > { %2797 = vmatprep.subr.bf16.mxu0 %v6097_v24 }
 0x528   : > { %3306 = vmatpush1.bf16.msra.mxu1 %v6092_v25 }
 0x529   : > { %3307 = vmatprep.subr.bf16.mxu1 %v6100_v26 }
 0x52a   : > { %2798 = vmatpush1.bf16.msra.mxu0 %v6095_v27 }
 0x52b   : > { %2799 = vmatprep.subr.bf16.mxu0 %v6103_v28 }
 0x52c   : > { %3308 = vmatpush1.bf16.msra.mxu1 %v6098_v29 }
 0x52d   : > { %3309 = vmatprep.subr.bf16.mxu1 %v6106_v30 }
 0x52e   : > { %2800 = vmatpush1.bf16.msra.mxu0 %v6101_v31 }
 0x52f   : > { %2801 = vmatprep.subr.bf16.mxu0 %v6109_v32 }
 0x530   : > { %3310 = vmatpush1.bf16.msra.mxu1 %v6104_v33 }
 0x531   : > { %3311 = vmatprep.subr.bf16.mxu1 %v6112_v34 }
 0x532   : > { %2802 = vmatpush1.bf16.msra.mxu0 %v6107_v35  ;;  %v3344_v35 = vadd.s32 24, %v6471_v4 }
 0x533   : > { %2803 = vmatprep.subr.bf16.mxu0 %v6115_v36  ;;  %v6151_v36 = vld [vmem:[%s7980_s9 + $0x104] ss:$8 sps:$4 sm:$0xff]  }
 0x534   : > { %3312 = vmatpush1.bf16.msra.mxu1 %v6110_v37  ;;  %vm3354_vm4 = vcmp.eq.s32.totalorder %v3344_v35, %v6751_v45  ;;  %vm3346_vm5 = vcmp.eq.s32.totalorder %v3344_v35, %v6760_v7  ;;  %v6223_v35 = vld [vmem:[%s7980_s9 + $0x1c4] ss:$8 sps:$4 sm:$0xff]  }
 0x535   : > { %3313 = vmatprep.subr.bf16.mxu1 %v6118_v38 }
 0x536   : > { %2804 = vmatpush1.bf16.msra.mxu0 %v6113_v39  ;;  %v6148_v39 = vld [vmem:[%s7980_s9 + $0x4] ss:$8 sps:$4 sm:$0xff]  }
 0x537   : > { %2805 = vmatprep.subr.bf16.mxu0 %v6121_v40  ;;  %v6149_v40 = vld [vmem:[%s7980_s9 + $0x100] ss:$8 sps:$4 sm:$0xff]  }
 0x538   : > { %3314 = vmatpush1.bf16.msra.mxu1 %v6116_v41  ;;  %v6157_v41 = vld [vmem:[%s7980_s9 + $0x114] ss:$8 sps:$4 sm:$0xff]  }
 0x539   : > { %3315 = vmatprep.subr.bf16.mxu1 %v6124_v42  ;;  %v6146_v42 = vld [vmem:[%s7980_s9] ss:$8 sps:$4 sm:$0xff]  }
 0x53a   : > { %2806 = vmatpush1.bf16.msra.mxu0 %v6119_v43  ;;  %v6154_v43 = vld [vmem:[%s7980_s9 + $0x14] ss:$8 sps:$4 sm:$0xff]  }
 0x53b   : > { %2807 = vmatprep.subr.bf16.mxu0 %v6127_v44  ;;  %v5374_v44 = vsel %vm3354_vm4, 1.0, %v6389_v60 }
 0x53c   : > { %3316 = vmatpush1.bf16.msra.mxu1 %v6122_v46  ;;  %v6155_v46 = vld [vmem:[%s7980_s9 + $0x110] ss:$8 sps:$4 sm:$0xff]  }
 0x53d   : > { %3317 = vmatprep.subr.bf16.mxu1 %v6130_v47  ;;  %v6163_v47 = vld [vmem:[%s7980_s9 + $0x124] ss:$8 sps:$4 sm:$0xff]  }
 0x53e   : > { %2808 = vmatpush1.bf16.msra.mxu0 %v6125_v1  ;;  %v5372_v1 = vsel %vm3346_vm5, 1.0, %v6389_v60 }
 0x53f   : > { %2809 = vmatprep.subr.bf16.mxu0 %v6133_v48  ;;  %v6152_v48 = vld [vmem:[%s7980_s9 + $0x10] ss:$8 sps:$4 sm:$0xff]  }
 0x540   : > { %3318 = vmatpush1.bf16.msra.mxu1 %v6128_v49  ;;  %v3360_v49 = vpack.c.bf16 %v5374_v44, %v7119_v14  ;;  %v6158_v14 = vld [vmem:[%s7980_s9 + $0x20] ss:$8 sps:$4 sm:$0xff]  }
 0x541   : > { %3319 = vmatprep.subr.bf16.mxu1 %v6136_v51  ;;  %v3352_v51 = vpack.c.bf16 %v5372_v1, %v7136_v18  ;;  %v6166_v18 = vld [vmem:[%s7980_s9 + $0x34] ss:$8 sps:$4 sm:$0xff]   ;;  %v6233_v44 = vld [vmem:[%s7980_s9 + $0x1e0] ss:$8 sps:$4 sm:$0xff]   ;;  %v6239_v1 = vld [vmem:[%s7980_s9 + $0x1f0] ss:$8 sps:$4 sm:$0xff]  }
 0x542   : > { %2810 = vmatpush1.bf16.msra.mxu0 %v6131_v53  ;;  %v6169_v53 = vld [vmem:[%s7980_s9 + $0x134] ss:$8 sps:$4 sm:$0xff]  }
 0x543   : > { %2811 = vmatprep.subr.bf16.mxu0 %v6139_v54  ;;  %v6167_v54 = vld [vmem:[%s7980_s9 + $0x130] ss:$8 sps:$4 sm:$0xff]  }
 0x544   : > { %3320 = vmatpush1.bf16.msra.mxu1 %v6134_v55 }
 0x545   : > { %3321 = vmatprep.subr.bf16.mxu1 %v6142_v56  ;;  %v6164_v56 = vld [vmem:[%s7980_s9 + $0x30] ss:$8 sps:$4 sm:$0xff]  }
 0x546   : > { %2812 = vmatpush1.bf16.msra.mxu0 %v6137_v57 }
 0x547   : > { %2813 = vmatprep.subr.bf16.mxu0 %v6145_v58  ;;  %v6172_v58 = vld [vmem:[%s7980_s9 + $0x44] ss:$8 sps:$4 sm:$0xff]  }
 0x548   : > { %3322 = vmatpush1.bf16.msra.mxu1 %v6140_v59  ;;  %v6173_v59 = vld [vmem:[%s7980_s9 + $0x140] ss:$8 sps:$4 sm:$0xff]  }
 0x54a   : > { %2814 = vmatpush1.bf16.msra.mxu0 %v6143_v61 }
 0x54b   : > { %3324 = vmatmul.mubr.bf16.vlgmr.msra.gmra.mrb[28].mxu1 %v7284_v50 }
 0x54c   : > { %3402 = vmatprep.mubr.bf16.mxu1 %v6388_v3 }
 0x54d   : > { %2816 = vmatmul.mubr.bf16.vlgmr.msra.gmra.mrb[24].mxu0 %v7270_v16 }
 0x54e   : > { %3471 = vmatprep.mubr.bf16.mxu0 %v6388_v3 }
 0x61e   : > { %v3325_v5 = vpop.f32.mrb[28].mxu1 }
 0x61f   : > { %v3334_v8 = vadd.f32 %v3325_v5, %v2831_v0  ;;  %v3327_v9 = vpop.f32.mrb[29].mxu1  ;;  %v6176_v5 = vld [vmem:[%s7980_s9 + $0x50] ss:$8 sps:$4 sm:$0xff]  }
 0x620   : > { %v3335_v11 = vadd.f32 %v3327_v9, %v2835_v2  ;;  %v2817_v12 = vpop.f32.mrb[24].mxu0  ;;  %v3329_v50 = vpop.f32.mrb[30].mxu1  ;;  %v6185_v9 = vld [vmem:[%s7980_s9 + $0x160] ss:$8 sps:$4 sm:$0xff]  }
 0x621   : > { %v2838_v62 = vadd.f32 %v2831_v0, %v2817_v12  ;;  %v3336_v15 = vadd.f32 %v3329_v50, %v2831_v0  ;;  %v2819_v17 = vpop.f32.mrb[25].mxu0  ;;  %v3331_v16 = vpop.f32.mrb[31].mxu1  ;;  %v3338_v22 = vmax.f32 %v3334_v8, 0.0  ;;  %v6184_v8 = vld [vmem:[%s7980_s9 + $0x64] ss:$8 sps:$4 sm:$0xff]  }
 0x622   : > { %v2839_v19 = vadd.f32 %v2835_v2, %v2819_v17  ;;  %v3337_v20 = vadd.f32 %v3331_v16, %v2835_v2  ;;  %v2821_v21 = vpop.f32.mrb[26].mxu0  ;;  %v3339_v26 = vmax.f32 %v3335_v11, 0.0  ;;  %v6193_v11 = vld [vmem:[%s7980_s9 + $0x174] ss:$8 sps:$4 sm:$0xff]   ;;  %v6182_v12 = vld [vmem:[%s7980_s9 + $0x60] ss:$8 sps:$4 sm:$0xff]  }
 0x623   : > { %v3340_v23 = vmax.f32 %v3336_v15, 0.0  ;;  %v2840_v24 = vadd.f32 %v2831_v0, %v2821_v21  ;;  %v2823_v25 = vpop.f32.mrb[27].mxu0  ;;  %v2842_v29 = vmax.f32 %v2838_v62, 0.0  ;;  %v6179_v0 = vld [vmem:[%s7980_s9 + $0x150] ss:$8 sps:$4 sm:$0xff]  }
 0x624   : > { %v3341_v27 = vmax.f32 %v3337_v20, 0.0  ;;  %v2841_v28 = vadd.f32 %v2835_v2, %v2823_v25  ;;  %v2843_v32 = vmax.f32 %v2839_v19, 0.0  ;;  %v6187_v2 = vld [vmem:[%s7980_s9 + $0x164] ss:$8 sps:$4 sm:$0xff]   ;;  %v6190_v50 = vld [vmem:[%s7980_s9 + $0x74] ss:$8 sps:$4 sm:$0xff]  }
 0x625   : > { %v3342_v30 = vpack.c.bf16 %v3340_v23, %v3338_v22  ;;  %v2844_v31 = vmax.f32 %v2840_v24, 0.0  ;;  %v6191_v62 = vld [vmem:[%s7980_s9 + $0x170] ss:$8 sps:$4 sm:$0xff]   ;;  %v6199_v15 = vld [vmem:[%s7980_s9 + $0x184] ss:$8 sps:$4 sm:$0xff]  }
 0x626   : > { %v3343_v33 = vpack.c.bf16 %v3341_v27, %v3339_v26  ;;  %v2845_v34 = vmax.f32 %v2841_v28, 0.0  ;;  %v6188_v17 = vld [vmem:[%s7980_s9 + $0x70] ss:$8 sps:$4 sm:$0xff]   ;;  %v6196_v16 = vld [vmem:[%s7980_s9 + $0x84] ss:$8 sps:$4 sm:$0xff]  }
 0x627   : > { %v2846_v37 = vpack.c.bf16 %v2844_v31, %v2842_v29  ;;  %v6197_v19 = vld [vmem:[%s7980_s9 + $0x180] ss:$8 sps:$4 sm:$0xff]   ;;  %v6202_v21 = vld [vmem:[%s7980_s9 + $0x94] ss:$8 sps:$4 sm:$0xff]   ;;  %v6200_v22 = vld [vmem:[%s7980_s9 + $0x90] ss:$8 sps:$4 sm:$0xff]  }
 0x628   : > { %v2847_v38 = vpack.c.bf16 %v2845_v34, %v2843_v32  ;;  %3370 = vmatprep.subr.bf16.mxu1 %v3343_v33  ;;  %v6194_v20 = vld [vmem:[%s7980_s9 + $0x80] ss:$8 sps:$4 sm:$0xff]   ;;  %v6205_v23 = vld [vmem:[%s7980_s9 + $0x194] ss:$8 sps:$4 sm:$0xff]   ;;  %v6203_v24 = vld [vmem:[%s7980_s9 + $0x190] ss:$8 sps:$4 sm:$0xff]  }
 0x629   : > { %3371 = vmatpush1.bf16.msra.mxu1 %v3342_v30  ;;  %v6208_v25 = vld [vmem:[%s7980_s9 + $0xa4] ss:$8 sps:$4 sm:$0xff]   ;;  %v6206_v26 = vld [vmem:[%s7980_s9 + $0xa0] ss:$8 sps:$4 sm:$0xff]   ;;  %v6214_v29 = vld [vmem:[%s7980_s9 + $0xb4] ss:$8 sps:$4 sm:$0xff]  }
 0x62a   : > { %3439 = vmatprep.subr.bf16.mxu0 %v2847_v38  ;;  %3833 = vmatprep.subr.bf16.mxu1 %v6151_v36  ;;  %v6211_v27 = vld [vmem:[%s7980_s9 + $0x1a4] ss:$8 sps:$4 sm:$0xff]   ;;  %v6209_v28 = vld [vmem:[%s7980_s9 + $0x1a0] ss:$8 sps:$4 sm:$0xff]   ;;  %v6212_v30 = vld [vmem:[%s7980_s9 + $0xb0] ss:$8 sps:$4 sm:$0xff]  }
 0x62b   : > { %3440 = vmatpush1.bf16.msra.mxu0 %v2846_v37  ;;  %v6217_v31 = vld [vmem:[%s7980_s9 + $0x1b4] ss:$8 sps:$4 sm:$0xff]   ;;  %v6215_v32 = vld [vmem:[%s7980_s9 + $0x1b0] ss:$8 sps:$4 sm:$0xff]   ;;  %v6220_v33 = vld [vmem:[%s7980_s9 + $0xc4] ss:$8 sps:$4 sm:$0xff]  }
 0x62c   : > { %5376 = vmatmul.mubr.msk.bf16.vlgmr.msra.gmra.mrb[32].mxu1 %vm418_vm0, %v6758_v6  ;;  %4405 = vmatprep.subr.bf16.mxu0 %v6148_v39  ;;  %v3345_v6 = vadd.s32 32, %v6471_v4  ;;  %v6160_v4 = vld [vmem:[%s7980_s9 + $0x24] ss:$8 sps:$4 sm:$0xff]   ;;  %v6218_v34 = vld [vmem:[%s7980_s9 + $0xc0] ss:$8 sps:$4 sm:$0xff]  }
 0x62d   : > { %3412 = vmatprep.mubr.bf16.mxu1 %v6388_v3  ;;  %3834 = vmatpush1.bf16.msra.mxu1 %v6149_v40  ;;  %v6221_v36 = vld [vmem:[%s7980_s9 + $0x1c0] ss:$8 sps:$4 sm:$0xff]   ;;  %v6226_v37 = vld [vmem:[%s7980_s9 + $0xd4] ss:$8 sps:$4 sm:$0xff]   ;;  %v6224_v38 = vld [vmem:[%s7980_s9 + $0xd0] ss:$8 sps:$4 sm:$0xff]  }
 0x62e   : > { %5379 = vmatmul.mubr.msk.bf16.vlgmr.msra.gmra.mrb[28].mxu0 %vm418_vm0, %v6773_v13  ;;  %3835 = vmatprep.subr.bf16.mxu1 %v6157_v41  ;;  %v6161_v13 = vld [vmem:[%s7980_s9 + $0x120] ss:$8 sps:$4 sm:$0xff]   ;;  %vm3355_vm6 = vcmp.eq.s32.totalorder %v3345_v6, %v6751_v45  ;;  %vm3347_vm7 = vcmp.eq.s32.totalorder %v3345_v6, %v6760_v7  ;;  %v6175_v7 = vld [vmem:[%s7980_s9 + $0x144] ss:$8 sps:$4 sm:$0xff]   ;;  %v6229_v39 = vld [vmem:[%s7980_s9 + $0x1d4] ss:$8 sps:$4 sm:$0xff]  }
 0x62f   : > { %3481 = vmatprep.mubr.bf16.mxu0 %v6388_v3  ;;  %4406 = vmatpush1.bf16.msra.mxu0 %v6146_v42  ;;  %v5375_v45 = vsel %vm3355_vm6, 1.0, %v6389_v60  ;;  %v5373_v55 = vsel %vm3347_vm7, 1.0, %v6389_v60  ;;  %v6170_v60 = vld [vmem:[%s7980_s9 + $0x40] ss:$8 sps:$4 sm:$0xff]   ;;  %v6227_v40 = vld [vmem:[%s7980_s9 + $0x1d0] ss:$8 sps:$4 sm:$0xff]  }
 0x630   : > { %4407 = vmatprep.subr.bf16.mxu0 %v6154_v43  ;;  %v3361_v57 = vpack.c.bf16 %v5375_v45, %v5375_v45  ;;  %v3353_v61 = vpack.c.bf16 %v5373_v55, %v5373_v55  ;;  %v6232_v41 = vld [vmem:[%s7980_s9 + $0xe4] ss:$8 sps:$4 sm:$0xff]   ;;  %v6230_v42 = vld [vmem:[%s7980_s9 + $0xe0] ss:$8 sps:$4 sm:$0xff]   ;;  %v6236_v6 = vld [vmem:[%s7980_s9 + $0xf0] ss:$8 sps:$4 sm:$0xff]  }
 0x631   : > { %3836 = vmatpush1.bf16.msra.mxu1 %v6155_v46  ;;  %v6235_v43 = vld [vmem:[%s7980_s9 + $0x1e4] ss:$8 sps:$4 sm:$0xff]   ;;  %v6238_v46 = vld [vmem:[%s7980_s9 + $0xf4] ss:$8 sps:$4 sm:$0xff]  }
 0x632   : > { %3837 = vmatprep.subr.bf16.mxu1 %v6163_v47  ;;  %v6241_v47 = vld [vmem:[%s7980_s9 + $0x1f4] ss:$8 sps:$4 sm:$0xff]  }
 0x633   : > { %4408 = vmatpush1.bf16.msra.mxu0 %v6152_v48  ;;  %v6244_v48 = vld [vmem:[%s7980_s9 + $0x204] ss:$8 sps:$4 sm:$0xff]  }
 0x634   : > { %5377 = vmatmul.mubr.msk.bf16.gmra.mrb[36].mxu1 %vm418_vm0, %v3360_v49  ;;  %4409 = vmatprep.subr.bf16.mxu0 %v6160_v4  ;;  %v6247_v49 = vld [vmem:[%s7980_s9 + $0x304] ss:$8 sps:$4 sm:$0xff]  }
 0x635   : > { %3422 = vmatprep.mubr.bf16.mxu1 %v6388_v3  ;;  %3838 = vmatpush1.bf16.msra.mxu1 %v6161_v13 }
 0x636   : > { %5380 = vmatmul.mubr.msk.bf16.gmra.mrb[32].mxu0 %vm418_vm0, %v3352_v51  ;;  %3839 = vmatprep.subr.bf16.mxu1 %v6169_v53 }
 0x637   : > { %3491 = vmatprep.mubr.bf16.mxu0 %v6388_v3  ;;  %4410 = vmatpush1.bf16.msra.mxu0 %v6158_v14  ;;  %v6181_v3 = vld [vmem:[%s7980_s9 + $0x154] ss:$8 sps:$4 sm:$0xff]  }
 0x638   : > { %4411 = vmatprep.subr.bf16.mxu0 %v6166_v18 }
 0x639   : > { %3840 = vmatpush1.bf16.msra.mxu1 %v6167_v54 }
 0x63a   : > { %3841 = vmatprep.subr.bf16.mxu1 %v6175_v7 }
 0x63b   : > { %4412 = vmatpush1.bf16.msra.mxu0 %v6164_v56 }
 0x63c   : > { %5378 = vmatmul.mubr.msk.bf16.gmra.mrb[40].mxu1 %vm418_vm0, %v3361_v57  ;;  %4413 = vmatprep.subr.bf16.mxu0 %v6172_v58 }
 0x63d   : > { %3842 = vmatpush1.bf16.msra.mxu1 %v6173_v59 }
 0x63e   : > { %5381 = vmatmul.mubr.msk.bf16.gmra.mrb[36].mxu0 %vm418_vm0, %v3353_v61  ;;  %3843 = vmatprep.subr.bf16.mxu1 %v6181_v3 }
 0x63f   : > { %4414 = vmatpush1.bf16.msra.mxu0 %v6170_v60 }
 0x640   : > { %4415 = vmatprep.subr.bf16.mxu0 %v6178_v63 }
 0x641   : > { %3844 = vmatpush1.bf16.msra.mxu1 %v6179_v0 }
 0x642   : > { %3845 = vmatprep.subr.bf16.mxu1 %v6187_v2 }
 0x643   : > { %4416 = vmatpush1.bf16.msra.mxu0 %v6176_v5 }
 0x644   : > { %4417 = vmatprep.subr.bf16.mxu0 %v6184_v8 }
 0x645   : > { %3846 = vmatpush1.bf16.msra.mxu1 %v6185_v9 }
 0x646   : > { %3847 = vmatprep.subr.bf16.mxu1 %v6193_v11 }
 0x647   : > { %4418 = vmatpush1.bf16.msra.mxu0 %v6182_v12 }
 0x648   : > { %4419 = vmatprep.subr.bf16.mxu0 %v6190_v50 }
 0x649   : > { %3848 = vmatpush1.bf16.msra.mxu1 %v6191_v62 }
 0x64a   : > { %3849 = vmatprep.subr.bf16.mxu1 %v6199_v15 }
 0x64b   : > { %4420 = vmatpush1.bf16.msra.mxu0 %v6188_v17 }
 0x64c   : > { %4421 = vmatprep.subr.bf16.mxu0 %v6196_v16 }
 0x64d   : > { %3850 = vmatpush1.bf16.msra.mxu1 %v6197_v19 }
 0x64e   : > { %3851 = vmatprep.subr.bf16.mxu1 %v6205_v23 }
 0x64f   : > { %4422 = vmatpush1.bf16.msra.mxu0 %v6194_v20 }
 0x650   : > { %4423 = vmatprep.subr.bf16.mxu0 %v6202_v21 }
 0x651   : > { %3852 = vmatpush1.bf16.msra.mxu1 %v6203_v24 }
 0x652   : > { %3853 = vmatprep.subr.bf16.mxu1 %v6211_v27 }
 0x653   : > { %4424 = vmatpush1.bf16.msra.mxu0 %v6200_v22 }
 0x654   : > { %4425 = vmatprep.subr.bf16.mxu0 %v6208_v25 }
 0x655   : > { %3854 = vmatpush1.bf16.msra.mxu1 %v6209_v28 }
 0x656   : > { %3855 = vmatprep.subr.bf16.mxu1 %v6217_v31 }
 0x657   : > { %4426 = vmatpush1.bf16.msra.mxu0 %v6206_v26 }
 0x658   : > { %4427 = vmatprep.subr.bf16.mxu0 %v6214_v29 }
 0x659   : > { %3856 = vmatpush1.bf16.msra.mxu1 %v6215_v32 }
 0x65a   : > { %3857 = vmatprep.subr.bf16.mxu1 %v6223_v35 }
 0x65b   : > { %4428 = vmatpush1.bf16.msra.mxu0 %v6212_v30 }
 0x65c   : > { %4429 = vmatprep.subr.bf16.mxu0 %v6220_v33 }
 0x65d   : > { %3858 = vmatpush1.bf16.msra.mxu1 %v6221_v36 }
 0x65e   : > { %3859 = vmatprep.subr.bf16.mxu1 %v6229_v39 }
 0x65f   : > { %4430 = vmatpush1.bf16.msra.mxu0 %v6218_v34 }
 0x660   : > { %4431 = vmatprep.subr.bf16.mxu0 %v6226_v37 }
 0x661   : > { %3860 = vmatpush1.bf16.msra.mxu1 %v6227_v40 }
 0x662   : > { %3861 = vmatprep.subr.bf16.mxu1 %v6235_v43 }
 0x663   : > { %4432 = vmatpush1.bf16.msra.mxu0 %v6224_v38 }
 0x664   : > { %4433 = vmatprep.subr.bf16.mxu0 %v6232_v41  ;;  %v6242_v41 = vld [vmem:[%s7980_s9 + $0x200] ss:$8 sps:$4 sm:$0xff]  }
 0x665   : > { %3862 = vmatpush1.bf16.msra.mxu1 %v6233_v44 }
 0x666   : > { %3863 = vmatprep.subr.bf16.mxu1 %v6241_v47 }
 0x667   : > { %4434 = vmatpush1.bf16.msra.mxu0 %v6230_v42 }
 0x668   : > { %4435 = vmatprep.subr.bf16.mxu0 %v6238_v46 }
 0x669   : > { %3864 = vmatpush1.bf16.msra.mxu1 %v6239_v1 }
 0x66a   : > { %4050 = vmatprep.subr.bf16.mxu1 %v6247_v49  ;;  %v6250_v49 = vld [vmem:[%s7980_s9 + $0x214] ss:$8 sps:$4 sm:$0xff]  }
 0x66b   : > { %4436 = vmatpush1.bf16.msra.mxu0 %v6236_v6 }
 0x66c   : > { %4667 = vmatprep.subr.bf16.mxu0 %v6244_v48 }
 0x6ff   : > { %v3404_v4 = vpop.f32.mrb[32].mxu1 }
 0x700   : > { %v3406_v13 = vpop.f32.mrb[33].mxu1 }
 0x701   : > { %v3473_v51 = vpop.f32.mrb[28].mxu0  ;;  %v3408_v53 = vpop.f32.mrb[34].mxu1 }
 0x702   : > { %v3474_v14 = vadd.f32 %v3473_v51, %v3404_v4  ;;  %v3475_v18 = vpop.f32.mrb[29].mxu0  ;;  %v3410_v45 = vpop.f32.mrb[35].mxu1  ;;  %v6245_v4 = vld [vmem:[%s7980_s9 + $0x300] ss:$8 sps:$4 sm:$0xff]  }
 0x703   : > { %v3476_v54 = vadd.f32 %v3475_v18, %v3406_v13  ;;  %v3477_v7 = vpop.f32.mrb[30].mxu0 }
 0x704   : > { %v3478_v55 = vadd.f32 %v3477_v7, %v3408_v53  ;;  %v3479_v56 = vpop.f32.mrb[31].mxu0  ;;  %v6251_v7 = vld [vmem:[%s7980_s9 + $0x310] ss:$8 sps:$4 sm:$0xff]  }
 0x705   : > { %v5637_v57 = vpack.c.bf16 %v3476_v54, %v3474_v14  ;;  %v3480_v58 = vadd.f32 %v3479_v56, %v3410_v45  ;;  %v6248_v45 = vld [vmem:[%s7980_s9 + $0x210] ss:$8 sps:$4 sm:$0xff]   ;;  %v6256_v56 = vld [vmem:[%s7980_s9 + $0x220] ss:$8 sps:$4 sm:$0xff]  }
 0x706   : > { %v7698_v0 = vpack.c.bf16 %v3478_v55, %v3474_v14  ;;  %v6253_v14 = vld [vmem:[%s7980_s9 + $0x314] ss:$8 sps:$4 sm:$0xff]  }
 0x707   : > { %3532 = vst [vmem:[#allocation5] sm:$0xff] %v5637_v57  ;;  %v5638_v59 = vpack.c.bf16 %v3480_v58, %v3478_v55  ;;  %v3414_v61 = vpop.f32.mrb[36].mxu1  ;;  %v7700_v2 = vpack.c.bf16 %v3480_v58, %v3476_v54  ;;  %v6258_v54 = vld [vmem:[%s7980_s9 + $0x224] ss:$8 sps:$4 sm:$0xff]   ;;  %v6266_v57 = vld [vmem:[%s7980_s9 + $0x234] ss:$8 sps:$4 sm:$0xff]  }
 0x708   : > { %v3416_v3 = vpop.f32.mrb[37].mxu1  ;;  %v3632_v19 = vshll.u32 %v7698_v0, 16  ;;  %v3630_v43 = vshrl.u32 %v7698_v0, 16  ;;  %v6262_v55 = vld [vmem:[%s7980_s9 + $0x324] ss:$8 sps:$4 sm:$0xff]  }
 0x709   : > { %v3483_v60 = vpop.f32.mrb[32].mxu0  ;;  %v3418_v63 = vpop.f32.mrb[38].mxu1  ;;  %v3644_v15 = vshll.u32 %v7700_v2, 16  ;;  %v3642_v28 = vshrl.u32 %v7700_v2, 16 }
 0x70a   : > { %v3484_v5 = vadd.f32 %v3483_v60, %v3414_v61  ;;  %v3485_v8 = vpop.f32.mrb[33].mxu0  ;;  %v3420_v9 = vpop.f32.mrb[39].mxu1  ;;  %v3634_v34 = vrot.slane %v3632_v19, 1  ;;  %v6260_v61 = vld [vmem:[%s7980_s9 + $0x320] ss:$8 sps:$4 sm:$0xff]  }
 0x70b   : > { %v3486_v11 = vadd.f32 %v3485_v8, %v3416_v3  ;;  %v3487_v12 = vpop.f32.mrb[34].mxu0  ;;  %v3646_v24 = vrot.slane %v3644_v15, 1  ;;  %v6269_v8 = vld [vmem:[%s7980_s9 + $0x334] ss:$8 sps:$4 sm:$0xff]  }
 0x70c   : > { %v3488_v50 = vadd.f32 %v3487_v12, %v3418_v63  ;;  %v3489_v62 = vpop.f32.mrb[35].mxu0  ;;  %v3635_v13 = vor.u32 %v3634_v34, %v3630_v43  ;;  %v6264_v12 = vld [vmem:[%s7980_s9 + $0x230] ss:$8 sps:$4 sm:$0xff]   ;;  %v6296_v43 = vld [vmem:[%s7980_s9 + $0x284] ss:$8 sps:$4 sm:$0xff]  }
 0x70d   : > { %v3490_v17 = vadd.f32 %v3489_v62, %v3420_v9  ;;  %v3647_v42 = vor.u32 %v3646_v24, %v3642_v28  ;;  %v6276_v34 = vld [vmem:[%s7980_s9 + $0x250] ss:$8 sps:$4 sm:$0xff]  }
 0x70e   : > { %v4144_v16 = vld [vmem:[#allocation5] sm:$0xee]  ;;  %v7704_v26 = vpack.c.bf16 %v3488_v50, %v3484_v5 }
 0x70f   : > { %v3424_v20 = vpop.f32.mrb[40].mxu1  ;;  %v5553_v21 = vcombine.low %v4144_v16, %v5638_v59  ;;  %v5554_v22 = vcombine.high %v4144_v16, %v5638_v59  ;;  %v7706_v27 = vpack.c.bf16 %v3490_v17, %v3486_v11  ;;  %v6272_v16 = vld [vmem:[%s7980_s9 + $0x244] ss:$8 sps:$4 sm:$0xff]  }
 0x710   : > { %v3426_v23 = vpop.f32.mrb[41].mxu1  ;;  %v4232_v38 = vrot.slane %v7704_v26, 1  ;;  %v3637_v44 = vshll.u32 %v7704_v26, 16  ;;  %v3653_v11 = vshrl.u32 %v7704_v26, 16 }
 0x711   : > { %v3493_v25 = vpop.f32.mrb[36].mxu0  ;;  %v3428_v29 = vpop.f32.mrb[42].mxu1  ;;  %v4231_v32 = vrot.slane %v5553_v21, 1  ;;  %v4234_v33 = vrot.slane %v5554_v22, 1  ;;  %v4235_v37 = vrot.slane %v7706_v27, 1  ;;  %v3649_v39 = vshll.u32 %v7706_v27, 16 }
 0x712   : > { %v3494_v30 = vadd.f32 %v3493_v25, %v3424_v20  ;;  %v3495_v31 = vpop.f32.mrb[37].mxu0  ;;  %v3429_v35 = vpop.f32.mrb[43].mxu1  ;;  %v3639_v51 = vrot.slane %v3637_v44, 1  ;;  %v3661_v9 = vshrl.u32 %v7706_v27, 16  ;;  %v6267_v25 = vld [vmem:[%s7980_s9 + $0x330] ss:$8 sps:$4 sm:$0xff]  }
 0x713   : > { %v3496_v36 = vadd.f32 %v3495_v31, %v3426_v23  ;;  %v3497_v40 = vpop.f32.mrb[38].mxu0  ;;  %v4236_v47 = vsel %vm2919_vm2, %v4234_v33, %v4235_v37  ;;  %v4233_v1 = vsel %vm2919_vm2, %v4231_v32, %v4232_v38  ;;  %v3651_v48 = vrot.slane %v3649_v39, 1  ;;  %v6275_v31 = vld [vmem:[%s7980_s9 + $0x344] ss:$8 sps:$4 sm:$0xff]   ;;  %v6278_v32 = vld [vmem:[%s7980_s9 + $0x254] ss:$8 sps:$4 sm:$0xff]  }
 0x714   : > { %v3498_v46 = vpop.f32.mrb[39].mxu0  ;;  %4437 = vmatprep.mubr.bf16.mxu0 %v4236_v47  ;;  %v7730_v18 = vsel %vm2391_vm3, %v3635_v13, %v3639_v51  ;;  %v7773_v20 = vor.u32 %v3653_v11, %v3639_v51  ;;  %v6273_v33 = vld [vmem:[%s7980_s9 + $0x340] ss:$8 sps:$4 sm:$0xff]   ;;  %v6281_v35 = vld [vmem:[%s7980_s9 + $0x354] ss:$8 sps:$4 sm:$0xff]  }
 0x715   : > { %v5641_v6 = vpack.c.bf16 %v3496_v36, %v3494_v30  ;;  %4438 = vmatmul.mubr.bf16.vlgmr.msra.gmra.mrb[40].mxu0 %v4233_v1  ;;  %v3652_v53 = vsel %vm2391_vm3, %v3647_v42, %v3651_v48  ;;  %v7771_v19 = vor.u32 %v3661_v9, %v3651_v48  ;;  %v6270_v30 = vld [vmem:[%s7980_s9 + $0x240] ss:$8 sps:$4 sm:$0xff]   ;;  %v6279_v36 = vld [vmem:[%s7980_s9 + $0x350] ss:$8 sps:$4 sm:$0xff]   ;;  %v6290_v39 = vld [vmem:[%s7980_s9 + $0x274] ss:$8 sps:$4 sm:$0xff]  }
 0x716   : > { %4668 = vmatpush1.bf16.msra.mxu0 %v6242_v41  ;;  %3865 = vmatprep.mubr.bf16.mxu1 %v3652_v53  ;;  %v6285_v40 = vld [vmem:[%s7980_s9 + $0x360] ss:$8 sps:$4 sm:$0xff]   ;;  %v6288_v41 = vld [vmem:[%s7980_s9 + $0x270] ss:$8 sps:$4 sm:$0xff]   ;;  %v6293_v42 = vld [vmem:[%s7980_s9 + $0x374] ss:$8 sps:$4 sm:$0xff]  }
 0x717   : > { %3536 = vst [vmem:[#allocation5 + $0x20] sm:$0x11] %v5641_v6  ;;  %3866 = vmatmul.mubr.bf16.vlgmr.msra.gmra.mrb[44].mxu1 %v7730_v18  ;;  %4669 = vmatprep.subr.bf16.mxu0 %v6250_v49  ;;  %v6291_v44 = vld [vmem:[%s7980_s9 + $0x370] ss:$8 sps:$4 sm:$0xff]   ;;  %v6294_v46 = vld [vmem:[%s7980_s9 + $0x280] ss:$8 sps:$4 sm:$0xff]  }
 0x718   : > { %4051 = vmatpush1.bf16.msra.mxu1 %v6245_v4  ;;  %v6299_v6 = vld [vmem:[%s7980_s9 + $0x384] ss:$8 sps:$4 sm:$0xff]   ;;  %v6302_v47 = vld [vmem:[%s7980_s9 + $0x294] ss:$8 sps:$4 sm:$0xff]   ;;  %v6297_v1 = vld [vmem:[%s7980_s9 + $0x380] ss:$8 sps:$4 sm:$0xff]  }
 0x719   : > { %4052 = vmatprep.subr.bf16.mxu1 %v6253_v14  ;;  %v6300_v48 = vld [vmem:[%s7980_s9 + $0x290] ss:$8 sps:$4 sm:$0xff]   ;;  %v6305_v49 = vld [vmem:[%s7980_s9 + $0x394] ss:$8 sps:$4 sm:$0xff]   ;;  %v6308_v4 = vld [vmem:[%s7980_s9 + $0x2a4] ss:$8 sps:$4 sm:$0xff]  }
 0x71a   : > { %4670 = vmatpush1.bf16.msra.mxu0 %v6248_v45  ;;  %v6303_v13 = vld [vmem:[%s7980_s9 + $0x390] ss:$8 sps:$4 sm:$0xff]   ;;  %v6306_v51 = vld [vmem:[%s7980_s9 + $0x2a0] ss:$8 sps:$4 sm:$0xff]   ;;  %v6314_v14 = vld [vmem:[%s7980_s9 + $0x2b4] ss:$8 sps:$4 sm:$0xff]  }
 0x71b   : > { %4671 = vmatprep.subr.bf16.mxu0 %v6258_v54  ;;  %v6309_v45 = vld [vmem:[%s7980_s9 + $0x3a0] ss:$8 sps:$4 sm:$0xff]   ;;  %v6312_v54 = vld [vmem:[%s7980_s9 + $0x2b0] ss:$8 sps:$4 sm:$0xff]  }
 0x71c   : > { %4053 = vmatpush1.bf16.msra.mxu1 %v6251_v7  ;;  %v6317_v7 = vld [vmem:[%s7980_s9 + $0x3b4] ss:$8 sps:$4 sm:$0xff]   ;;  %v6327_v9 = vld [vmem:[%s7980_s9 + $0x3d0] ss:$8 sps:$4 sm:$0xff]   ;;  %v6330_v11 = vld [vmem:[%s7980_s9 + $0x2e0] ss:$8 sps:$4 sm:$0xff]  }
 0x71d   : > { %4054 = vmatprep.subr.bf16.mxu1 %v6262_v55  ;;  %v6320_v55 = vld [vmem:[%s7980_s9 + $0x2c4] ss:$8 sps:$4 sm:$0xff]  }
 0x71e   : > { %v4143_v58 = vld [vmem:[#allocation5 + $0x20] sm:$0x11]  ;;  %4672 = vmatpush1.bf16.msra.mxu0 %v6256_v56 }
 0x71f   : > { %v3541_v59 = vld [vmem:[#allocation5 + $0x20] sm:$0x11]  ;;  %v7754_v3 = vcombine.high %v4143_v58, %v4143_v58  ;;  %v7756_v63 = vcombine.low %v4143_v58, %v4143_v58  ;;  %4673 = vmatprep.subr.bf16.mxu0 %v6266_v57  ;;  %v6318_v57 = vld [vmem:[%s7980_s9 + $0x2c0] ss:$8 sps:$4 sm:$0xff]  }
 0x720   : > { %v5456_v60 = vcombine.high %v3541_v59, %v3541_v59  ;;  %v5455_v5 = vcombine.low %v3541_v59, %v3541_v59  ;;  %4055 = vmatpush1.bf16.msra.mxu1 %v6260_v61  ;;  %v6315_v56 = vld [vmem:[%s7980_s9 + $0x3b0] ss:$8 sps:$4 sm:$0xff]   ;;  %v6323_v58 = vld [vmem:[%s7980_s9 + $0x3c4] ss:$8 sps:$4 sm:$0xff]   ;;  %v6326_v59 = vld [vmem:[%s7980_s9 + $0x2d4] ss:$8 sps:$4 sm:$0xff]  }
 0x721   : > { %v4239_v50 = vrot.slane %v7754_v3, 1  ;;  %v4237_v15 = vrot.slane %v7756_v63, 1  ;;  %4056 = vmatprep.subr.bf16.mxu1 %v6269_v8  ;;  %v6321_v61 = vld [vmem:[%s7980_s9 + $0x3c0] ss:$8 sps:$4 sm:$0xff]   ;;  %v6332_v8 = vld [vmem:[%s7980_s9 + $0x2e4] ss:$8 sps:$4 sm:$0xff]  }
 0x722   : > { %v3665_v62 = vshll.u32 %v5456_v60, 16  ;;  %v3657_v17 = vshll.u32 %v5455_v5, 16  ;;  %4674 = vmatpush1.bf16.msra.mxu0 %v6264_v12  ;;  %v6324_v60 = vld [vmem:[%s7980_s9 + $0x2d0] ss:$8 sps:$4 sm:$0xff]   ;;  %v6329_v5 = vld [vmem:[%s7980_s9 + $0x3d4] ss:$8 sps:$4 sm:$0xff]  }
 0x723   : > { %v4240_v21 = vsel %vm2919_vm2, %v4235_v37, %v4239_v50  ;;  %v4238_v23 = vsel %vm2919_vm2, %v4232_v38, %v4237_v15  ;;  %4675 = vmatprep.subr.bf16.mxu0 %v6272_v16  ;;  %v6282_v37 = vld [vmem:[%s7980_s9 + $0x260] ss:$8 sps:$4 sm:$0xff]   ;;  %v6287_v38 = vld [vmem:[%s7980_s9 + $0x364] ss:$8 sps:$4 sm:$0xff]   ;;  %v6338_v50 = vld [vmem:[%s7980_s9 + $0x2f4] ss:$8 sps:$4 sm:$0xff]  }
 0x724   : > { %v3667_v22 = vrot.slane %v3665_v62, 1  ;;  %v3659_v24 = vrot.slane %v3657_v17, 1  ;;  %4447 = vmatprep.mubr.bf16.mxu0 %v4240_v21  ;;  %4057 = vmatpush1.bf16.msra.mxu1 %v6267_v25  ;;  %v6335_v12 = vld [vmem:[%s7980_s9 + $0x3e4] ss:$8 sps:$4 sm:$0xff]   ;;  %v6333_v62 = vld [vmem:[%s7980_s9 + $0x3e0] ss:$8 sps:$4 sm:$0xff]  }
 0x725   : > { %4448 = vmatmul.mubr.bf16.gmra.mrb[44].mxu0 %v4238_v23  ;;  %4058 = vmatprep.subr.bf16.mxu1 %v6275_v31  ;;  %v4499_v15 = vshll.u32 %v7754_v3, 16  ;;  %v6336_v17 = vld [vmem:[%s7980_s9 + $0x2f0] ss:$8 sps:$4 sm:$0xff]   ;;  %v6341_v16 = vld [vmem:[%s7980_s9 + $0x3f4] ss:$8 sps:$4 sm:$0xff]   ;;  %v4491_v3 = vshll.u32 %v7756_v63, 16 }
 0x726   : > { %v3668_v28 = vsel %vm2391_vm3, %v7771_v19, %v3667_v22  ;;  %v3660_v29 = vsel %vm2391_vm3, %v7773_v20, %v3659_v24  ;;  %4699 = vmatprep.mubr.bf16.mxu0 %v3652_v53  ;;  %4676 = vmatpush1.bf16.msra.mxu0 %v6270_v30  ;;  %v6311_v53 = vld [vmem:[%s7980_s9 + $0x3a4] ss:$8 sps:$4 sm:$0xff]   ;;  %v6339_v21 = vld [vmem:[%s7980_s9 + $0x3f0] ss:$8 sps:$4 sm:$0xff]   ;;  %v4720_v63 = vld [vmem:[%s7981_s10] sm:$0x3] }
 0x727   : > { %3875 = vmatprep.mubr.bf16.mxu1 %v3668_v28  ;;  %4677 = vmatprep.subr.bf16.mxu0 %v6278_v32  ;;  %v4501_v22 = vrot.slane %v4499_v15, 1  ;;  %v4493_v24 = vrot.slane %v4491_v3, 1 }
 0x728   : > { %3876 = vmatmul.mubr.bf16.gmra.mrb[48].mxu1 %v3660_v29 }
 0x729   : > { %4082 = vmatprep.mubr.bf16.mxu1 %v7700_v2  ;;  %v6284_v2 = vld [vmem:[%s7980_s9 + $0x264] ss:$8 sps:$4 sm:$0xff]   ;;  %4059 = vmatpush1.bf16.msra.mxu1 %v6273_v33  ;;  %v4502_v23 = vsel %vm2391_vm3, %v7771_v19, %v4501_v22  ;;  %v4494_v25 = vsel %vm2391_vm3, %v7773_v20, %v4493_v24  ;;  %v4729_v19 = vrot.slane %v4720_v63, %v6599_v52 }
 0x72a   : > { %4678 = vmatpush1.bf16.msra.mxu0 %v6276_v34  ;;  %4060 = vmatprep.subr.bf16.mxu1 %v6281_v35 }
 0x72b   : > { %4679 = vmatprep.subr.bf16.mxu0 %v6284_v2 }
 0x72d   : > { %4061 = vmatpush1.bf16.msra.mxu1 %v6279_v36 }
 0x72e   : > { %4680 = vmatpush1.bf16.msra.mxu0 %v6282_v37  ;;  %4062 = vmatprep.subr.bf16.mxu1 %v6287_v38 }
 0x72f   : > { %4681 = vmatprep.subr.bf16.mxu0 %v6290_v39 }
 0x731   : > { %4063 = vmatpush1.bf16.msra.mxu1 %v6285_v40 }
 0x732   : > { %4682 = vmatpush1.bf16.msra.mxu0 %v6288_v41  ;;  %4064 = vmatprep.subr.bf16.mxu1 %v6293_v42 }
 0x733   : > { %4683 = vmatprep.subr.bf16.mxu0 %v6296_v43 }
 0x735   : > { %4065 = vmatpush1.bf16.msra.mxu1 %v6291_v44 }
 0x736   : > { %4684 = vmatpush1.bf16.msra.mxu0 %v6294_v46  ;;  %4066 = vmatprep.subr.bf16.mxu1 %v6299_v6 }
 0x737   : > { %4685 = vmatprep.subr.bf16.mxu0 %v6302_v47 }
 0x739   : > { %4067 = vmatpush1.bf16.msra.mxu1 %v6297_v1 }
 0x73a   : > { %4686 = vmatpush1.bf16.msra.mxu0 %v6300_v48  ;;  %4068 = vmatprep.subr.bf16.mxu1 %v6305_v49 }
 0x73b   : > { %4687 = vmatprep.subr.bf16.mxu0 %v6308_v4 }
 0x73d   : > { %4069 = vmatpush1.bf16.msra.mxu1 %v6303_v13 }
 0x73e   : > { %4688 = vmatpush1.bf16.msra.mxu0 %v6306_v51  ;;  %4070 = vmatprep.subr.bf16.mxu1 %v6311_v53 }
 0x73f   : > { %4689 = vmatprep.subr.bf16.mxu0 %v6314_v14 }
 0x741   : > { %4071 = vmatpush1.bf16.msra.mxu1 %v6309_v45 }
 0x742   : > { %4690 = vmatpush1.bf16.msra.mxu0 %v6312_v54  ;;  %4072 = vmatprep.subr.bf16.mxu1 %v6317_v7 }
 0x743   : > { %4691 = vmatprep.subr.bf16.mxu0 %v6320_v55 }
 0x745   : > { %4073 = vmatpush1.bf16.msra.mxu1 %v6315_v56 }
 0x746   : > { %4692 = vmatpush1.bf16.msra.mxu0 %v6318_v57  ;;  %4074 = vmatprep.subr.bf16.mxu1 %v6323_v58 }
 0x747   : > { %4693 = vmatprep.subr.bf16.mxu0 %v6326_v59 }
 0x749   : > { %4075 = vmatpush1.bf16.msra.mxu1 %v6321_v61 }
 0x74a   : > { %4694 = vmatpush1.bf16.msra.mxu0 %v6324_v60  ;;  %4076 = vmatprep.subr.bf16.mxu1 %v6329_v5 }
 0x74b   : > { %4695 = vmatprep.subr.bf16.mxu0 %v6332_v8 }
 0x74d   : > { %4077 = vmatpush1.bf16.msra.mxu1 %v6327_v9 }
 0x74e   : > { %4696 = vmatpush1.bf16.msra.mxu0 %v6330_v11  ;;  %4078 = vmatprep.subr.bf16.mxu1 %v6335_v12 }
 0x74f   : > { %4697 = vmatprep.subr.bf16.mxu0 %v6338_v50 }
 0x751   : > { %4079 = vmatpush1.bf16.msra.mxu1 %v6333_v62 }
 0x752   : > { %4698 = vmatpush1.bf16.msra.mxu0 %v6336_v17  ;;  %4080 = vmatprep.subr.bf16.mxu1 %v6341_v16 }
 0x755   : > { %4081 = vmatpush1.bf16.msra.mxu1 %v6339_v21  ;;  %4700 = vmatmul.mubr.bf16.vlgmr.msra.gmra.mrb[40].mxu0 %v7730_v18  ;;  %v4725_v18 = vrot.slane %v4720_v63, %v6486_v10 }
 0x756   : > { %4709 = vmatprep.mubr.bf16.mxu0 %v4502_v23 }
 0x758   : > { %4083 = vmatmul.mubr.bf16.vlgmr.msra.gmra.mrb[44].mxu1 %v7698_v0  ;;  %v4103_v0 = vld [vmem:[%s7981_s10] sm:$0x3] }
 0x759   : > { %4092 = vmatprep.mubr.bf16.mxu1 %v7706_v27  ;;  %v4108_v20 = vrot.slane %v4103_v0, %v6486_v10 }
 0x75d   : > { %4710 = vmatmul.mubr.bf16.gmra.mrb[44].mxu0 %v4494_v25 }
 0x760   : > { %4093 = vmatmul.mubr.bf16.gmra.mrb[48].mxu1 %v7704_v26  ;;  %v4112_v26 = vrot.slane %v4103_v0, %v6599_v52 }
 0x828   : > { %v4701_v27 = vpop.f32.mrb[40].mxu0 }
 0x829   : > { %v4732_v28 = vadd.f32 %v4725_v18, %v4701_v27  ;;  %v4703_v29 = vpop.f32.mrb[41].mxu0 }
 0x82a   : > { %v4733_v30 = vadd.f32 %v4729_v19, %v4703_v29  ;;  %v4705_v31 = vpop.f32.mrb[42].mxu0 }
 0x82b   : > { %6342 = vtanh.f32 %v4732_v28  ;;  %v4084_v32 = vpop.f32.mrb[44].mxu1  ;;  %v4734_v33 = vadd.f32 %v4725_v18, %v4705_v31  ;;  %v4707_v34 = vpop.f32.mrb[43].mxu0 }
 0x82c   : > { %6344 = vtanh.f32 %v4733_v30  ;;  %v4115_v35 = vadd.f32 %v4108_v20, %v4084_v32  ;;  %v4086_v2 = vpop.f32.mrb[45].mxu1  ;;  %v4735_v36 = vadd.f32 %v4729_v19, %v4707_v34 }
 0x82d   : > { %6346 = vtanh.f32 %v4734_v33  ;;  %v4116_v37 = vadd.f32 %v4112_v26, %v4086_v2  ;;  %v4088_v38 = vpop.f32.mrb[46].mxu1 }
 0x82e   : > { %6348 = vtanh.f32 %v4115_v35  ;;  %v4117_v10 = vadd.f32 %v4108_v20, %v4088_v38  ;;  %v4090_v39 = vpop.f32.mrb[47].mxu1 }
 0x82f   : > { %6350 = vtanh.f32 %v4116_v37  ;;  %v4118_v40 = vadd.f32 %v4112_v26, %v4090_v39 }
 0x830   : > { %6352 = vtanh.f32 %v4735_v36  ;;  %v4711_v52 = vpop.f32.mrb[44].mxu0 }
 0x831   : > { %6354 = vtanh.f32 %v4117_v10  ;;  %v4736_v41 = vadd.f32 %v4725_v18, %v4711_v52  ;;  %v4713_v42 = vpop.f32.mrb[45].mxu0 }
 0x832   : > { %6356 = vtanh.f32 %v4118_v40  ;;  %v4737_v43 = vadd.f32 %v4729_v19, %v4713_v42  ;;  %v4715_v44 = vpop.f32.mrb[46].mxu0 }
 0x833   : > { %6358 = vtanh.f32 %v4736_v41  ;;  %v4094_v46 = vpop.f32.mrb[48].mxu1  ;;  %v4738_v6 = vadd.f32 %v4725_v18, %v4715_v44  ;;  %v4717_v47 = vpop.f32.mrb[47].mxu0 }
 0x834   : > { %6360 = vtanh.f32 %v4737_v43  ;;  %v4119_v1 = vadd.f32 %v4108_v20, %v4094_v46  ;;  %v4096_v48 = vpop.f32.mrb[49].mxu1  ;;  %v4739_v49 = vadd.f32 %v4729_v19, %v4717_v47 }
 0x835   : > { %v6343_v4 = vpop.eup %6342  ;;  %6362 = vtanh.f32 %v4738_v6  ;;  %v4120_v13 = vadd.f32 %v4112_v26, %v4096_v48  ;;  %v4098_v51 = vpop.f32.mrb[50].mxu1 }
 0x836   : > { %v6345_v53 = vpop.eup %6344  ;;  %4748 = vst [vmem:[%s7950_s28 + $0x10] sm:$0xff] %v6343_v4  ;;  %6364 = vtanh.f32 %v4119_v1  ;;  %v4121_v14 = vadd.f32 %v4108_v20, %v4098_v51  ;;  %v4100_v45 = vpop.f32.mrb[51].mxu1 }
 0x837   : > { %v6347_v54 = vpop.eup %6346  ;;  %4749 = vst [vmem:[%s7950_s28 + $0x18] sm:$0xff] %v6345_v53  ;;  %6366 = vtanh.f32 %v4120_v13  ;;  %v4122_v7 = vadd.f32 %v4112_v26, %v4100_v45 }
 0x838   : > { %v6349_v55 = vpop.eup %6348  ;;  %4750 = vst [vmem:[%s7950_s28 + $0x30] sm:$0xff] %v6347_v54  ;;  %6368 = vtanh.f32 %v4739_v49 }
 0x839   : > { %v6351_v56 = vpop.eup %6350  ;;  %4131 = vst [vmem:[%s7950_s28] sm:$0xff] %v6349_v55  ;;  %6370 = vtanh.f32 %v4121_v14 }
 0x83a   : > { %v6353_v57 = vpop.eup %6352  ;;  %4132 = vst [vmem:[%s7950_s28 + $0x8] sm:$0xff] %v6351_v56  ;;  %6372 = vtanh.f32 %v4122_v7 }
 0x83b   : > { %v6355_v58 = vpop.eup %6354  ;;  %4751 = vst [vmem:[%s7950_s28 + $0x38] sm:$0xff] %v6353_v57 }
 0x83c   : > { %v6357_v59 = vpop.eup %6356  ;;  %4133 = vst [vmem:[%s7950_s28 + $0x20] sm:$0xff] %v6355_v58 }
 0x83d   : > { %v6359_v61 = vpop.eup %6358  ;;  %4134 = vst [vmem:[%s7950_s28 + $0x28] sm:$0xff] %v6357_v59 }
 0x83e   : > { %v6361_v60 = vpop.eup %6360  ;;  %4752 = vst [vmem:[%s7950_s28 + $0x50] sm:$0xff] %v6359_v61 }
 0x83f   : > { %v6363_v5 = vpop.eup %6362  ;;  %4753 = vst [vmem:[%s7950_s28 + $0x58] sm:$0xff] %v6361_v60 }
 0x840   : > { %v6365_v8 = vpop.eup %6364  ;;  %4754 = vst [vmem:[%s7950_s28 + $0x70] sm:$0xff] %v6363_v5 }
 0x841   : > { %v6367_v9 = vpop.eup %6366  ;;  %4135 = vst [vmem:[%s7950_s28 + $0x40] sm:$0xff] %v6365_v8 }
 0x842   : > { %v6369_v11 = vpop.eup %6368  ;;  %4136 = vst [vmem:[%s7950_s28 + $0x48] sm:$0xff] %v6367_v9 }
 0x843   : > { %v6371_v12 = vpop.eup %6370  ;;  %4755 = vst [vmem:[%s7950_s28 + $0x78] sm:$0xff] %v6369_v11 }
 0x844   : > { %v6373_v50 = vpop.eup %6372  ;;  %4137 = vst [vmem:[%s7950_s28 + $0x60] sm:$0xff] %v6371_v12 }
 0x845   : > { %4138 = vst [vmem:[%s7950_s28 + $0x68] sm:$0xff] %v6373_v50 }
 0x846 PF: > { %s21_s17 = sadd.s32 1, %s6386_s17  }
 0x847   : > { %p18_p5 = scmp.ge.s32.totalorder %s21_s17, 4  }
 0x849   :  { %20 = sbr.rel (!%p18_p5) target bundleno = 1 (0x1), region = 106 }

</bundles_post_ra>
